<compile_context>
chip_gen: v6e
topology: v6e:2x2x1
jax: 0.10.0
libtpu: 0.0.40
codegen_flags: <defaults>
</compile_context>

<pallas_src>
import jax
import jax.numpy as jnp
from jax import lax
from jax.experimental import pallas as pl
from jax.experimental.pallas import tpu as pltpu

LANES = 128


# ------------------------- helpers -------------------------

def _round_up(n, m):
    return ((n + m - 1) // m) * m


def _pad_to(a, shape):
    pads = [(0, t - s) for s, t in zip(a.shape, shape)]
    return jnp.pad(a, pads)


def _pick_tile(m, cap=512):
    """Largest multiple of 8 that divides m and is <= cap; else the full extent."""
    for t in range(min(cap, (m // 8) * 8), 7, -8):
        if m % t == 0:
            return t
    return m


# ------------------------- Pallas kernels -------------------------

def _conv_relu_pool_kernel(c_ref, w_ref, b_ref, o_ref):
    """Fused conv-as-matmul + bias + ReLU + 2x2 max-pool.

    c_ref: (4, TILE_M, K) bf16 -- im2col rows for the 4 positions of each 2x2 pool window.
    w_ref: (K, NP)       bf16 -- conv weight (im2col layout), channels zero-padded to NP.
    b_ref: (1, NP)       f32  -- bias, zero-padded.
    o_ref: (TILE_M, NP)  f32  -- pooled activation rows (lane-dense, NP = 128).
    """
    w = w_ref[...]
    b = b_ref[...]
    acc = None
    for q in range(4):  # unrolled; 4 quadrants partition the rows -> same total MXU work
        z = jnp.dot(c_ref[q], w, preferred_element_type=jnp.float32) + b
        z = jnp.maximum(z, 0.0)                              # ReLU (f32 VPU)
        acc = z if acc is None else jnp.maximum(acc, z)      # 2x2 max-pool
    o_ref[...] = acc.astype(o_ref.dtype)


def _mlp_kernel(x_ref, w1_ref, b1_ref, w2_ref, b2_ref, w3_ref, b3_ref, o_ref):
    """fc1+ReLU -> fc2+ReLU -> fc3 chained in VMEM (no inter-layer HBM round trips)."""
    h = jnp.dot(x_ref[...], w1_ref[...], preferred_element_type=jnp.float32)
    h = jnp.maximum(h + b1_ref[...], 0.0)
    h = jnp.dot(h.astype(jnp.bfloat16), w2_ref[...], preferred_element_type=jnp.float32)
    h = jnp.maximum(h + b2_ref[...], 0.0)
    o = jnp.dot(h.astype(jnp.bfloat16), w3_ref[...], preferred_element_type=jnp.float32)
    o_ref[...] = (o + b3_ref[...]).astype(o_ref.dtype)


# ------------------------- wrappers -------------------------

def conv_relu_pool(x_nchw, w, b):
    """Valid conv (stride 1) + bias + ReLU + 2x2/stride-2 max-pool.

    x_nchw: (B, C_in, H, W); w: (C_out, C_in, k, k) PyTorch layout; b: (C_out,).
    Returns pooled activation in NHWC: (B, OH//2, OW//2, C_out).
    """
    C_out, C_in, k, _ = w.shape
    B, _, H, W = x_nchw.shape
    OH, OW = H - k + 1, W - k + 1
    PH, PW = OH // 2, OW // 2
    Kc = C_in * k * k

    # im2col patches; column order (c_in, kh, kw) matches torch weight.view(C_out, -1).
    patches = lax.conv_general_dilated_patches(
        x_nchw.astype(jnp.bfloat16), (k, k), (1, 1), 'VALID',
        dimension_numbers=('NCHW', 'OIHW', 'NCHW'))            # (B, Kc, OH, OW)
    p = patches.transpose(0, 2, 3, 1)                          # (B, OH, OW, Kc)
    # Split rows into the 4 positions of each 2x2 pool window so the kernel fuses the pool.
    cols4 = jnp.stack(
        [p[:, 0::2, 0::2], p[:, 0::2, 1::2], p[:, 1::2, 0::2], p[:, 1::2, 1::2]],
        axis=0,
    ).reshape(4, B * PH * PW, Kc)

    NP = _round_up(C_out, LANES)  # lane-dense output stores
    wp = _pad_to(w.reshape(C_out, Kc).T, (Kc, NP)).astype(jnp.bfloat16)
    bp = _pad_to(b, (NP,)).reshape(1, NP).astype(jnp.float32)

    M = B * PH * PW
    tile_m = _pick_tile(M)
    out = pl.pallas_call(
        _conv_relu_pool_kernel,
        out_shape=jax.ShapeDtypeStruct((M, NP), jnp.float32),
        grid=(M // tile_m,),
        in_specs=[
            pl.BlockSpec((4, tile_m, Kc), lambda i: (0, i, 0)),
            pl.BlockSpec((Kc, NP), lambda i: (0, 0)),   # weights: same block every step -> resident
            pl.BlockSpec((1, NP), lambda i: (0, 0)),
        ],
        out_specs=pl.BlockSpec((tile_m, NP), lambda i: (i, 0)),
        compiler_params=pltpu.CompilerParams(dimension_semantics=("parallel",)),
    )(cols4, wp, bp)
    return out[:, :C_out].reshape(B, PH, PW, C_out)


def mlp_head(x_flat, params):
    B, D = x_flat.shape                                        # (B, 400)
    H1 = _round_up(params["fc1_w"].shape[0], LANES)            # 120 -> 128
    H2 = _round_up(params["fc2_w"].shape[0], LANES)            # 84  -> 128
    H3 = _round_up(params["fc3_w"].shape[0], LANES)            # 10  -> 128
    n_out = params["fc3_w"].shape[0]

    w1 = _pad_to(params["fc1_w"].T, (D, H1)).astype(jnp.bfloat16)
    b1 = _pad_to(params["fc1_b"], (H1,)).reshape(1, H1).astype(jnp.float32)
    w2 = _pad_to(params["fc2_w"].T, (H1, H2)).astype(jnp.bfloat16)
    b2 = _pad_to(params["fc2_b"], (H2,)).reshape(1, H2).astype(jnp.float32)
    w3 = _pad_to(params["fc3_w"].T, (H2, H3)).astype(jnp.bfloat16)
    b3 = _pad_to(params["fc3_b"], (H3,)).reshape(1, H3).astype(jnp.float32)

    tile_b = _pick_tile(B, cap=256)
    out = pl.pallas_call(
        _mlp_kernel,
        out_shape=jax.ShapeDtypeStruct((B, H3), jnp.float32),
        grid=(B // tile_b,),
        in_specs=[
            pl.BlockSpec((tile_b, D), lambda i: (i, 0)),
            pl.BlockSpec((D, H1), lambda i: (0, 0)),
            pl.BlockSpec((1, H1), lambda i: (0, 0)),
            pl.BlockSpec((H1, H2), lambda i: (0, 0)),
            pl.BlockSpec((1, H2), lambda i: (0, 0)),
            pl.BlockSpec((H2, H3), lambda i: (0, 0)),
            pl.BlockSpec((1, H3), lambda i: (0, 0)),
        ],
        out_specs=pl.BlockSpec((tile_b, H3), lambda i: (i, 0)),
        compiler_params=pltpu.CompilerParams(dimension_semantics=("parallel",)),
    )(x_flat.astype(jnp.bfloat16), w1, b1, w2, b2, w3, b3)
    return out[:, :n_out]


def lenet5_forward(x, params):
    """x: (B, 3, 32, 32) NCHW -> (B, 10) logits."""
    B = x.shape[0]
    a1 = conv_relu_pool(x, params["conv1_w"], params["conv1_b"])           # (B, 14, 14, 6)
    a2 = conv_relu_pool(a1.transpose(0, 3, 1, 2),
                        params["conv2_w"], params["conv2_b"])              # (B, 5, 5, 16)
    flat = a2.transpose(0, 3, 1, 2).reshape(B, -1)                         # torch NCHW flatten
    return mlp_head(flat, params)                                          # (B, 10)


# ------------------------- reference & init -------------------------

def lenet5_reference(x, params):
    """Pure-JAX f32 reference matching the PyTorch forward."""
    def conv(z, w, b):
        y = lax.conv_general_dilated(z, w, (1, 1), 'VALID',
                                     dimension_numbers=('NCHW', 'OIHW', 'NCHW'))
        return y + b.reshape(1, -1, 1, 1)

    def pool(z):
        return lax.reduce_window(z, -jnp.inf, lax.max, (1, 1, 2, 2), (1, 1, 2, 2), 'VALID')

    y = pool(jax.nn.relu(conv(x, params["conv1_w"], params["conv1_b"])))
    y = pool(jax.nn.relu(conv(y, params["conv2_w"], params["conv2_b"])))
    y = y.reshape(y.shape[0], -1)
    y = jax.nn.relu(y @ params["fc1_w"].T + params["fc1_b"])
    y = jax.nn.relu(y @ params["fc2_w"].T + params["fc2_b"])
    return y @ params["fc3_w"].T + params["fc3_b"]


def init_params(key):
    """Deterministic init mimicking PyTorch default (uniform +-1/sqrt(fan_in))."""
    def uinit(k, shape, fan_in):
        bound = 1.0 / float(fan_in) ** 0.5
        return jax.random.uniform(k, shape, jnp.float32, -bound, bound)

    ks = jax.random.split(key, 10)
    return {
        "conv1_w": uinit(ks[0], (6, 3, 5, 5), 3 * 5 * 5),
        "conv1_b": uinit(ks[1], (6,), 3 * 5 * 5),
        "conv2_w": uinit(ks[2], (16, 6, 5, 5), 6 * 5 * 5),
        "conv2_b": uinit(ks[3], (16,), 6 * 5 * 5),
        "fc1_w": uinit(ks[4], (120, 400), 400),
        "fc1_b": uinit(ks[5], (120,), 400),
        "fc2_w": uinit(ks[6], (84, 120), 120),
        "fc2_b": uinit(ks[7], (84,), 120),
        "fc3_w": uinit(ks[8], (10, 84), 84),
        "fc3_b": uinit(ks[9], (10,), 84),
    }


if __name__ == "__main__":
    key = jax.random.PRNGKey(0)
    k_x, k_p = jax.random.split(key)
    # CIFAR-10 geometry is required by the FC shapes (16*5*5 = 400): 32x32 RGB.
    B = 2
    x = jax.random.normal(k_x, (B, 3, 32, 32), jnp.float32)
    params = init_params(k_p)

    fwd = jax.jit(lenet5_forward)
    out = jax.block_until_ready(fwd(x, params))

    assert out.shape == (B, 10), out.shape
    assert out.dtype == jnp.float32
    assert bool(jnp.all(jnp.isfinite(out)))

    ref = lenet5_reference(x, params)
    err = float(jnp.max(jnp.abs(out - ref)))
    assert err < 1e-1, f"max |pallas - reference| = {err}"  # bf16-MXU tolerance

    print("KERNEL_OK")
</pallas_src>

<mosaic_0001>
module attributes {stable_mosaic.version = 11 : i64} {
  func.func @_conv_relu_pool_kernel(%arg0: i32, %arg1: memref<4x392x75xbf16, #tpu.memory_space<vmem>>, %arg2: memref<75x128xbf16, #tpu.memory_space<vmem>>, %arg3: memref<1x128xf32, #tpu.memory_space<vmem>>, %arg4: memref<392x128xf32, #tpu.memory_space<vmem>>) attributes {dimension_semantics = [#tpu.dimension_semantics<parallel>], iteration_bounds = array<i64: 1>, scalar_prefetch = 0 : i64, scratch_operands = 0 : i64, tpu.core_type = #tpu.core_type<tc>, window_params = [{transform_indices = @transform_0, window_bounds = array<i64: 4, 392, 75>}, {pipeline_mode = #tpu.pipeline_mode<synchronous>, transform_indices = @transform_1, window_bounds = array<i64: 75, 128>}, {pipeline_mode = #tpu.pipeline_mode<synchronous>, transform_indices = @transform_2, window_bounds = array<i64: 1, 128>}, {transform_indices = @transform_3, window_bounds = array<i64: 392, 128>}]} {
    %c0 = arith.constant 0 : index
    %c0_0 = arith.constant 0 : index
    %0 = vector.load %arg2[%c0, %c0_0] : memref<75x128xbf16, #tpu.memory_space<vmem>>, vector<75x128xbf16>
    %c0_1 = arith.constant 0 : index
    %c0_2 = arith.constant 0 : index
    %1 = vector.load %arg3[%c0_1, %c0_2] : memref<1x128xf32, #tpu.memory_space<vmem>>, vector<1x128xf32>
    %c0_3 = arith.constant 0 : index
    %c0_4 = arith.constant 0 : index
    %c0_5 = arith.constant 0 : index
    %2 = vector.load %arg1[%c0_3, %c0_4, %c0_5] : memref<4x392x75xbf16, #tpu.memory_space<vmem>>, vector<1x392x75xbf16>
    %3 = vector.shape_cast %2 : vector<1x392x75xbf16> to vector<392x75xbf16>
    %cst = arith.constant dense<0.000000e+00> : vector<392x128xf32>
    %4 = tpu.matmul %3, %0, %cst {dimension_numbers = #tpu.dot_dimension_numbers<[1], [0], [0], [1], [0, 0, 1, 1], [], []>} : vector<392x75xbf16>, vector<75x128xbf16>, vector<392x128xf32> -> vector<392x128xf32>
    %5 = vector.broadcast %1 : vector<1x128xf32> to vector<392x128xf32>
    %6 = arith.addf %4, %5 : vector<392x128xf32>
    %cst_6 = arith.constant 0.000000e+00 : f32
    %7 = vector.broadcast %cst_6 : f32 to vector<392x128xf32>
    %8 = arith.maximumf %6, %7 : vector<392x128xf32>
    %c1 = arith.constant 1 : index
    %c0_7 = arith.constant 0 : index
    %c0_8 = arith.constant 0 : index
    %9 = vector.load %arg1[%c1, %c0_7, %c0_8] : memref<4x392x75xbf16, #tpu.memory_space<vmem>>, vector<1x392x75xbf16>
    %10 = vector.shape_cast %9 : vector<1x392x75xbf16> to vector<392x75xbf16>
    %cst_9 = arith.constant dense<0.000000e+00> : vector<392x128xf32>
    %11 = tpu.matmul %10, %0, %cst_9 {dimension_numbers = #tpu.dot_dimension_numbers<[1], [0], [0], [1], [0, 0, 1, 1], [], []>} : vector<392x75xbf16>, vector<75x128xbf16>, vector<392x128xf32> -> vector<392x128xf32>
    %12 = vector.broadcast %1 : vector<1x128xf32> to vector<392x128xf32>
    %13 = arith.addf %11, %12 : vector<392x128xf32>
    %cst_10 = arith.constant 0.000000e+00 : f32
    %14 = vector.broadcast %cst_10 : f32 to vector<392x128xf32>
    %15 = arith.maximumf %13, %14 : vector<392x128xf32>
    %16 = arith.maximumf %8, %15 : vector<392x128xf32>
    %c2 = arith.constant 2 : index
    %c0_11 = arith.constant 0 : index
    %c0_12 = arith.constant 0 : index
    %17 = vector.load %arg1[%c2, %c0_11, %c0_12] : memref<4x392x75xbf16, #tpu.memory_space<vmem>>, vector<1x392x75xbf16>
    %18 = vector.shape_cast %17 : vector<1x392x75xbf16> to vector<392x75xbf16>
    %cst_13 = arith.constant dense<0.000000e+00> : vector<392x128xf32>
    %19 = tpu.matmul %18, %0, %cst_13 {dimension_numbers = #tpu.dot_dimension_numbers<[1], [0], [0], [1], [0, 0, 1, 1], [], []>} : vector<392x75xbf16>, vector<75x128xbf16>, vector<392x128xf32> -> vector<392x128xf32>
    %20 = vector.broadcast %1 : vector<1x128xf32> to vector<392x128xf32>
    %21 = arith.addf %19, %20 : vector<392x128xf32>
    %cst_14 = arith.constant 0.000000e+00 : f32
    %22 = vector.broadcast %cst_14 : f32 to vector<392x128xf32>
    %23 = arith.maximumf %21, %22 : vector<392x128xf32>
    %24 = arith.maximumf %16, %23 : vector<392x128xf32>
    %c3 = arith.constant 3 : index
    %c0_15 = arith.constant 0 : index
    %c0_16 = arith.constant 0 : index
    %25 = vector.load %arg1[%c3, %c0_15, %c0_16] : memref<4x392x75xbf16, #tpu.memory_space<vmem>>, vector<1x392x75xbf16>
    %26 = vector.shape_cast %25 : vector<1x392x75xbf16> to vector<392x75xbf16>
    %cst_17 = arith.constant dense<0.000000e+00> : vector<392x128xf32>
    %27 = tpu.matmul %26, %0, %cst_17 {dimension_numbers = #tpu.dot_dimension_numbers<[1], [0], [0], [1], [0, 0, 1, 1], [], []>} : vector<392x75xbf16>, vector<75x128xbf16>, vector<392x128xf32> -> vector<392x128xf32>
    %28 = vector.broadcast %1 : vector<1x128xf32> to vector<392x128xf32>
    %29 = arith.addf %27, %28 : vector<392x128xf32>
    %cst_18 = arith.constant 0.000000e+00 : f32
    %30 = vector.broadcast %cst_18 : f32 to vector<392x128xf32>
    %31 = arith.maximumf %29, %30 : vector<392x128xf32>
    %32 = arith.maximumf %24, %31 : vector<392x128xf32>
    %c0_19 = arith.constant 0 : index
    %c0_20 = arith.constant 0 : index
    %33 = vector.load %arg4[%c0_19, %c0_20] : memref<392x128xf32, #tpu.memory_space<vmem>>, vector<392x128xf32>
    tpu.vector_store %arg4[%c0_19, %c0_20], %32 {strides = array<i32>} : memref<392x128xf32, #tpu.memory_space<vmem>>, vector<392x128xf32>,
    return
  }
  func.func @transform_0(%arg0: i32) -> (i32, i32, i32) {
    %c0_i32 = arith.constant 0 : i32
    %c0_i32_0 = arith.constant 0 : i32
    %c0_i32_1 = arith.constant 0 : i32
    return %c0_i32, %arg0, %c0_i32_0 : i32, i32, i32
  }
  func.func @transform_1(%arg0: i32) -> (i32, i32) {
    %c0_i32 = arith.constant 0 : i32
    %c0_i32_0 = arith.constant 0 : i32
    %c0_i32_1 = arith.constant 0 : i32
    return %c0_i32, %c0_i32_0 : i32, i32
  }
  func.func @transform_2(%arg0: i32) -> (i32, i32) {
    %c0_i32 = arith.constant 0 : i32
    %c0_i32_0 = arith.constant 0 : i32
    %c0_i32_1 = arith.constant 0 : i32
    return %c0_i32, %c0_i32_0 : i32, i32
  }
  func.func @transform_3(%arg0: i32) -> (i32, i32) {
    %c0_i32 = arith.constant 0 : i32
    %c0_i32_0 = arith.constant 0 : i32
    return %arg0, %c0_i32 : i32, i32
  }
}

module attributes {stable_mosaic.version = 11 : i64} {
  func.func @_conv_relu_pool_kernel(%arg0: i32, %arg1: memref<4x50x150xbf16, #tpu.memory_space<vmem>>, %arg2: memref<150x128xbf16, #tpu.memory_space<vmem>>, %arg3: memref<1x128xf32, #tpu.memory_space<vmem>>, %arg4: memref<50x128xf32, #tpu.memory_space<vmem>>) attributes {dimension_semantics = [#tpu.dimension_semantics<parallel>], iteration_bounds = array<i64: 1>, scalar_prefetch = 0 : i64, scratch_operands = 0 : i64, tpu.core_type = #tpu.core_type<tc>, window_params = [{transform_indices = @transform_0, window_bounds = array<i64: 4, 50, 150>}, {pipeline_mode = #tpu.pipeline_mode<synchronous>, transform_indices = @transform_1, window_bounds = array<i64: 150, 128>}, {pipeline_mode = #tpu.pipeline_mode<synchronous>, transform_indices = @transform_2, window_bounds = array<i64: 1, 128>}, {transform_indices = @transform_3, window_bounds = array<i64: 50, 128>}]} {
    %c0 = arith.constant 0 : index
    %c0_0 = arith.constant 0 : index
    %0 = vector.load %arg2[%c0, %c0_0] : memref<150x128xbf16, #tpu.memory_space<vmem>>, vector<150x128xbf16>
    %c0_1 = arith.constant 0 : index
    %c0_2 = arith.constant 0 : index
    %1 = vector.load %arg3[%c0_1, %c0_2] : memref<1x128xf32, #tpu.memory_space<vmem>>, vector<1x128xf32>
    %c0_3 = arith.constant 0 : index
    %c0_4 = arith.constant 0 : index
    %c0_5 = arith.constant 0 : index
    %2 = vector.load %arg1[%c0_3, %c0_4, %c0_5] : memref<4x50x150xbf16, #tpu.memory_space<vmem>>, vector<1x50x150xbf16>
    %3 = vector.shape_cast %2 : vector<1x50x150xbf16> to vector<50x150xbf16>
    %cst = arith.constant dense<0.000000e+00> : vector<50x128xf32>
    %4 = tpu.matmul %3, %0, %cst {dimension_numbers = #tpu.dot_dimension_numbers<[1], [0], [0], [1], [0, 0, 1, 1], [], []>} : vector<50x150xbf16>, vector<150x128xbf16>, vector<50x128xf32> -> vector<50x128xf32>
    %5 = vector.broadcast %1 : vector<1x128xf32> to vector<50x128xf32>
    %6 = arith.addf %4, %5 : vector<50x128xf32>
    %cst_6 = arith.constant 0.000000e+00 : f32
    %7 = vector.broadcast %cst_6 : f32 to vector<50x128xf32>
    %8 = arith.maximumf %6, %7 : vector<50x128xf32>
    %c1 = arith.constant 1 : index
    %c0_7 = arith.constant 0 : index
    %c0_8 = arith.constant 0 : index
    %9 = vector.load %arg1[%c1, %c0_7, %c0_8] : memref<4x50x150xbf16, #tpu.memory_space<vmem>>, vector<1x50x150xbf16>
    %10 = vector.shape_cast %9 : vector<1x50x150xbf16> to vector<50x150xbf16>
    %cst_9 = arith.constant dense<0.000000e+00> : vector<50x128xf32>
    %11 = tpu.matmul %10, %0, %cst_9 {dimension_numbers = #tpu.dot_dimension_numbers<[1], [0], [0], [1], [0, 0, 1, 1], [], []>} : vector<50x150xbf16>, vector<150x128xbf16>, vector<50x128xf32> -> vector<50x128xf32>
    %12 = vector.broadcast %1 : vector<1x128xf32> to vector<50x128xf32>
    %13 = arith.addf %11, %12 : vector<50x128xf32>
    %cst_10 = arith.constant 0.000000e+00 : f32
    %14 = vector.broadcast %cst_10 : f32 to vector<50x128xf32>
    %15 = arith.maximumf %13, %14 : vector<50x128xf32>
    %16 = arith.maximumf %8, %15 : vector<50x128xf32>
    %c2 = arith.constant 2 : index
    %c0_11 = arith.constant 0 : index
    %c0_12 = arith.constant 0 : index
    %17 = vector.load %arg1[%c2, %c0_11, %c0_12] : memref<4x50x150xbf16, #tpu.memory_space<vmem>>, vector<1x50x150xbf16>
    %18 = vector.shape_cast %17 : vector<1x50x150xbf16> to vector<50x150xbf16>
    %cst_13 = arith.constant dense<0.000000e+00> : vector<50x128xf32>
    %19 = tpu.matmul %18, %0, %cst_13 {dimension_numbers = #tpu.dot_dimension_numbers<[1], [0], [0], [1], [0, 0, 1, 1], [], []>} : vector<50x150xbf16>, vector<150x128xbf16>, vector<50x128xf32> -> vector<50x128xf32>
    %20 = vector.broadcast %1 : vector<1x128xf32> to vector<50x128xf32>
    %21 = arith.addf %19, %20 : vector<50x128xf32>
    %cst_14 = arith.constant 0.000000e+00 : f32
    %22 = vector.broadcast %cst_14 : f32 to vector<50x128xf32>
    %23 = arith.maximumf %21, %22 : vector<50x128xf32>
    %24 = arith.maximumf %16, %23 : vector<50x128xf32>
    %c3 = arith.constant 3 : index
    %c0_15 = arith.constant 0 : index
    %c0_16 = arith.constant 0 : index
    %25 = vector.load %arg1[%c3, %c0_15, %c0_16] : memref<4x50x150xbf16, #tpu.memory_space<vmem>>, vector<1x50x150xbf16>
    %26 = vector.shape_cast %25 : vector<1x50x150xbf16> to vector<50x150xbf16>
    %cst_17 = arith.constant dense<0.000000e+00> : vector<50x128xf32>
    %27 = tpu.matmul %26, %0, %cst_17 {dimension_numbers = #tpu.dot_dimension_numbers<[1], [0], [0], [1], [0, 0, 1, 1], [], []>} : vector<50x150xbf16>, vector<150x128xbf16>, vector<50x128xf32> -> vector<50x128xf32>
    %28 = vector.broadcast %1 : vector<1x128xf32> to vector<50x128xf32>
    %29 = arith.addf %27, %28 : vector<50x128xf32>
    %cst_18 = arith.constant 0.000000e+00 : f32
    %30 = vector.broadcast %cst_18 : f32 to vector<50x128xf32>
    %31 = arith.maximumf %29, %30 : vector<50x128xf32>
    %32 = arith.maximumf %24, %31 : vector<50x128xf32>
    %c0_19 = arith.constant 0 : index
    %c0_20 = arith.constant 0 : index
    %33 = vector.load %arg4[%c0_19, %c0_20] : memref<50x128xf32, #tpu.memory_space<vmem>>, vector<50x128xf32>
    tpu.vector_store %arg4[%c0_19, %c0_20], %32 {strides = array<i32>} : memref<50x128xf32, #tpu.memory_space<vmem>>, vector<50x128xf32>,
    return
  }
  func.func @transform_0(%arg0: i32) -> (i32, i32, i32) {
    %c0_i32 = arith.constant 0 : i32
    %c0_i32_0 = arith.constant 0 : i32
    %c0_i32_1 = arith.constant 0 : i32
    return %c0_i32, %arg0, %c0_i32_0 : i32, i32, i32
  }
  func.func @transform_1(%arg0: i32) -> (i32, i32) {
    %c0_i32 = arith.constant 0 : i32
    %c0_i32_0 = arith.constant 0 : i32
    %c0_i32_1 = arith.constant 0 : i32
    return %c0_i32, %c0_i32_0 : i32, i32
  }
  func.func @transform_2(%arg0: i32) -> (i32, i32) {
    %c0_i32 = arith.constant 0 : i32
    %c0_i32_0 = arith.constant 0 : i32
    %c0_i32_1 = arith.constant 0 : i32
    return %c0_i32, %c0_i32_0 : i32, i32
  }
  func.func @transform_3(%arg0: i32) -> (i32, i32) {
    %c0_i32 = arith.constant 0 : i32
    %c0_i32_0 = arith.constant 0 : i32
    return %arg0, %c0_i32 : i32, i32
  }
}

module attributes {stable_mosaic.version = 11 : i64} {
  func.func @_mlp_kernel(%arg0: i32, %arg1: memref<2x400xbf16, #tpu.memory_space<vmem>>, %arg2: memref<400x128xbf16, #tpu.memory_space<vmem>>, %arg3: memref<1x128xf32, #tpu.memory_space<vmem>>, %arg4: memref<128x128xbf16, #tpu.memory_space<vmem>>, %arg5: memref<1x128xf32, #tpu.memory_space<vmem>>, %arg6: memref<128x128xbf16, #tpu.memory_space<vmem>>, %arg7: memref<1x128xf32, #tpu.memory_space<vmem>>, %arg8: memref<2x128xf32, #tpu.memory_space<vmem>>) attributes {dimension_semantics = [#tpu.dimension_semantics<parallel>], iteration_bounds = array<i64: 1>, scalar_prefetch = 0 : i64, scratch_operands = 0 : i64, tpu.core_type = #tpu.core_type<tc>, window_params = [{transform_indices = @transform_0, window_bounds = array<i64: 2, 400>}, {pipeline_mode = #tpu.pipeline_mode<synchronous>, transform_indices = @transform_1, window_bounds = array<i64: 400, 128>}, {pipeline_mode = #tpu.pipeline_mode<synchronous>, transform_indices = @transform_2, window_bounds = array<i64: 1, 128>}, {pipeline_mode = #tpu.pipeline_mode<synchronous>, transform_indices = @transform_3, window_bounds = array<i64: 128, 128>}, {pipeline_mode = #tpu.pipeline_mode<synchronous>, transform_indices = @transform_4, window_bounds = array<i64: 1, 128>}, {pipeline_mode = #tpu.pipeline_mode<synchronous>, transform_indices = @transform_5, window_bounds = array<i64: 128, 128>}, {pipeline_mode = #tpu.pipeline_mode<synchronous>, transform_indices = @transform_6, window_bounds = array<i64: 1, 128>}, {transform_indices = @transform_7, window_bounds = array<i64: 2, 128>}]} {
    %c0 = arith.constant 0 : index
    %c0_0 = arith.constant 0 : index
    %0 = vector.load %arg1[%c0, %c0_0] : memref<2x400xbf16, #tpu.memory_space<vmem>>, vector<2x400xbf16>
    %c0_1 = arith.constant 0 : index
    %c0_2 = arith.constant 0 : index
    %1 = vector.load %arg2[%c0_1, %c0_2] : memref<400x128xbf16, #tpu.memory_space<vmem>>, vector<400x128xbf16>
    %cst = arith.constant dense<0.000000e+00> : vector<2x128xf32>
    %2 = tpu.matmul %0, %1, %cst {dimension_numbers = #tpu.dot_dimension_numbers<[1], [0], [0], [1], [0, 0, 1, 1], [], []>} : vector<2x400xbf16>, vector<400x128xbf16>, vector<2x128xf32> -> vector<2x128xf32>
    %c0_3 = arith.constant 0 : index
    %c0_4 = arith.constant 0 : index
    %3 = vector.load %arg3[%c0_3, %c0_4] : memref<1x128xf32, #tpu.memory_space<vmem>>, vector<1x128xf32>
    %4 = vector.broadcast %3 : vector<1x128xf32> to vector<2x128xf32>
    %5 = arith.addf %2, %4 : vector<2x128xf32>
    %cst_5 = arith.constant 0.000000e+00 : f32
    %6 = vector.broadcast %cst_5 : f32 to vector<2x128xf32>
    %7 = arith.maximumf %5, %6 : vector<2x128xf32>
    %8 = arith.truncf %7 : vector<2x128xf32> to vector<2x128xbf16>
    %c0_6 = arith.constant 0 : index
    %c0_7 = arith.constant 0 : index
    %9 = vector.load %arg4[%c0_6, %c0_7] : memref<128x128xbf16, #tpu.memory_space<vmem>>, vector<128x128xbf16>
    %cst_8 = arith.constant dense<0.000000e+00> : vector<2x128xf32>
    %10 = tpu.matmul %8, %9, %cst_8 {dimension_numbers = #tpu.dot_dimension_numbers<[1], [0], [0], [1], [0, 0, 1, 1], [], []>} : vector<2x128xbf16>, vector<128x128xbf16>, vector<2x128xf32> -> vector<2x128xf32>
    %c0_9 = arith.constant 0 : index
    %c0_10 = arith.constant 0 : index
    %11 = vector.load %arg5[%c0_9, %c0_10] : memref<1x128xf32, #tpu.memory_space<vmem>>, vector<1x128xf32>
    %12 = vector.broadcast %11 : vector<1x128xf32> to vector<2x128xf32>
    %13 = arith.addf %10, %12 : vector<2x128xf32>
    %cst_11 = arith.constant 0.000000e+00 : f32
    %14 = vector.broadcast %cst_11 : f32 to vector<2x128xf32>
    %15 = arith.maximumf %13, %14 : vector<2x128xf32>
    %16 = arith.truncf %15 : vector<2x128xf32> to vector<2x128xbf16>
    %c0_12 = arith.constant 0 : index
    %c0_13 = arith.constant 0 : index
    %17 = vector.load %arg6[%c0_12, %c0_13] : memref<128x128xbf16, #tpu.memory_space<vmem>>, vector<128x128xbf16>
    %cst_14 = arith.constant dense<0.000000e+00> : vector<2x128xf32>
    %18 = tpu.matmul %16, %17, %cst_14 {dimension_numbers = #tpu.dot_dimension_numbers<[1], [0], [0], [1], [0, 0, 1, 1], [], []>} : vector<2x128xbf16>, vector<128x128xbf16>, vector<2x128xf32> -> vector<2x128xf32>
    %c0_15 = arith.constant 0 : index
    %c0_16 = arith.constant 0 : index
    %19 = vector.load %arg7[%c0_15, %c0_16] : memref<1x128xf32, #tpu.memory_space<vmem>>, vector<1x128xf32>
    %20 = vector.broadcast %19 : vector<1x128xf32> to vector<2x128xf32>
    %21 = arith.addf %18, %20 : vector<2x128xf32>
    %c0_17 = arith.constant 0 : index
    %c0_18 = arith.constant 0 : index
    %22 = vector.load %arg8[%c0_17, %c0_18] : memref<2x128xf32, #tpu.memory_space<vmem>>, vector<2x128xf32>
    tpu.vector_store %arg8[%c0_17, %c0_18], %21 {strides = array<i32>} : memref<2x128xf32, #tpu.memory_space<vmem>>, vector<2x128xf32>,
    return
  }
  func.func @transform_0(%arg0: i32) -> (i32, i32) {
    %c0_i32 = arith.constant 0 : i32
    %c0_i32_0 = arith.constant 0 : i32
    return %arg0, %c0_i32 : i32, i32
  }
  func.func @transform_1(%arg0: i32) -> (i32, i32) {
    %c0_i32 = arith.constant 0 : i32
    %c0_i32_0 = arith.constant 0 : i32
    %c0_i32_1 = arith.constant 0 : i32
    return %c0_i32, %c0_i32_0 : i32, i32
  }
  func.func @transform_2(%arg0: i32) -> (i32, i32) {
    %c0_i32 = arith.constant 0 : i32
    %c0_i32_0 = arith.constant 0 : i32
    %c0_i32_1 = arith.constant 0 : i32
    return %c0_i32, %c0_i32_0 : i32, i32
  }
  func.func @transform_3(%arg0: i32) -> (i32, i32) {
    %c0_i32 = arith.constant 0 : i32
    %c0_i32_0 = arith.constant 0 : i32
    %c0_i32_1 = arith.constant 0 : i32
    return %c0_i32, %c0_i32_0 : i32, i32
  }
  func.func @transform_4(%arg0: i32) -> (i32, i32) {
    %c0_i32 = arith.constant 0 : i32
    %c0_i32_0 = arith.constant 0 : i32
    %c0_i32_1 = arith.constant 0 : i32
    return %c0_i32, %c0_i32_0 : i32, i32
  }
  func.func @transform_5(%arg0: i32) -> (i32, i32) {
    %c0_i32 = arith.constant 0 : i32
    %c0_i32_0 = arith.constant 0 : i32
    %c0_i32_1 = arith.constant 0 : i32
    return %c0_i32, %c0_i32_0 : i32, i32
  }
  func.func @transform_6(%arg0: i32) -> (i32, i32) {
    %c0_i32 = arith.constant 0 : i32
    %c0_i32_0 = arith.constant 0 : i32
    %c0_i32_1 = arith.constant 0 : i32
    return %c0_i32, %c0_i32_0 : i32, i32
  }
  func.func @transform_7(%arg0: i32) -> (i32, i32) {
    %c0_i32 = arith.constant 0 : i32
    %c0_i32_0 = arith.constant 0 : i32
    return %arg0, %c0_i32 : i32, i32
  }
}

</mosaic_0001>

<bundles_post_ra>
// kernel: lenet5_forward.3
= control target key start
LH: loop header
LB: loop body
LE: loop exit
PB: predicated region body
PF: predicated region fallthrough
CT: control target
= control target key end

     0   :  { %vm309_vm0 = vcmask 1044480   ;;  %vm310_vm1 = vcmask 1045504   ;;  %v4574_v0 = vmov 0.0   ;;  %v3408_v2 = vmov 65535   ;;  %s4570_s1 = inlined_call_operand.vmem [shape: bf16[75,128], index: 1, kind: input, shape index: {}]   ;;  %s4571_s0 = inlined_call_operand.vmem [shape: bf16[4,392,75], index: 0, kind: input, shape index: {}]   ;;  %s4572_s2 = inlined_call_operand.vmem [shape: f32[1,128], index: 2, kind: input, shape index: {}]   ;;  %s4573_s3 = inlined_call_operand.vmem [shape: f32[392,128], index: 3, kind: output, shape index: {}]  }
   0x1   :  { %2857 = vmatprep.subr.bf16.mxu0 %v4574_v0  ;;  %2967 = vmatprep.subr.bf16.mxu1 %v4574_v0  ;;  %v3300_v1 = vld [vmem:[%s4570_s1 + $0x20] sm:$0x3f]   ;;  %v311_v3 = vsel %vm309_vm0, 4294967295, %v3408_v2  ;;  %vm3409_vm2 = vmmov 0   ;;  %v3301_v6 = vld [vmem:[%s4570_s1 + $0x18] sm:$0xff]   ;;  %v3302_v7 = vld [vmem:[%s4570_s1 + $0x10] sm:$0xff]  }
   0x2   :  { %v312_v4 = vsel %vm310_vm1, %v311_v3, 0  ;;  %2867 = vmatprep.mubr.msk.bf16.mxu0 %vm3409_vm2, %v4574_v0  ;;  %2977 = vmatprep.mubr.msk.bf16.mxu1 %vm3409_vm2, %v4574_v0  ;;  %v3303_v8 = vld [vmem:[%s4570_s1 + $0x8] sm:$0xff]   ;;  %v3304_v9 = vld [vmem:[%s4570_s1] sm:$0xff]   ;;  %vm233_vm3 = vcmask 613376   ;;  %v3309_v14 = vld [vmem:[%s4571_s0 + $0x10] sm:$0xff]  }
   0x3   :  { %v314_v5 = vand.u32 %v3300_v1, %v312_v4  ;;  %v3305_v10 = vld [vmem:[%s4571_s0] sm:$0xff]   ;;  %v3307_v12 = vld [vmem:[%s4571_s0 + $0x8] sm:$0xff]   ;;  %v3310_v15 = vld [vmem:[%s4571_s0 + $0xd4] sm:$0xff]  }
   0x4   :  { %v3306_v11 = vld [vmem:[%s4571_s0 + $0xc4] sm:$0xff]   ;;  %v3308_v13 = vld [vmem:[%s4571_s0 + $0xcc] sm:$0xff]   ;;  %v3311_v16 = vld [vmem:[%s4571_s0 + $0x18] sm:$0xff]  }
   0x5   :  { %2858 = vmatpush3.bf16.msra.mxu0 %v314_v5  ;;  %2968 = vmatpush3.bf16.msra.mxu1 %v314_v5  ;;  %v3312_v17 = vld [vmem:[%s4571_s0 + $0xdc] sm:$0xff]   ;;  %v3314_v19 = vld [vmem:[%s4571_s0 + $0xe4] sm:$0xff]   ;;  %v3316_v21 = vld [vmem:[%s4571_s0 + $0xec] sm:$0xff]  }
   0x6   :  { %2859 = vmatprep.subr.bf16.mxu0 %v4574_v0  ;;  %2969 = vmatprep.subr.bf16.mxu1 %v4574_v0  ;;  %v3313_v18 = vld [vmem:[%s4571_s0 + $0x20] sm:$0xff]   ;;  %v3315_v20 = vld [vmem:[%s4571_s0 + $0x28] sm:$0xff]   ;;  %v3317_v22 = vld [vmem:[%s4571_s0 + $0x30] sm:$0xff]  }
   0x7   :  { %v3318_v23 = vld [vmem:[%s4571_s0 + $0xf4] sm:$0xff]   ;;  %v3320_v25 = vld [vmem:[%s4571_s0 + $0xfc] sm:$0xff]   ;;  %v3322_v27 = vld [vmem:[%s4571_s0 + $0x104] sm:$0xff]  }
   0x8   :  { %v3319_v24 = vld [vmem:[%s4571_s0 + $0x38] sm:$0xff]   ;;  %v3321_v26 = vld [vmem:[%s4571_s0 + $0x40] sm:$0xff]   ;;  %v3323_v28 = vld [vmem:[%s4571_s0 + $0x48] sm:$0xff]  }
   0x9   :  { %2860 = vmatpush3.bf16.msra.mxu0 %v3301_v6  ;;  %2970 = vmatpush3.bf16.msra.mxu1 %v3301_v6  ;;  %v3324_v29 = vld [vmem:[%s4571_s0 + $0x10c] sm:$0xff]   ;;  %v3326_v31 = vld [vmem:[%s4571_s0 + $0x114] sm:$0xff]   ;;  %v3328_v33 = vld [vmem:[%s4571_s0 + $0x11c] sm:$0xff]  }
   0xa   :  { %2861 = vmatprep.subr.bf16.mxu0 %v4574_v0  ;;  %2971 = vmatprep.subr.bf16.mxu1 %v4574_v0  ;;  %v3325_v30 = vld [vmem:[%s4571_s0 + $0x50] sm:$0xff]   ;;  %v3327_v32 = vld [vmem:[%s4571_s0 + $0x58] sm:$0xff]   ;;  %v3329_v34 = vld [vmem:[%s4571_s0 + $0x60] sm:$0xff]  }
   0xb   :  { %v3330_v35 = vld [vmem:[%s4571_s0 + $0x124] sm:$0xff]   ;;  %v3332_v37 = vld [vmem:[%s4571_s0 + $0x12c] sm:$0xff]   ;;  %v3334_v39 = vld [vmem:[%s4571_s0 + $0x134] sm:$0xff]  }
   0xc   :  { %v3331_v36 = vld [vmem:[%s4571_s0 + $0x68] sm:$0xff]   ;;  %v3333_v38 = vld [vmem:[%s4571_s0 + $0x70] sm:$0xff]   ;;  %v3335_v40 = vld [vmem:[%s4571_s0 + $0x78] sm:$0xff]  }
   0xd   :  { %2862 = vmatpush3.bf16.msra.mxu0 %v3302_v7  ;;  %2972 = vmatpush3.bf16.msra.mxu1 %v3302_v7  ;;  %v3336_v41 = vld [vmem:[%s4571_s0 + $0x13c] sm:$0xff]   ;;  %v3338_v43 = vld [vmem:[%s4571_s0 + $0x144] sm:$0xff]   ;;  %v3340_v45 = vld [vmem:[%s4571_s0 + $0x14c] sm:$0xff]  }
   0xe   :  { %2863 = vmatprep.subr.bf16.mxu0 %v4574_v0  ;;  %2973 = vmatprep.subr.bf16.mxu1 %v4574_v0  ;;  %v3337_v42 = vld [vmem:[%s4571_s0 + $0x80] sm:$0xff]   ;;  %v3339_v44 = vld [vmem:[%s4571_s0 + $0x88] sm:$0xff]   ;;  %v3341_v46 = vld [vmem:[%s4571_s0 + $0x90] sm:$0xff]  }
   0xf   :  { %v3342_v47 = vld [vmem:[%s4571_s0 + $0x154] sm:$0xff]   ;;  %v3344_v49 = vld [vmem:[%s4571_s0 + $0x15c] sm:$0xff]   ;;  %v3346_v51 = vld [vmem:[%s4571_s0 + $0x164] sm:$0xff]  }
  0x10   :  { %v3343_v48 = vld [vmem:[%s4571_s0 + $0x98] sm:$0xff]   ;;  %v3345_v50 = vld [vmem:[%s4571_s0 + $0xa0] sm:$0xff]   ;;  %v3347_v52 = vld [vmem:[%s4571_s0 + $0xa8] sm:$0xff]  }
  0x11   :  { %2864 = vmatpush3.bf16.msra.mxu0 %v3303_v8  ;;  %2974 = vmatpush3.bf16.msra.mxu1 %v3303_v8  ;;  %v3348_v53 = vld [vmem:[%s4571_s0 + $0x16c] sm:$0xff]   ;;  %v3350_v55 = vld [vmem:[%s4571_s0 + $0x174] sm:$0xff]   ;;  %v3352_v57 = vld [vmem:[%s4571_s0 + $0x17c] sm:$0xff]  }
  0x12   :  { %2865 = vmatprep.subr.bf16.mxu0 %v4574_v0  ;;  %2975 = vmatprep.subr.bf16.mxu1 %v4574_v0  ;;  %v3349_v54 = vld [vmem:[%s4571_s0 + $0xb0] sm:$0xff]   ;;  %v3351_v56 = vld [vmem:[%s4571_s0 + $0xb8] sm:$0xff]   ;;  %v3353_v58 = vld [vmem:[%s4571_s0 + $0xc0] ss:$0 sps:$4 sm:$0xff]  }
  0x13   :  { %v3354_v59 = vld [vmem:[%s4571_s0 + $0x184] ss:$0 sps:$4 sm:$0xff]   ;;  %v3766_v60 = vld [vmem:[%s4572_s2] ss:$0 sm:$0xff] }
  0x15   :  { %2866 = vmatpush3.bf16.msra.mxu0 %v3304_v9  ;;  %2976 = vmatpush3.bf16.msra.mxu1 %v3304_v9 }
  0x16   :  { %3077 = vmatprep.subr.bf16.mxu0 %v4574_v0  ;;  %3187 = vmatprep.subr.bf16.mxu1 %v4574_v0 }
  0x18   :  { %2868 = vmatmul.mubr.msk.bf16.vlgmr.msra.gmra.mxu0 %vm233_vm3, %v3305_v10  ;;  %2978 = vmatmul.mubr.msk.bf16.vlgmr.msra.gmra.mxu1 %vm233_vm3, %v3306_v11 }
  0x19   :  { %3078 = vmatpush3.bf16.msra.mxu0 %v314_v5  ;;  %3188 = vmatpush3.bf16.msra.mxu1 %v314_v5 }
  0x1a   :  { %2871 = vmatprep.mubr.msk.bf16.mxu0 %vm3409_vm2, %v4574_v0  ;;  %2981 = vmatprep.mubr.msk.bf16.mxu1 %vm3409_vm2, %v4574_v0 }
  0x1b   :  { %3079 = vmatprep.subr.bf16.mxu0 %v4574_v0  ;;  %3189 = vmatprep.subr.bf16.mxu1 %v4574_v0 }
  0x1d   :  { %3080 = vmatpush3.bf16.msra.mxu0 %v3301_v6  ;;  %3190 = vmatpush3.bf16.msra.mxu1 %v3301_v6 }
  0x1e   :  { %3081 = vmatprep.subr.bf16.mxu0 %v4574_v0  ;;  %3191 = vmatprep.subr.bf16.mxu1 %v4574_v0 }
  0x20   :  { %2872 = vmatmul.mubr.msk.bf16.gmra.mxu0 %vm233_vm3, %v3307_v12  ;;  %2982 = vmatmul.mubr.msk.bf16.gmra.mxu1 %vm233_vm3, %v3308_v13 }
  0x21   :  { %2875 = vmatprep.mubr.msk.bf16.mxu0 %vm3409_vm2, %v4574_v0  ;;  %2985 = vmatprep.mubr.msk.bf16.mxu1 %vm3409_vm2, %v4574_v0 }
  0x22   :  { %3082 = vmatpush3.bf16.msra.mxu0 %v3302_v7  ;;  %3192 = vmatpush3.bf16.msra.mxu1 %v3302_v7 }
  0x23   :  { %3083 = vmatprep.subr.bf16.mxu0 %v4574_v0  ;;  %3193 = vmatprep.subr.bf16.mxu1 %v4574_v0 }
  0x26   :  { %3084 = vmatpush3.bf16.msra.mxu0 %v3303_v8  ;;  %3194 = vmatpush3.bf16.msra.mxu1 %v3303_v8  ;;  %v3355_v8 = vld [vmem:[%s4571_s0 + $0x188] sm:$0xff]  }
  0x27   :  { %3085 = vmatprep.subr.bf16.mxu0 %v4574_v0  ;;  %3195 = vmatprep.subr.bf16.mxu1 %v4574_v0 }
  0x28   :  { %2876 = vmatmul.mubr.msk.bf16.gmra.mxu0 %vm233_vm3, %v3309_v14  ;;  %2986 = vmatmul.mubr.msk.bf16.gmra.mxu1 %vm233_vm3, %v3310_v15 }
  0x29   :  { %2879 = vmatprep.mubr.msk.bf16.mxu0 %vm3409_vm2, %v4574_v0  ;;  %2989 = vmatprep.mubr.msk.bf16.mxu1 %vm3409_vm2, %v4574_v0 }
  0x2a   :  { %3086 = vmatpush3.bf16.msra.mxu0 %v3304_v9  ;;  %3196 = vmatpush3.bf16.msra.mxu1 %v3304_v9  ;;  %v3356_v9 = vld [vmem:[%s4571_s0 + $0x24c] sm:$0xff]  }
  0x30   :  { %2880 = vmatmul.mubr.msk.bf16.gmra.mxu0 %vm233_vm3, %v3311_v16  ;;  %2990 = vmatmul.mubr.msk.bf16.gmra.mxu1 %vm233_vm3, %v3312_v17 }
  0x31   :  { %2883 = vmatprep.mubr.msk.bf16.mxu0 %vm3409_vm2, %v4574_v0  ;;  %2993 = vmatprep.mubr.msk.bf16.mxu1 %vm3409_vm2, %v4574_v0 }
  0x38   :  { %2884 = vmatmul.mubr.msk.bf16.gmra.mxu0 %vm233_vm3, %v3313_v18  ;;  %2994 = vmatmul.mubr.msk.bf16.gmra.mxu1 %vm233_vm3, %v3314_v19 }
  0x39   :  { %2887 = vmatprep.mubr.msk.bf16.mxu0 %vm3409_vm2, %v4574_v0  ;;  %2997 = vmatprep.mubr.msk.bf16.mxu1 %vm3409_vm2, %v4574_v0 }
  0x40   :  { %2888 = vmatmul.mubr.msk.bf16.gmra.mxu0 %vm233_vm3, %v3315_v20  ;;  %2998 = vmatmul.mubr.msk.bf16.gmra.mxu1 %vm233_vm3, %v3316_v21 }
  0x41   :  { %2891 = vmatprep.mubr.msk.bf16.mxu0 %vm3409_vm2, %v4574_v0  ;;  %3001 = vmatprep.mubr.msk.bf16.mxu1 %vm3409_vm2, %v4574_v0 }
  0x48   :  { %2892 = vmatmul.mubr.msk.bf16.gmra.mxu0 %vm233_vm3, %v3317_v22  ;;  %3002 = vmatmul.mubr.msk.bf16.gmra.mxu1 %vm233_vm3, %v3318_v23 }
  0x49   :  { %2895 = vmatprep.mubr.msk.bf16.mxu0 %vm3409_vm2, %v4574_v0  ;;  %3005 = vmatprep.mubr.msk.bf16.mxu1 %vm3409_vm2, %v4574_v0 }
  0x50   :  { %2896 = vmatmul.mubr.msk.bf16.gmra.mxu0 %vm233_vm3, %v3319_v24  ;;  %3006 = vmatmul.mubr.msk.bf16.gmra.mxu1 %vm233_vm3, %v3320_v25 }
  0x51   :  { %2899 = vmatprep.mubr.msk.bf16.mxu0 %vm3409_vm2, %v4574_v0  ;;  %3009 = vmatprep.mubr.msk.bf16.mxu1 %vm3409_vm2, %v4574_v0 }
  0x58   :  { %2900 = vmatmul.mubr.msk.bf16.gmra.mxu0 %vm233_vm3, %v3321_v26  ;;  %3010 = vmatmul.mubr.msk.bf16.gmra.mxu1 %vm233_vm3, %v3322_v27 }
  0x59   :  { %2903 = vmatprep.mubr.msk.bf16.mxu0 %vm3409_vm2, %v4574_v0  ;;  %3013 = vmatprep.mubr.msk.bf16.mxu1 %vm3409_vm2, %v4574_v0 }
  0x60   :  { %2904 = vmatmul.mubr.msk.bf16.gmra.mxu0 %vm233_vm3, %v3323_v28  ;;  %3014 = vmatmul.mubr.msk.bf16.gmra.mxu1 %vm233_vm3, %v3324_v29  ;;  %v3357_v28 = vld [vmem:[%s4571_s0 + $0x190] sm:$0xff]  }
  0x61   :  { %2907 = vmatprep.mubr.msk.bf16.mxu0 %vm3409_vm2, %v4574_v0  ;;  %3017 = vmatprep.mubr.msk.bf16.mxu1 %vm3409_vm2, %v4574_v0  ;;  %v3358_v29 = vld [vmem:[%s4571_s0 + $0x254] sm:$0xff]  }
  0x68   :  { %2908 = vmatmul.mubr.msk.bf16.gmra.mxu0 %vm233_vm3, %v3325_v30  ;;  %3018 = vmatmul.mubr.msk.bf16.gmra.mxu1 %vm233_vm3, %v3326_v31 }
  0x69   :  { %2911 = vmatprep.mubr.msk.bf16.mxu0 %vm3409_vm2, %v4574_v0  ;;  %3021 = vmatprep.mubr.msk.bf16.mxu1 %vm3409_vm2, %v4574_v0 }
  0x70   :  { %2912 = vmatmul.mubr.msk.bf16.gmra.mxu0 %vm233_vm3, %v3327_v32  ;;  %3022 = vmatmul.mubr.msk.bf16.gmra.mxu1 %vm233_vm3, %v3328_v33 }
  0x71   :  { %2915 = vmatprep.mubr.msk.bf16.mxu0 %vm3409_vm2, %v4574_v0  ;;  %3025 = vmatprep.mubr.msk.bf16.mxu1 %vm3409_vm2, %v4574_v0 }
  0x78   :  { %2916 = vmatmul.mubr.msk.bf16.gmra.mxu0 %vm233_vm3, %v3329_v34  ;;  %3026 = vmatmul.mubr.msk.bf16.gmra.mxu1 %vm233_vm3, %v3330_v35 }
  0x79   :  { %2919 = vmatprep.mubr.msk.bf16.mxu0 %vm3409_vm2, %v4574_v0  ;;  %3029 = vmatprep.mubr.msk.bf16.mxu1 %vm3409_vm2, %v4574_v0 }
  0x80   :  { %2920 = vmatmul.mubr.msk.bf16.gmra.mxu0 %vm233_vm3, %v3331_v36  ;;  %3030 = vmatmul.mubr.msk.bf16.gmra.mxu1 %vm233_vm3, %v3332_v37 }
  0x81   :  { %2923 = vmatprep.mubr.msk.bf16.mxu0 %vm3409_vm2, %v4574_v0  ;;  %3033 = vmatprep.mubr.msk.bf16.mxu1 %vm3409_vm2, %v4574_v0 }
  0x88   :  { %2924 = vmatmul.mubr.msk.bf16.gmra.mxu0 %vm233_vm3, %v3333_v38  ;;  %3034 = vmatmul.mubr.msk.bf16.gmra.mxu1 %vm233_vm3, %v3334_v39 }
  0x89   :  { %2927 = vmatprep.mubr.msk.bf16.mxu0 %vm3409_vm2, %v4574_v0  ;;  %3037 = vmatprep.mubr.msk.bf16.mxu1 %vm3409_vm2, %v4574_v0 }
  0x90   :  { %2928 = vmatmul.mubr.msk.bf16.gmra.mxu0 %vm233_vm3, %v3335_v40  ;;  %3038 = vmatmul.mubr.msk.bf16.gmra.mxu1 %vm233_vm3, %v3336_v41 }
  0x91   :  { %2931 = vmatprep.mubr.msk.bf16.mxu0 %vm3409_vm2, %v4574_v0  ;;  %3041 = vmatprep.mubr.msk.bf16.mxu1 %vm3409_vm2, %v4574_v0 }
  0x98   :  { %2932 = vmatmul.mubr.msk.bf16.gmra.mxu0 %vm233_vm3, %v3337_v42  ;;  %3042 = vmatmul.mubr.msk.bf16.gmra.mxu1 %vm233_vm3, %v3338_v43 }
  0x99   :  { %2935 = vmatprep.mubr.msk.bf16.mxu0 %vm3409_vm2, %v4574_v0  ;;  %3045 = vmatprep.mubr.msk.bf16.mxu1 %vm3409_vm2, %v4574_v0 }
  0xa0   :  { %2936 = vmatmul.mubr.msk.bf16.gmra.mxu0 %vm233_vm3, %v3339_v44  ;;  %3046 = vmatmul.mubr.msk.bf16.gmra.mxu1 %vm233_vm3, %v3340_v45 }
  0xa1   :  { %2939 = vmatprep.mubr.msk.bf16.mxu0 %vm3409_vm2, %v4574_v0  ;;  %3049 = vmatprep.mubr.msk.bf16.mxu1 %vm3409_vm2, %v4574_v0 }
  0xa8   :  { %2940 = vmatmul.mubr.msk.bf16.gmra.mxu0 %vm233_vm3, %v3341_v46  ;;  %3050 = vmatmul.mubr.msk.bf16.gmra.mxu1 %vm233_vm3, %v3342_v47 }
  0xa9   :  { %2943 = vmatprep.mubr.msk.bf16.mxu0 %vm3409_vm2, %v4574_v0  ;;  %3053 = vmatprep.mubr.msk.bf16.mxu1 %vm3409_vm2, %v4574_v0 }
  0xb0   :  { %2944 = vmatmul.mubr.msk.bf16.gmra.mxu0 %vm233_vm3, %v3343_v48  ;;  %3054 = vmatmul.mubr.msk.bf16.gmra.mxu1 %vm233_vm3, %v3344_v49  ;;  %v3359_v48 = vld [vmem:[%s4571_s0 + $0x198] sm:$0xff]  }
  0xb1   :  { %2947 = vmatprep.mubr.msk.bf16.mxu0 %vm3409_vm2, %v4574_v0  ;;  %3057 = vmatprep.mubr.msk.bf16.mxu1 %vm3409_vm2, %v4574_v0  ;;  %v3360_v49 = vld [vmem:[%s4571_s0 + $0x25c] sm:$0xff]  }
  0xb8   :  { %2948 = vmatmul.mubr.msk.bf16.gmra.mxu0 %vm233_vm3, %v3345_v50  ;;  %3058 = vmatmul.mubr.msk.bf16.gmra.mxu1 %vm233_vm3, %v3346_v51 }
  0xb9   :  { %2951 = vmatprep.mubr.msk.bf16.mxu0 %vm3409_vm2, %v4574_v0  ;;  %3061 = vmatprep.mubr.msk.bf16.mxu1 %vm3409_vm2, %v4574_v0 }
  0xc0   :  { %2952 = vmatmul.mubr.msk.bf16.gmra.mxu0 %vm233_vm3, %v3347_v52  ;;  %3062 = vmatmul.mubr.msk.bf16.gmra.mxu1 %vm233_vm3, %v3348_v53 }
  0xc1   :  { %2955 = vmatprep.mubr.msk.bf16.mxu0 %vm3409_vm2, %v4574_v0  ;;  %3065 = vmatprep.mubr.msk.bf16.mxu1 %vm3409_vm2, %v4574_v0 }
  0xc8   :  { %2956 = vmatmul.mubr.msk.bf16.gmra.mxu0 %vm233_vm3, %v3349_v54  ;;  %3066 = vmatmul.mubr.msk.bf16.gmra.mxu1 %vm233_vm3, %v3350_v55 }
  0xc9   :  { %2959 = vmatprep.mubr.msk.bf16.mxu0 %vm3409_vm2, %v4574_v0  ;;  %3069 = vmatprep.mubr.msk.bf16.mxu1 %vm3409_vm2, %v4574_v0 }
  0xd0   :  { %2960 = vmatmul.mubr.msk.bf16.gmra.mxu0 %vm233_vm3, %v3351_v56  ;;  %3070 = vmatmul.mubr.msk.bf16.gmra.mxu1 %vm233_vm3, %v3352_v57 }
  0xd1   :  { %2963 = vmatprep.mubr.msk.bf16.mxu0 %vm3409_vm2, %v4574_v0  ;;  %3073 = vmatprep.mubr.msk.bf16.mxu1 %vm3409_vm2, %v4574_v0 }
  0xd8   :  { %v350_v61 = vpop.f32.mrf.mxu0  ;;  %2964 = vmatmul.mubr.msk.bf16.gmra.mxu0 %vm233_vm3, %v3353_v58  ;;  %v879_v62 = vpop.f32.mrf.mxu1  ;;  %3074 = vmatmul.mubr.msk.bf16.gmra.mxu1 %vm233_vm3, %v3354_v59 }
  0xd9   :  { %v351_v63 = vadd.f32 %v3766_v60, %v350_v61  ;;  %v880_v1 = vadd.f32 %v3766_v60, %v879_v62  ;;  %3087 = vmatprep.mubr.msk.bf16.mxu0 %vm3409_vm2, %v4574_v0  ;;  %3197 = vmatprep.mubr.msk.bf16.mxu1 %vm3409_vm2, %v4574_v0 }
  0xda   :  { %v2869_v2 = vpop.f32.mrf.mxu0  ;;  %v2979_v3 = vpop.f32.mrf.mxu1 }
  0xdb   :  { %v548_v4 = vmax.f32 %v351_v63, 0.0  ;;  %v1077_v5 = vmax.f32 %v880_v1, 0.0 }
  0xdc   :  { %v353_v6 = vpop.f32.mrf.mxu0  ;;  %v882_v7 = vpop.f32.mrf.mxu1 }
  0xdd   :  { %v3782_v10 = vmax.f32 %v548_v4, %v1077_v5  ;;  %v354_v11 = vadd.f32 %v3766_v60, %v353_v6  ;;  %v883_v12 = vadd.f32 %v3766_v60, %v882_v7  ;;  %v3361_v6 = vld [vmem:[%s4571_s0 + $0x1a0] sm:$0xff]  }
  0xde   :  { %v2870_v13 = vpop.f32.mrf.mxu0  ;;  %v2980_v14 = vpop.f32.mrf.mxu1  ;;  %v3362_v7 = vld [vmem:[%s4571_s0 + $0x264] sm:$0xff]  }
  0xdf   :  { %v549_v15 = vmax.f32 %v354_v11, 0.0  ;;  %v1078_v16 = vmax.f32 %v883_v12, 0.0 }
  0xe0   :  { %v358_v17 = vpop.f32.mrf.mxu0  ;;  %v887_v18 = vpop.f32.mrf.mxu1  ;;  %3088 = vmatmul.mubr.msk.bf16.vlgmr.msra.gmra.mxu0 %vm233_vm3, %v3355_v8  ;;  %3198 = vmatmul.mubr.msk.bf16.vlgmr.msra.gmra.mxu1 %vm233_vm3, %v3356_v9 }
  0xe1   :  { %v3788_v19 = vmax.f32 %v549_v15, %v1078_v16  ;;  %v359_v20 = vadd.f32 %v3766_v60, %v358_v17  ;;  %v888_v21 = vadd.f32 %v3766_v60, %v887_v18  ;;  %3091 = vmatprep.mubr.msk.bf16.mxu0 %vm3409_vm2, %v4574_v0  ;;  %3201 = vmatprep.mubr.msk.bf16.mxu1 %vm3409_vm2, %v4574_v0 }
  0xe2   :  { %v2873_v22 = vpop.f32.mrf.mxu0  ;;  %v2983_v23 = vpop.f32.mrf.mxu1 }
  0xe3   :  { %v550_v24 = vmax.f32 %v359_v20, 0.0  ;;  %v1079_v25 = vmax.f32 %v888_v21, 0.0 }
  0xe4   :  { %v361_v26 = vpop.f32.mrf.mxu0  ;;  %v890_v27 = vpop.f32.mrf.mxu1 }
  0xe5   :  { %v3802_v30 = vmax.f32 %v550_v24, %v1079_v25  ;;  %v362_v31 = vadd.f32 %v3766_v60, %v361_v26  ;;  %v891_v32 = vadd.f32 %v3766_v60, %v890_v27 }
  0xe6   :  { %v2874_v33 = vpop.f32.mrf.mxu0  ;;  %v2984_v34 = vpop.f32.mrf.mxu1 }
  0xe7   :  { %v551_v35 = vmax.f32 %v362_v31, 0.0  ;;  %v1080_v36 = vmax.f32 %v891_v32, 0.0 }
  0xe8   :  { %v366_v37 = vpop.f32.mrf.mxu0  ;;  %v895_v38 = vpop.f32.mrf.mxu1  ;;  %3092 = vmatmul.mubr.msk.bf16.gmra.mxu0 %vm233_vm3, %v3357_v28  ;;  %3202 = vmatmul.mubr.msk.bf16.gmra.mxu1 %vm233_vm3, %v3358_v29  ;;  %v3363_v28 = vld [vmem:[%s4571_s0 + $0x1a8] sm:$0xff]  }
  0xe9   :  { %v3808_v39 = vmax.f32 %v551_v35, %v1080_v36  ;;  %v367_v40 = vadd.f32 %v3766_v60, %v366_v37  ;;  %v896_v41 = vadd.f32 %v3766_v60, %v895_v38  ;;  %3095 = vmatprep.mubr.msk.bf16.mxu0 %vm3409_vm2, %v4574_v0  ;;  %3205 = vmatprep.mubr.msk.bf16.mxu1 %vm3409_vm2, %v4574_v0  ;;  %v3364_v29 = vld [vmem:[%s4571_s0 + $0x26c] sm:$0xff]  }
  0xea   :  { %v2877_v42 = vpop.f32.mrf.mxu0  ;;  %v2987_v43 = vpop.f32.mrf.mxu1 }
  0xeb   :  { %v552_v44 = vmax.f32 %v367_v40, 0.0  ;;  %v1081_v45 = vmax.f32 %v896_v41, 0.0 }
  0xec   :  { %v369_v46 = vpop.f32.mrf.mxu0  ;;  %v898_v47 = vpop.f32.mrf.mxu1 }
  0xed   :  { %v3822_v50 = vmax.f32 %v552_v44, %v1081_v45  ;;  %v370_v51 = vadd.f32 %v3766_v60, %v369_v46  ;;  %v899_v52 = vadd.f32 %v3766_v60, %v898_v47 }
  0xee   :  { %v2878_v53 = vpop.f32.mrf.mxu0  ;;  %v2988_v54 = vpop.f32.mrf.mxu1 }
  0xef   :  { %v553_v55 = vmax.f32 %v370_v51, 0.0  ;;  %v1082_v56 = vmax.f32 %v899_v52, 0.0  ;;  %v3365_v51 = vld [vmem:[%s4571_s0 + $0x1b0] sm:$0xff]  }
  0xf0   :  { %v374_v57 = vpop.f32.mrf.mxu0  ;;  %v903_v58 = vpop.f32.mrf.mxu1  ;;  %3096 = vmatmul.mubr.msk.bf16.gmra.mxu0 %vm233_vm3, %v3359_v48  ;;  %3206 = vmatmul.mubr.msk.bf16.gmra.mxu1 %vm233_vm3, %v3360_v49  ;;  %v3366_v52 = vld [vmem:[%s4571_s0 + $0x274] sm:$0xff]  }
  0xf1   :  { %v3828_v59 = vmax.f32 %v553_v55, %v1082_v56  ;;  %v375_v61 = vadd.f32 %v3766_v60, %v374_v57  ;;  %v904_v62 = vadd.f32 %v3766_v60, %v903_v58  ;;  %3099 = vmatprep.mubr.msk.bf16.mxu0 %vm3409_vm2, %v4574_v0  ;;  %3209 = vmatprep.mubr.msk.bf16.mxu1 %vm3409_vm2, %v4574_v0 }
  0xf2   :  { %v2881_v63 = vpop.f32.mrf.mxu0  ;;  %v2991_v1 = vpop.f32.mrf.mxu1 }
  0xf3   :  { %v554_v2 = vmax.f32 %v375_v61, 0.0  ;;  %v1083_v3 = vmax.f32 %v904_v62, 0.0 }
  0xf4   :  { %v377_v4 = vpop.f32.mrf.mxu0  ;;  %v906_v5 = vpop.f32.mrf.mxu1 }
  0xf5   :  { %v3842_v8 = vmax.f32 %v554_v2, %v1083_v3  ;;  %v378_v9 = vadd.f32 %v3766_v60, %v377_v4  ;;  %v907_v11 = vadd.f32 %v3766_v60, %v906_v5 }
  0xf6   :  { %v2882_v12 = vpop.f32.mrf.mxu0  ;;  %v2992_v13 = vpop.f32.mrf.mxu1 }
  0xf7   :  { %v555_v14 = vmax.f32 %v378_v9, 0.0  ;;  %v1084_v15 = vmax.f32 %v907_v11, 0.0  ;;  %v3367_v12 = vld [vmem:[%s4571_s0 + $0x1b8] sm:$0xff]  }
  0xf8   :  { %v382_v16 = vpop.f32.mrf.mxu0  ;;  %v911_v17 = vpop.f32.mrf.mxu1  ;;  %3100 = vmatmul.mubr.msk.bf16.gmra.mxu0 %vm233_vm3, %v3361_v6  ;;  %3210 = vmatmul.mubr.msk.bf16.gmra.mxu1 %vm233_vm3, %v3362_v7  ;;  %v3368_v13 = vld [vmem:[%s4571_s0 + $0x27c] sm:$0xff]  }
  0xf9   :  { %v3848_v18 = vmax.f32 %v555_v14, %v1084_v15  ;;  %v383_v20 = vadd.f32 %v3766_v60, %v382_v16  ;;  %v912_v21 = vadd.f32 %v3766_v60, %v911_v17  ;;  %3103 = vmatprep.mubr.msk.bf16.mxu0 %vm3409_vm2, %v4574_v0  ;;  %3213 = vmatprep.mubr.msk.bf16.mxu1 %vm3409_vm2, %v4574_v0 }
  0xfa   :  { %v2885_v22 = vpop.f32.mrf.mxu0  ;;  %v2995_v23 = vpop.f32.mrf.mxu1 }
  0xfb   :  { %v556_v24 = vmax.f32 %v383_v20, 0.0  ;;  %v1085_v25 = vmax.f32 %v912_v21, 0.0 }
  0xfc   :  { %v385_v26 = vpop.f32.mrf.mxu0  ;;  %v914_v27 = vpop.f32.mrf.mxu1 }
  0xfd   :  { %v3862_v31 = vmax.f32 %v556_v24, %v1085_v25  ;;  %v386_v32 = vadd.f32 %v3766_v60, %v385_v26  ;;  %v915_v33 = vadd.f32 %v3766_v60, %v914_v27 }
  0xfe   :  { %v2886_v34 = vpop.f32.mrf.mxu0  ;;  %v2996_v35 = vpop.f32.mrf.mxu1 }
  0xff   :  { %v557_v36 = vmax.f32 %v386_v32, 0.0  ;;  %v1086_v37 = vmax.f32 %v915_v33, 0.0 }
 0x100   :  { %v390_v38 = vpop.f32.mrf.mxu0  ;;  %v919_v40 = vpop.f32.mrf.mxu1  ;;  %3104 = vmatmul.mubr.msk.bf16.gmra.mxu0 %vm233_vm3, %v3363_v28  ;;  %3214 = vmatmul.mubr.msk.bf16.gmra.mxu1 %vm233_vm3, %v3364_v29 }
 0x101   :  { %v3868_v41 = vmax.f32 %v557_v36, %v1086_v37  ;;  %v391_v42 = vadd.f32 %v3766_v60, %v390_v38  ;;  %v920_v43 = vadd.f32 %v3766_v60, %v919_v40  ;;  %3107 = vmatprep.mubr.msk.bf16.mxu0 %vm3409_vm2, %v4574_v0  ;;  %3217 = vmatprep.mubr.msk.bf16.mxu1 %vm3409_vm2, %v4574_v0  ;;  %v3369_v36 = vld [vmem:[%s4571_s0 + $0x1c0] sm:$0xff]  }
 0x102   :  { %v2889_v44 = vpop.f32.mrf.mxu0  ;;  %v2999_v45 = vpop.f32.mrf.mxu1  ;;  %v3370_v37 = vld [vmem:[%s4571_s0 + $0x284] sm:$0xff]  }
 0x103   :  { %v558_v46 = vmax.f32 %v391_v42, 0.0  ;;  %v1087_v47 = vmax.f32 %v920_v43, 0.0 }
 0x104   :  { %v393_v48 = vpop.f32.mrf.mxu0  ;;  %v922_v49 = vpop.f32.mrf.mxu1 }
 0x105   :  { %v3882_v53 = vmax.f32 %v558_v46, %v1087_v47  ;;  %v394_v54 = vadd.f32 %v3766_v60, %v393_v48  ;;  %v923_v55 = vadd.f32 %v3766_v60, %v922_v49 }
 0x106   :  { %v2890_v56 = vpop.f32.mrf.mxu0  ;;  %v3000_v57 = vpop.f32.mrf.mxu1 }
 0x107   :  { %v559_v58 = vmax.f32 %v394_v54, 0.0  ;;  %v1088_v61 = vmax.f32 %v923_v55, 0.0 }
 0x108   :  { %v398_v62 = vpop.f32.mrf.mxu0  ;;  %v927_v63 = vpop.f32.mrf.mxu1  ;;  %3108 = vmatmul.mubr.msk.bf16.gmra.mxu0 %vm233_vm3, %v3365_v51  ;;  %3218 = vmatmul.mubr.msk.bf16.gmra.mxu1 %vm233_vm3, %v3366_v52 }
 0x109   :  { %v3888_v1 = vmax.f32 %v559_v58, %v1088_v61  ;;  %v399_v2 = vadd.f32 %v3766_v60, %v398_v62  ;;  %v928_v3 = vadd.f32 %v3766_v60, %v927_v63  ;;  %3111 = vmatprep.mubr.msk.bf16.mxu0 %vm3409_vm2, %v4574_v0  ;;  %3221 = vmatprep.mubr.msk.bf16.mxu1 %vm3409_vm2, %v4574_v0  ;;  %v3371_v62 = vld [vmem:[%s4571_s0 + $0x1c8] sm:$0xff]  }
 0x10a   :  { %v2893_v4 = vpop.f32.mrf.mxu0  ;;  %v3003_v5 = vpop.f32.mrf.mxu1  ;;  %v3372_v63 = vld [vmem:[%s4571_s0 + $0x28c] sm:$0xff]  }
 0x10b   :  { %v560_v6 = vmax.f32 %v399_v2, 0.0  ;;  %v1089_v7 = vmax.f32 %v928_v3, 0.0 }
 0x10c   :  { %v401_v9 = vpop.f32.mrf.mxu0  ;;  %v930_v11 = vpop.f32.mrf.mxu1 }
 0x10d   :  { %v3902_v14 = vmax.f32 %v560_v6, %v1089_v7  ;;  %v402_v15 = vadd.f32 %v3766_v60, %v401_v9  ;;  %v931_v16 = vadd.f32 %v3766_v60, %v930_v11 }
 0x10e   :  { %v2894_v17 = vpop.f32.mrf.mxu0  ;;  %v3004_v20 = vpop.f32.mrf.mxu1 }
 0x10f   :  { %v561_v21 = vmax.f32 %v402_v15, 0.0  ;;  %v1090_v22 = vmax.f32 %v931_v16, 0.0 }
 0x110   :  { %v406_v23 = vpop.f32.mrf.mxu0  ;;  %v935_v24 = vpop.f32.mrf.mxu1  ;;  %3112 = vmatmul.mubr.msk.bf16.gmra.mxu0 %vm233_vm3, %v3367_v12  ;;  %3222 = vmatmul.mubr.msk.bf16.gmra.mxu1 %vm233_vm3, %v3368_v13 }
 0x111   :  { %v3908_v25 = vmax.f32 %v561_v21, %v1090_v22  ;;  %v407_v26 = vadd.f32 %v3766_v60, %v406_v23  ;;  %v936_v27 = vadd.f32 %v3766_v60, %v935_v24  ;;  %3115 = vmatprep.mubr.msk.bf16.mxu0 %vm3409_vm2, %v4574_v0  ;;  %3225 = vmatprep.mubr.msk.bf16.mxu1 %vm3409_vm2, %v4574_v0 }
 0x112   :  { %v2897_v28 = vpop.f32.mrf.mxu0  ;;  %v3007_v29 = vpop.f32.mrf.mxu1 }
 0x113   :  { %v562_v32 = vmax.f32 %v407_v26, 0.0  ;;  %v1091_v33 = vmax.f32 %v936_v27, 0.0  ;;  %v3373_v26 = vld [vmem:[%s4571_s0 + $0x1d0] sm:$0xff]  }
 0x114   :  { %v409_v34 = vpop.f32.mrf.mxu0  ;;  %v938_v35 = vpop.f32.mrf.mxu1  ;;  %v3374_v27 = vld [vmem:[%s4571_s0 + $0x294] sm:$0xff]  }
 0x115   :  { %v3922_v38 = vmax.f32 %v562_v32, %v1091_v33  ;;  %v410_v40 = vadd.f32 %v3766_v60, %v409_v34  ;;  %v939_v42 = vadd.f32 %v3766_v60, %v938_v35 }
 0x116   :  { %v2898_v43 = vpop.f32.mrf.mxu0  ;;  %v3008_v44 = vpop.f32.mrf.mxu1 }
 0x117   :  { %v563_v45 = vmax.f32 %v410_v40, 0.0  ;;  %v1092_v46 = vmax.f32 %v939_v42, 0.0 }
 0x118   :  { %v414_v47 = vpop.f32.mrf.mxu0  ;;  %v943_v48 = vpop.f32.mrf.mxu1  ;;  %3116 = vmatmul.mubr.msk.bf16.gmra.mxu0 %vm233_vm3, %v3369_v36  ;;  %3226 = vmatmul.mubr.msk.bf16.gmra.mxu1 %vm233_vm3, %v3370_v37 }
 0x119   :  { %v3928_v49 = vmax.f32 %v563_v45, %v1092_v46  ;;  %v415_v51 = vadd.f32 %v3766_v60, %v414_v47  ;;  %v944_v52 = vadd.f32 %v3766_v60, %v943_v48  ;;  %3119 = vmatprep.mubr.msk.bf16.mxu0 %vm3409_vm2, %v4574_v0  ;;  %3229 = vmatprep.mubr.msk.bf16.mxu1 %vm3409_vm2, %v4574_v0 }
 0x11a   :  { %v2901_v54 = vpop.f32.mrf.mxu0  ;;  %v3011_v55 = vpop.f32.mrf.mxu1 }
 0x11b   :  { %v564_v56 = vmax.f32 %v415_v51, 0.0  ;;  %v1093_v57 = vmax.f32 %v944_v52, 0.0  ;;  %v3375_v54 = vld [vmem:[%s4571_s0 + $0x1d8] sm:$0xff]  }
 0x11c   :  { %v417_v58 = vpop.f32.mrf.mxu0  ;;  %v946_v61 = vpop.f32.mrf.mxu1  ;;  %v3376_v55 = vld [vmem:[%s4571_s0 + $0x29c] sm:$0xff]  }
 0x11d   :  { %v3942_v2 = vmax.f32 %v564_v56, %v1093_v57  ;;  %v418_v3 = vadd.f32 %v3766_v60, %v417_v58  ;;  %v947_v4 = vadd.f32 %v3766_v60, %v946_v61 }
 0x11e   :  { %v2902_v5 = vpop.f32.mrf.mxu0  ;;  %v3012_v6 = vpop.f32.mrf.mxu1 }
 0x11f   :  { %v565_v7 = vmax.f32 %v418_v3, 0.0  ;;  %v1094_v9 = vmax.f32 %v947_v4, 0.0 }
 0x120   :  { %v422_v11 = vpop.f32.mrf.mxu0  ;;  %v951_v12 = vpop.f32.mrf.mxu1  ;;  %3120 = vmatmul.mubr.msk.bf16.gmra.mxu0 %vm233_vm3, %v3371_v62  ;;  %3230 = vmatmul.mubr.msk.bf16.gmra.mxu1 %vm233_vm3, %v3372_v63 }
 0x121   :  { %v3948_v13 = vmax.f32 %v565_v7, %v1094_v9  ;;  %v423_v15 = vadd.f32 %v3766_v60, %v422_v11  ;;  %v952_v16 = vadd.f32 %v3766_v60, %v951_v12  ;;  %3123 = vmatprep.mubr.msk.bf16.mxu0 %vm3409_vm2, %v4574_v0  ;;  %3233 = vmatprep.mubr.msk.bf16.mxu1 %vm3409_vm2, %v4574_v0 }
 0x122   :  { %v2905_v17 = vpop.f32.mrf.mxu0  ;;  %v3015_v20 = vpop.f32.mrf.mxu1 }
 0x123   :  { %v566_v21 = vmax.f32 %v423_v15, 0.0  ;;  %v1095_v22 = vmax.f32 %v952_v16, 0.0 }
 0x124   :  { %v425_v23 = vpop.f32.mrf.mxu0  ;;  %v954_v24 = vpop.f32.mrf.mxu1 }
 0x125   :  { %v3962_v28 = vmax.f32 %v566_v21, %v1095_v22  ;;  %v426_v29 = vadd.f32 %v3766_v60, %v425_v23  ;;  %v955_v32 = vadd.f32 %v3766_v60, %v954_v24  ;;  %v3377_v21 = vld [vmem:[%s4571_s0 + $0x1e0] sm:$0xff]  }
 0x126   :  { %v2906_v33 = vpop.f32.mrf.mxu0  ;;  %v3016_v34 = vpop.f32.mrf.mxu1  ;;  %v3378_v22 = vld [vmem:[%s4571_s0 + $0x2a4] sm:$0xff]  }
 0x127   :  { %v567_v35 = vmax.f32 %v426_v29, 0.0  ;;  %v1096_v36 = vmax.f32 %v955_v32, 0.0 }
 0x128   :  { %v430_v37 = vpop.f32.mrf.mxu0  ;;  %v959_v40 = vpop.f32.mrf.mxu1  ;;  %3124 = vmatmul.mubr.msk.bf16.gmra.mxu0 %vm233_vm3, %v3373_v26  ;;  %3234 = vmatmul.mubr.msk.bf16.gmra.mxu1 %vm233_vm3, %v3374_v27 }
 0x129   :  { %v3968_v42 = vmax.f32 %v567_v35, %v1096_v36  ;;  %v431_v43 = vadd.f32 %v3766_v60, %v430_v37  ;;  %v960_v44 = vadd.f32 %v3766_v60, %v959_v40  ;;  %3127 = vmatprep.mubr.msk.bf16.mxu0 %vm3409_vm2, %v4574_v0  ;;  %3237 = vmatprep.mubr.msk.bf16.mxu1 %vm3409_vm2, %v4574_v0 }
 0x12a   :  { %v2909_v45 = vpop.f32.mrf.mxu0  ;;  %v3019_v46 = vpop.f32.mrf.mxu1 }
 0x12b   :  { %v568_v47 = vmax.f32 %v431_v43, 0.0  ;;  %v1097_v48 = vmax.f32 %v960_v44, 0.0 }
 0x12c   :  { %v433_v51 = vpop.f32.mrf.mxu0  ;;  %v962_v52 = vpop.f32.mrf.mxu1 }
 0x12d   :  { %v3982_v56 = vmax.f32 %v568_v47, %v1097_v48  ;;  %v434_v57 = vadd.f32 %v3766_v60, %v433_v51  ;;  %v963_v58 = vadd.f32 %v3766_v60, %v962_v52  ;;  %v3379_v51 = vld [vmem:[%s4571_s0 + $0x1e8] sm:$0xff]  }
 0x12e   :  { %v2910_v61 = vpop.f32.mrf.mxu0  ;;  %v3020_v62 = vpop.f32.mrf.mxu1  ;;  %v3380_v52 = vld [vmem:[%s4571_s0 + $0x2ac] sm:$0xff]  }
 0x12f   :  { %v569_v63 = vmax.f32 %v434_v57, 0.0  ;;  %v1098_v3 = vmax.f32 %v963_v58, 0.0 }
 0x130   :  { %v438_v4 = vpop.f32.mrf.mxu0  ;;  %v967_v5 = vpop.f32.mrf.mxu1  ;;  %3128 = vmatmul.mubr.msk.bf16.gmra.mxu0 %vm233_vm3, %v3375_v54  ;;  %3238 = vmatmul.mubr.msk.bf16.gmra.mxu1 %vm233_vm3, %v3376_v55 }
 0x131   :  { %v3988_v6 = vmax.f32 %v569_v63, %v1098_v3  ;;  %v439_v7 = vadd.f32 %v3766_v60, %v438_v4  ;;  %v968_v9 = vadd.f32 %v3766_v60, %v967_v5  ;;  %3131 = vmatprep.mubr.msk.bf16.mxu0 %vm3409_vm2, %v4574_v0  ;;  %3241 = vmatprep.mubr.msk.bf16.mxu1 %vm3409_vm2, %v4574_v0 }
 0x132   :  { %v2913_v11 = vpop.f32.mrf.mxu0  ;;  %v3023_v12 = vpop.f32.mrf.mxu1 }
 0x133   :  { %v570_v15 = vmax.f32 %v439_v7, 0.0  ;;  %v1099_v16 = vmax.f32 %v968_v9, 0.0 }
 0x134   :  { %v441_v17 = vpop.f32.mrf.mxu0  ;;  %v970_v20 = vpop.f32.mrf.mxu1 }
 0x135   :  { %v4002_v23 = vmax.f32 %v570_v15, %v1099_v16  ;;  %v442_v24 = vadd.f32 %v3766_v60, %v441_v17  ;;  %v971_v26 = vadd.f32 %v3766_v60, %v970_v20 }
 0x136   :  { %v2914_v27 = vpop.f32.mrf.mxu0  ;;  %v3024_v29 = vpop.f32.mrf.mxu1 }
 0x137   :  { %v571_v32 = vmax.f32 %v442_v24, 0.0  ;;  %v1100_v33 = vmax.f32 %v971_v26, 0.0 }
 0x138   :  { %v446_v34 = vpop.f32.mrf.mxu0  ;;  %v975_v35 = vpop.f32.mrf.mxu1  ;;  %3132 = vmatmul.mubr.msk.bf16.gmra.mxu0 %vm233_vm3, %v3377_v21  ;;  %3242 = vmatmul.mubr.msk.bf16.gmra.mxu1 %vm233_vm3, %v3378_v22  ;;  %v3381_v21 = vld [vmem:[%s4571_s0 + $0x1f0] sm:$0xff]  }
 0x139   :  { %v4008_v36 = vmax.f32 %v571_v32, %v1100_v33  ;;  %v447_v37 = vadd.f32 %v3766_v60, %v446_v34  ;;  %v976_v40 = vadd.f32 %v3766_v60, %v975_v35  ;;  %3135 = vmatprep.mubr.msk.bf16.mxu0 %vm3409_vm2, %v4574_v0  ;;  %3245 = vmatprep.mubr.msk.bf16.mxu1 %vm3409_vm2, %v4574_v0  ;;  %v3382_v22 = vld [vmem:[%s4571_s0 + $0x2b4] sm:$0xff]  }
 0x13a   :  { %v2917_v43 = vpop.f32.mrf.mxu0  ;;  %v3027_v44 = vpop.f32.mrf.mxu1 }
 0x13b   :  { %v572_v45 = vmax.f32 %v447_v37, 0.0  ;;  %v1101_v46 = vmax.f32 %v976_v40, 0.0 }
 0x13c   :  { %v449_v47 = vpop.f32.mrf.mxu0  ;;  %v978_v48 = vpop.f32.mrf.mxu1 }
 0x13d   :  { %v4022_v54 = vmax.f32 %v572_v45, %v1101_v46  ;;  %v450_v55 = vadd.f32 %v3766_v60, %v449_v47  ;;  %v979_v57 = vadd.f32 %v3766_v60, %v978_v48 }
 0x13e   :  { %v2918_v58 = vpop.f32.mrf.mxu0  ;;  %v3028_v61 = vpop.f32.mrf.mxu1 }
 0x13f   :  { %v573_v62 = vmax.f32 %v450_v55, 0.0  ;;  %v1102_v63 = vmax.f32 %v979_v57, 0.0  ;;  %v3383_v55 = vld [vmem:[%s4571_s0 + $0x1f8] sm:$0xff]  }
 0x140   :  { %v454_v3 = vpop.f32.mrf.mxu0  ;;  %v983_v4 = vpop.f32.mrf.mxu1  ;;  %3136 = vmatmul.mubr.msk.bf16.gmra.mxu0 %vm233_vm3, %v3379_v51  ;;  %3246 = vmatmul.mubr.msk.bf16.gmra.mxu1 %vm233_vm3, %v3380_v52  ;;  %v3384_v57 = vld [vmem:[%s4571_s0 + $0x2bc] sm:$0xff]  }
 0x141   :  { %v4028_v5 = vmax.f32 %v573_v62, %v1102_v63  ;;  %v455_v7 = vadd.f32 %v3766_v60, %v454_v3  ;;  %v984_v9 = vadd.f32 %v3766_v60, %v983_v4  ;;  %3139 = vmatprep.mubr.msk.bf16.mxu0 %vm3409_vm2, %v4574_v0  ;;  %3249 = vmatprep.mubr.msk.bf16.mxu1 %vm3409_vm2, %v4574_v0 }
 0x142   :  { %v2921_v11 = vpop.f32.mrf.mxu0  ;;  %v3031_v12 = vpop.f32.mrf.mxu1 }
 0x143   :  { %v574_v15 = vmax.f32 %v455_v7, 0.0  ;;  %v1103_v16 = vmax.f32 %v984_v9, 0.0 }
 0x144   :  { %v457_v17 = vpop.f32.mrf.mxu0  ;;  %v986_v20 = vpop.f32.mrf.mxu1 }
 0x145   :  { %v4042_v24 = vmax.f32 %v574_v15, %v1103_v16  ;;  %v458_v26 = vadd.f32 %v3766_v60, %v457_v17  ;;  %v987_v27 = vadd.f32 %v3766_v60, %v986_v20 }
 0x146   :  { %v2922_v29 = vpop.f32.mrf.mxu0  ;;  %v3032_v32 = vpop.f32.mrf.mxu1 }
 0x147   :  { %v575_v33 = vmax.f32 %v458_v26, 0.0  ;;  %v1104_v34 = vmax.f32 %v987_v27, 0.0  ;;  %v3385_v29 = vld [vmem:[%s4571_s0 + $0x200] sm:$0xff]  }
 0x148   :  { %v462_v35 = vpop.f32.mrf.mxu0  ;;  %v991_v37 = vpop.f32.mrf.mxu1  ;;  %3140 = vmatmul.mubr.msk.bf16.gmra.mxu0 %vm233_vm3, %v3381_v21  ;;  %3250 = vmatmul.mubr.msk.bf16.gmra.mxu1 %vm233_vm3, %v3382_v22  ;;  %v3386_v32 = vld [vmem:[%s4571_s0 + $0x2c4] sm:$0xff]  }
 0x149   :  { %v4048_v40 = vmax.f32 %v575_v33, %v1104_v34  ;;  %v463_v43 = vadd.f32 %v3766_v60, %v462_v35  ;;  %v992_v44 = vadd.f32 %v3766_v60, %v991_v37  ;;  %3143 = vmatprep.mubr.msk.bf16.mxu0 %vm3409_vm2, %v4574_v0  ;;  %3253 = vmatprep.mubr.msk.bf16.mxu1 %vm3409_vm2, %v4574_v0 }
 0x14a   :  { %v2925_v45 = vpop.f32.mrf.mxu0  ;;  %v3035_v46 = vpop.f32.mrf.mxu1 }
 0x14b   :  { %v576_v47 = vmax.f32 %v463_v43, 0.0  ;;  %v1105_v48 = vmax.f32 %v992_v44, 0.0 }
 0x14c   :  { %v465_v51 = vpop.f32.mrf.mxu0  ;;  %v994_v52 = vpop.f32.mrf.mxu1 }
 0x14d   :  { %v4062_v58 = vmax.f32 %v576_v47, %v1105_v48  ;;  %v466_v61 = vadd.f32 %v3766_v60, %v465_v51  ;;  %v995_v62 = vadd.f32 %v3766_v60, %v994_v52 }
 0x14e   :  { %v2926_v63 = vpop.f32.mrf.mxu0  ;;  %v3036_v3 = vpop.f32.mrf.mxu1 }
 0x14f   :  { %v577_v4 = vmax.f32 %v466_v61, 0.0  ;;  %v1106_v7 = vmax.f32 %v995_v62, 0.0 }
 0x150   :  { %v470_v9 = vpop.f32.mrf.mxu0  ;;  %v999_v11 = vpop.f32.mrf.mxu1  ;;  %3144 = vmatmul.mubr.msk.bf16.gmra.mxu0 %vm233_vm3, %v3383_v55  ;;  %3254 = vmatmul.mubr.msk.bf16.gmra.mxu1 %vm233_vm3, %v3384_v57 }
 0x151   :  { %v4068_v12 = vmax.f32 %v577_v4, %v1106_v7  ;;  %v471_v15 = vadd.f32 %v3766_v60, %v470_v9  ;;  %v1000_v16 = vadd.f32 %v3766_v60, %v999_v11  ;;  %3147 = vmatprep.mubr.msk.bf16.mxu0 %vm3409_vm2, %v4574_v0  ;;  %3257 = vmatprep.mubr.msk.bf16.mxu1 %vm3409_vm2, %v4574_v0  ;;  %v3387_v4 = vld [vmem:[%s4571_s0 + $0x208] sm:$0xff]  }
 0x152   :  { %v2929_v17 = vpop.f32.mrf.mxu0  ;;  %v3039_v20 = vpop.f32.mrf.mxu1  ;;  %v3388_v7 = vld [vmem:[%s4571_s0 + $0x2cc] sm:$0xff]  }
 0x153   :  { %v578_v21 = vmax.f32 %v471_v15, 0.0  ;;  %v1107_v22 = vmax.f32 %v1000_v16, 0.0 }
 0x154   :  { %v473_v26 = vpop.f32.mrf.mxu0  ;;  %v1002_v27 = vpop.f32.mrf.mxu1 }
 0x155   :  { %v4082_v33 = vmax.f32 %v578_v21, %v1107_v22  ;;  %v474_v34 = vadd.f32 %v3766_v60, %v473_v26  ;;  %v1003_v35 = vadd.f32 %v3766_v60, %v1002_v27 }
 0x156   :  { %v2930_v37 = vpop.f32.mrf.mxu0  ;;  %v3040_v43 = vpop.f32.mrf.mxu1 }
 0x157   :  { %v579_v44 = vmax.f32 %v474_v34, 0.0  ;;  %v1108_v45 = vmax.f32 %v1003_v35, 0.0 }
 0x158   :  { %v478_v46 = vpop.f32.mrf.mxu0  ;;  %v1007_v47 = vpop.f32.mrf.mxu1  ;;  %3148 = vmatmul.mubr.msk.bf16.gmra.mxu0 %vm233_vm3, %v3385_v29  ;;  %3258 = vmatmul.mubr.msk.bf16.gmra.mxu1 %vm233_vm3, %v3386_v32 }
 0x159   :  { %v4088_v48 = vmax.f32 %v579_v44, %v1108_v45  ;;  %v479_v51 = vadd.f32 %v3766_v60, %v478_v46  ;;  %v1008_v52 = vadd.f32 %v3766_v60, %v1007_v47  ;;  %3151 = vmatprep.mubr.msk.bf16.mxu0 %vm3409_vm2, %v4574_v0  ;;  %3261 = vmatprep.mubr.msk.bf16.mxu1 %vm3409_vm2, %v4574_v0  ;;  %v3389_v46 = vld [vmem:[%s4571_s0 + $0x210] sm:$0xff]  }
 0x15a   :  { %v2933_v55 = vpop.f32.mrf.mxu0  ;;  %v3043_v57 = vpop.f32.mrf.mxu1  ;;  %v3390_v47 = vld [vmem:[%s4571_s0 + $0x2d4] sm:$0xff]  }
 0x15b   :  { %v580_v61 = vmax.f32 %v479_v51, 0.0  ;;  %v1109_v62 = vmax.f32 %v1008_v52, 0.0 }
 0x15c   :  { %v481_v63 = vpop.f32.mrf.mxu0  ;;  %v1010_v3 = vpop.f32.mrf.mxu1 }
 0x15d   :  { %v4102_v9 = vmax.f32 %v580_v61, %v1109_v62  ;;  %v482_v11 = vadd.f32 %v3766_v60, %v481_v63  ;;  %v1011_v15 = vadd.f32 %v3766_v60, %v1010_v3 }
 0x15e   :  { %v2934_v16 = vpop.f32.mrf.mxu0  ;;  %v3044_v17 = vpop.f32.mrf.mxu1 }
 0x15f   :  { %v581_v20 = vmax.f32 %v482_v11, 0.0  ;;  %v1110_v21 = vmax.f32 %v1011_v15, 0.0 }
 0x160   :  { %v486_v22 = vpop.f32.mrf.mxu0  ;;  %v1015_v26 = vpop.f32.mrf.mxu1  ;;  %3152 = vmatmul.mubr.msk.bf16.gmra.mxu0 %vm233_vm3, %v3387_v4  ;;  %3262 = vmatmul.mubr.msk.bf16.gmra.mxu1 %vm233_vm3, %v3388_v7 }
 0x161   :  { %v4108_v27 = vmax.f32 %v581_v20, %v1110_v21  ;;  %v487_v29 = vadd.f32 %v3766_v60, %v486_v22  ;;  %v1016_v32 = vadd.f32 %v3766_v60, %v1015_v26  ;;  %3155 = vmatprep.mubr.msk.bf16.mxu0 %vm3409_vm2, %v4574_v0  ;;  %3265 = vmatprep.mubr.msk.bf16.mxu1 %vm3409_vm2, %v4574_v0 }
 0x162   :  { %v2937_v34 = vpop.f32.mrf.mxu0  ;;  %v3047_v35 = vpop.f32.mrf.mxu1 }
 0x163   :  { %v582_v37 = vmax.f32 %v487_v29, 0.0  ;;  %v1111_v43 = vmax.f32 %v1016_v32, 0.0  ;;  %v3391_v29 = vld [vmem:[%s4571_s0 + $0x218] sm:$0xff]  }
 0x164   :  { %v489_v44 = vpop.f32.mrf.mxu0  ;;  %v1018_v45 = vpop.f32.mrf.mxu1  ;;  %v3392_v32 = vld [vmem:[%s4571_s0 + $0x2dc] sm:$0xff]  }
 0x165   :  { %v4122_v51 = vmax.f32 %v582_v37, %v1111_v43  ;;  %v490_v52 = vadd.f32 %v3766_v60, %v489_v44  ;;  %v1019_v55 = vadd.f32 %v3766_v60, %v1018_v45 }
 0x166   :  { %v2938_v57 = vpop.f32.mrf.mxu0  ;;  %v3048_v61 = vpop.f32.mrf.mxu1 }
 0x167   :  { %v583_v62 = vmax.f32 %v490_v52, 0.0  ;;  %v1112_v63 = vmax.f32 %v1019_v55, 0.0 }
 0x168   :  { %v494_v3 = vpop.f32.mrf.mxu0  ;;  %v1023_v4 = vpop.f32.mrf.mxu1  ;;  %3156 = vmatmul.mubr.msk.bf16.gmra.mxu0 %vm233_vm3, %v3389_v46  ;;  %3266 = vmatmul.mubr.msk.bf16.gmra.mxu1 %vm233_vm3, %v3390_v47 }
 0x169   :  { %v4128_v7 = vmax.f32 %v583_v62, %v1112_v63  ;;  %v495_v11 = vadd.f32 %v3766_v60, %v494_v3  ;;  %v1024_v15 = vadd.f32 %v3766_v60, %v1023_v4  ;;  %3159 = vmatprep.mubr.msk.bf16.mxu0 %vm3409_vm2, %v4574_v0  ;;  %3269 = vmatprep.mubr.msk.bf16.mxu1 %vm3409_vm2, %v4574_v0 }
 0x16a   :  { %v2941_v16 = vpop.f32.mrf.mxu0  ;;  %v3051_v17 = vpop.f32.mrf.mxu1 }
 0x16b   :  { %v584_v20 = vmax.f32 %v495_v11, 0.0  ;;  %v1113_v21 = vmax.f32 %v1024_v15, 0.0  ;;  %v3393_v16 = vld [vmem:[%s4571_s0 + $0x220] sm:$0xff]  }
 0x16c   :  { %v497_v22 = vpop.f32.mrf.mxu0  ;;  %v1026_v26 = vpop.f32.mrf.mxu1  ;;  %v3394_v17 = vld [vmem:[%s4571_s0 + $0x2e4] sm:$0xff]  }
 0x16d   :  { %v4142_v34 = vmax.f32 %v584_v20, %v1113_v21  ;;  %v498_v35 = vadd.f32 %v3766_v60, %v497_v22  ;;  %v1027_v37 = vadd.f32 %v3766_v60, %v1026_v26 }
 0x16e   :  { %v2942_v43 = vpop.f32.mrf.mxu0  ;;  %v3052_v44 = vpop.f32.mrf.mxu1 }
 0x16f   :  { %v585_v45 = vmax.f32 %v498_v35, 0.0  ;;  %v1114_v46 = vmax.f32 %v1027_v37, 0.0 }
 0x170   :  { %v502_v47 = vpop.f32.mrf.mxu0  ;;  %v1031_v52 = vpop.f32.mrf.mxu1  ;;  %3160 = vmatmul.mubr.msk.bf16.gmra.mxu0 %vm233_vm3, %v3391_v29  ;;  %3270 = vmatmul.mubr.msk.bf16.gmra.mxu1 %vm233_vm3, %v3392_v32 }
 0x171   :  { %v4148_v55 = vmax.f32 %v585_v45, %v1114_v46  ;;  %v503_v57 = vadd.f32 %v3766_v60, %v502_v47  ;;  %v1032_v61 = vadd.f32 %v3766_v60, %v1031_v52  ;;  %3163 = vmatprep.mubr.msk.bf16.mxu0 %vm3409_vm2, %v4574_v0  ;;  %3273 = vmatprep.mubr.msk.bf16.mxu1 %vm3409_vm2, %v4574_v0 }
 0x172   :  { %v2945_v62 = vpop.f32.mrf.mxu0  ;;  %v3055_v63 = vpop.f32.mrf.mxu1 }
 0x173   :  { %v586_v3 = vmax.f32 %v503_v57, 0.0  ;;  %v1115_v4 = vmax.f32 %v1032_v61, 0.0 }
 0x174   :  { %v505_v11 = vpop.f32.mrf.mxu0  ;;  %v1034_v15 = vpop.f32.mrf.mxu1 }
 0x175   :  { %v4162_v20 = vmax.f32 %v586_v3, %v1115_v4  ;;  %v506_v21 = vadd.f32 %v3766_v60, %v505_v11  ;;  %v1035_v22 = vadd.f32 %v3766_v60, %v1034_v15  ;;  %v3395_v3 = vld [vmem:[%s4571_s0 + $0x228] sm:$0xff]  }
 0x176   :  { %v2946_v26 = vpop.f32.mrf.mxu0  ;;  %v3056_v29 = vpop.f32.mrf.mxu1  ;;  %v3396_v4 = vld [vmem:[%s4571_s0 + $0x2ec] sm:$0xff]  }
 0x177   :  { %v587_v32 = vmax.f32 %v506_v21, 0.0  ;;  %v1116_v35 = vmax.f32 %v1035_v22, 0.0 }
 0x178   :  { %v510_v37 = vpop.f32.mrf.mxu0  ;;  %v1039_v43 = vpop.f32.mrf.mxu1  ;;  %3164 = vmatmul.mubr.msk.bf16.gmra.mxu0 %vm233_vm3, %v3393_v16  ;;  %3274 = vmatmul.mubr.msk.bf16.gmra.mxu1 %vm233_vm3, %v3394_v17 }
 0x179   :  { %v4168_v44 = vmax.f32 %v587_v32, %v1116_v35  ;;  %v511_v45 = vadd.f32 %v3766_v60, %v510_v37  ;;  %v1040_v46 = vadd.f32 %v3766_v60, %v1039_v43  ;;  %3167 = vmatprep.mubr.msk.bf16.mxu0 %vm3409_vm2, %v4574_v0  ;;  %3277 = vmatprep.mubr.msk.bf16.mxu1 %vm3409_vm2, %v4574_v0 }
 0x17a   :  { %v2949_v47 = vpop.f32.mrf.mxu0  ;;  %v3059_v52 = vpop.f32.mrf.mxu1 }
 0x17b   :  { %v588_v57 = vmax.f32 %v511_v45, 0.0  ;;  %v1117_v61 = vmax.f32 %v1040_v46, 0.0 }
 0x17c   :  { %v513_v62 = vpop.f32.mrf.mxu0  ;;  %v1042_v63 = vpop.f32.mrf.mxu1 }
 0x17d   :  { %v4182_v11 = vmax.f32 %v588_v57, %v1117_v61  ;;  %v514_v15 = vadd.f32 %v3766_v60, %v513_v62  ;;  %v1043_v16 = vadd.f32 %v3766_v60, %v1042_v63  ;;  %v3397_v62 = vld [vmem:[%s4571_s0 + $0x230] sm:$0xff]  }
 0x17e   :  { %v2950_v17 = vpop.f32.mrf.mxu0  ;;  %v3060_v21 = vpop.f32.mrf.mxu1 }
 0x17f   :  { %v589_v22 = vmax.f32 %v514_v15, 0.0  ;;  %v1118_v26 = vmax.f32 %v1043_v16, 0.0 }
 0x180   :  { %v518_v29 = vpop.f32.mrf.mxu0  ;;  %v1047_v32 = vpop.f32.mrf.mxu1  ;;  %3168 = vmatmul.mubr.msk.bf16.gmra.mxu0 %vm233_vm3, %v3395_v3  ;;  %3278 = vmatmul.mubr.msk.bf16.gmra.mxu1 %vm233_vm3, %v3396_v4  ;;  %v4207_v3 = vld [vmem:[%s4572_s2] ss:$0 sm:$0xff] }
 0x181   :  { %v4188_v35 = vmax.f32 %v589_v22, %v1118_v26  ;;  %v519_v37 = vadd.f32 %v3766_v60, %v518_v29  ;;  %v1048_v43 = vadd.f32 %v3766_v60, %v1047_v32  ;;  %3171 = vmatprep.mubr.msk.bf16.mxu0 %vm3409_vm2, %v4574_v0  ;;  %3281 = vmatprep.mubr.msk.bf16.mxu1 %vm3409_vm2, %v4574_v0  ;;  %v3398_v60 = vld [vmem:[%s4571_s0 + $0x2f4] sm:$0xff]  }
 0x182   :  { %v2953_v45 = vpop.f32.mrf.mxu0  ;;  %v3063_v46 = vpop.f32.mrf.mxu1 }
 0x183   :  { %v590_v47 = vmax.f32 %v519_v37, 0.0  ;;  %v1119_v52 = vmax.f32 %v1048_v43, 0.0 }
 0x184   :  { %v521_v57 = vpop.f32.mrf.mxu0  ;;  %v1050_v61 = vpop.f32.mrf.mxu1 }
 0x185   :  { %v4202_v63 = vmax.f32 %v590_v47, %v1119_v52  ;;  %v522_v4 = vadd.f32 %v4207_v3, %v521_v57  ;;  %v1051_v15 = vadd.f32 %v4207_v3, %v1050_v61 }
 0x186   :  { %v2954_v16 = vpop.f32.mrf.mxu0  ;;  %v3064_v17 = vpop.f32.mrf.mxu1 }
 0x187   :  { %v591_v21 = vmax.f32 %v522_v4, 0.0  ;;  %v1120_v22 = vmax.f32 %v1051_v15, 0.0 }
 0x188   :  { %v526_v26 = vpop.f32.mrf.mxu0  ;;  %v1055_v29 = vpop.f32.mrf.mxu1  ;;  %3172 = vmatmul.mubr.msk.bf16.gmra.mxu0 %vm233_vm3, %v3397_v62  ;;  %3282 = vmatmul.mubr.msk.bf16.gmra.mxu1 %vm233_vm3, %v3398_v60  ;;  %v3399_v62 = vld [vmem:[%s4571_s0 + $0x238] sm:$0xff]  }
 0x189   :  { %v4213_v32 = vmax.f32 %v591_v21, %v1120_v22  ;;  %v527_v37 = vadd.f32 %v4207_v3, %v526_v26  ;;  %v1056_v43 = vadd.f32 %v4207_v3, %v1055_v29  ;;  %3175 = vmatprep.mubr.msk.bf16.mxu0 %vm3409_vm2, %v4574_v0  ;;  %3285 = vmatprep.mubr.msk.bf16.mxu1 %vm3409_vm2, %v4574_v0  ;;  %v3400_v60 = vld [vmem:[%s4571_s0 + $0x2fc] sm:$0xff]  }
 0x18a   :  { %v2957_v45 = vpop.f32.mrf.mxu0  ;;  %v3067_v46 = vpop.f32.mrf.mxu1 }
 0x18b   :  { %v592_v47 = vmax.f32 %v527_v37, 0.0  ;;  %v1121_v52 = vmax.f32 %v1056_v43, 0.0 }
 0x18c   :  { %v529_v57 = vpop.f32.mrf.mxu0  ;;  %v1058_v61 = vpop.f32.mrf.mxu1 }
 0x18d   :  { %v4227_v4 = vmax.f32 %v592_v47, %v1121_v52  ;;  %v530_v15 = vadd.f32 %v4207_v3, %v529_v57  ;;  %v1059_v16 = vadd.f32 %v4207_v3, %v1058_v61 }
 0x18e   :  { %v2958_v17 = vpop.f32.mrf.mxu0  ;;  %v3068_v21 = vpop.f32.mrf.mxu1 }
 0x18f   :  { %v593_v22 = vmax.f32 %v530_v15, 0.0  ;;  %v1122_v26 = vmax.f32 %v1059_v16, 0.0  ;;  %v3402_v16 = vld [vmem:[%s4571_s0 + $0x304] sm:$0xff]  }
 0x190   :  { %v534_v29 = vpop.f32.mrf.mxu0  ;;  %v1063_v37 = vpop.f32.mrf.mxu1  ;;  %3176 = vmatmul.mubr.msk.bf16.gmra.mxu0 %vm233_vm3, %v3399_v62  ;;  %3286 = vmatmul.mubr.msk.bf16.gmra.mxu1 %vm233_vm3, %v3400_v60  ;;  %v3401_v60 = vld [vmem:[%s4571_s0 + $0x240] sm:$0xff]  }
 0x191   :  { %v4233_v43 = vmax.f32 %v593_v22, %v1122_v26  ;;  %v535_v45 = vadd.f32 %v4207_v3, %v534_v29  ;;  %v1064_v46 = vadd.f32 %v4207_v3, %v1063_v37  ;;  %3179 = vmatprep.mubr.msk.bf16.mxu0 %vm3409_vm2, %v4574_v0  ;;  %3289 = vmatprep.mubr.msk.bf16.mxu1 %vm3409_vm2, %v4574_v0 }
 0x192   :  { %v2961_v47 = vpop.f32.mrf.mxu0  ;;  %v3071_v52 = vpop.f32.mrf.mxu1 }
 0x193   :  { %4576 = vst [vmem:[#allocation2_spill] sm:$0xff] %v4233_v43  ;;  %v594_v57 = vmax.f32 %v535_v45, 0.0  ;;  %v1123_v61 = vmax.f32 %v1064_v46, 0.0 }
 0x194   :  { %v537_v15 = vpop.f32.mrf.mxu0  ;;  %v1066_v62 = vpop.f32.mrf.mxu1 }
 0x195   :  { %v4247_v17 = vmax.f32 %v594_v57, %v1123_v61  ;;  %v538_v21 = vadd.f32 %v4207_v3, %v537_v15  ;;  %v1067_v22 = vadd.f32 %v4207_v3, %v1066_v62  ;;  %v4579_v61 = vmov 0.0  }
 0x196   :  { %v2962_v26 = vpop.f32.mrf.mxu0  ;;  %v3072_v29 = vpop.f32.mrf.mxu1 }
 0x197   :  { %4577 = vst [vmem:[#allocation3_spill] sm:$0xff] %v4247_v17  ;;  %v595_v37 = vmax.f32 %v538_v21, 0.0  ;;  %v1124_v45 = vmax.f32 %v1067_v22, 0.0  ;;  %v3404_v29 = vld [vmem:[%s4571_s0 + $0x30c] ss:$0 sps:$4 sm:$0xff]  }
 0x198   :  { %v542_v46 = vpop.f32.mrf.mxu0  ;;  %v1071_v47 = vpop.f32.mrf.mxu1  ;;  %3180 = vmatmul.mubr.msk.bf16.gmra.mxu0 %vm233_vm3, %v3401_v60  ;;  %3290 = vmatmul.mubr.msk.bf16.gmra.mxu1 %vm233_vm3, %v3402_v16  ;;  %v3403_v16 = vld [vmem:[%s4571_s0 + $0x248] ss:$0 sps:$4 sm:$0xff]  }
 0x199   :  { %v4253_v52 = vmax.f32 %v595_v37, %v1124_v45  ;;  %v543_v0 = vadd.f32 %v4207_v3, %v542_v46  ;;  %v1072_v57 = vadd.f32 %v4207_v3, %v1071_v47  ;;  %3183 = vmatprep.mubr.msk.bf16.mxu0 %vm3409_vm2, %v4579_v61  ;;  %3293 = vmatprep.mubr.msk.bf16.mxu1 %vm3409_vm2, %v4579_v61 }
 0x19a   :  { %v2965_v15 = vpop.f32.mrf.mxu0  ;;  %v3075_v62 = vpop.f32.mrf.mxu1 }
 0x19b   :  { %4578 = vst [vmem:[#allocation4_spill] sm:$0xff] %v4253_v52  ;;  %v596_v21 = vmax.f32 %v543_v0, 0.0  ;;  %v1125_v22 = vmax.f32 %v1072_v57, 0.0 }
 0x19c   :  { %v545_v26 = vpop.f32.mrf.mxu0  ;;  %v1074_v60 = vpop.f32.mrf.mxu1 }
 0x19d   :  { %v4267_v37 = vmax.f32 %v596_v21, %v1125_v22 }
 0x19e   :  { %v2966_v45 = vpop.f32.mrf.mxu0  ;;  %v3076_v46 = vpop.f32.mrf.mxu1 }
 0x19f   :  { %4580 = vst [vmem:[#allocation5_spill] sm:$0xff] %v4267_v37 }
 0x1a0   :  { %v1457_v47 = vpop.f32.mrf.mxu0  ;;  %3184 = vmatmul.mubr.msk.bf16.gmra.mxu0 %vm233_vm3, %v3403_v16  ;;  %v2035_v61 = vpop.f32.mrf.mxu1  ;;  %3294 = vmatmul.mubr.msk.bf16.gmra.mxu1 %vm233_vm3, %v3404_v29 }
 0x1a1   :  { %v1458_v0 = vadd.f32 %v4207_v3, %v1457_v47  ;;  %v2036_v57 = vadd.f32 %v4207_v3, %v2035_v61 }
 0x1a2   :  { %v3089_v15 = vpop.f32.mrf.mxu0  ;;  %v3199_v62 = vpop.f32.mrf.mxu1 }
 0x1a3   :  { %v1655_v26 = vmax.f32 %v1458_v0, 0.0  ;;  %v2233_v60 = vmax.f32 %v2036_v57, 0.0 }
 0x1a4   :  { %v1460_v52 = vpop.f32.mrf.mxu0  ;;  %v2038_v17 = vpop.f32.mrf.mxu1 }
 0x1a5   :  { %v1704_v21 = vmax.f32 %v3782_v10, %v1655_v26  ;;  %v1461_v22 = vadd.f32 %v4207_v3, %v1460_v52  ;;  %v2039_v45 = vadd.f32 %v4207_v3, %v2038_v17 }
 0x1a6   :  { %v3090_v16 = vpop.f32.mrf.mxu0  ;;  %v3200_v46 = vpop.f32.mrf.mxu1 }
 0x1a7   :  { %v2282_v37 = vmax.f32 %v1704_v21, %v2233_v60  ;;  %v1656_v29 = vmax.f32 %v1461_v22, 0.0  ;;  %v2234_v0 = vmax.f32 %v2039_v45, 0.0 }
 0x1a8   :  { %v1465_v43 = vpop.f32.mrf.mxu0  ;;  %v2043_v47 = vpop.f32.mrf.mxu1 }
 0x1a9   :  { %2331 = vst [vmem:[%s4573_s3] sm:$0xff] %v2282_v37  ;;  %v1705_v61 = vmax.f32 %v3788_v19, %v1656_v29  ;;  %v1466_v57 = vadd.f32 %v4207_v3, %v1465_v43  ;;  %v2044_v10 = vadd.f32 %v4207_v3, %v2043_v47 }
 0x1aa   :  { %v3093_v52 = vpop.f32.mrf.mxu0  ;;  %v3203_v15 = vpop.f32.mrf.mxu1 }
 0x1ab   :  { %v2283_v17 = vmax.f32 %v1705_v61, %v2234_v0  ;;  %v1657_v62 = vmax.f32 %v1466_v57, 0.0  ;;  %v2235_v26 = vmax.f32 %v2044_v10, 0.0 }
 0x1ac   :  { %v1468_v60 = vpop.f32.mrf.mxu0  ;;  %v2046_v21 = vpop.f32.mrf.mxu1 }
 0x1ad   :  { %2332 = vst [vmem:[%s4573_s3 + $0x8] sm:$0xff] %v2283_v17  ;;  %v1706_v37 = vmax.f32 %v3802_v30, %v1657_v62  ;;  %v1469_v19 = vadd.f32 %v4207_v3, %v1468_v60  ;;  %v2047_v22 = vadd.f32 %v4207_v3, %v2046_v21 }
 0x1ae   :  { %v3094_v43 = vpop.f32.mrf.mxu0  ;;  %v3204_v45 = vpop.f32.mrf.mxu1 }
 0x1af   :  { %v2284_v16 = vmax.f32 %v1706_v37, %v2235_v26  ;;  %v1658_v46 = vmax.f32 %v1469_v19, 0.0  ;;  %v2236_v0 = vmax.f32 %v2047_v22, 0.0 }
 0x1b0   :  { %v1473_v29 = vpop.f32.mrf.mxu0  ;;  %v2051_v47 = vpop.f32.mrf.mxu1 }
 0x1b1   :  { %2333 = vst [vmem:[%s4573_s3 + $0x10] sm:$0xff] %v2284_v16  ;;  %v1707_v61 = vmax.f32 %v3808_v39, %v1658_v46  ;;  %v1474_v57 = vadd.f32 %v4207_v3, %v1473_v29  ;;  %v2052_v30 = vadd.f32 %v4207_v3, %v2051_v47 }
 0x1b2   :  { %v3097_v10 = vpop.f32.mrf.mxu0  ;;  %v3207_v52 = vpop.f32.mrf.mxu1 }
 0x1b3   :  { %v2285_v15 = vmax.f32 %v1707_v61, %v2236_v0  ;;  %v1659_v17 = vmax.f32 %v1474_v57, 0.0  ;;  %v2237_v62 = vmax.f32 %v2052_v30, 0.0 }
 0x1b4   :  { %v1476_v26 = vpop.f32.mrf.mxu0  ;;  %v2054_v60 = vpop.f32.mrf.mxu1 }
 0x1b5   :  { %2334 = vst [vmem:[%s4573_s3 + $0x18] sm:$0xff] %v2285_v15  ;;  %v1708_v21 = vmax.f32 %v3822_v50, %v1659_v17  ;;  %v1477_v39 = vadd.f32 %v4207_v3, %v1476_v26  ;;  %v2055_v37 = vadd.f32 %v4207_v3, %v2054_v60 }
 0x1b6   :  { %v3098_v19 = vpop.f32.mrf.mxu0  ;;  %v3208_v22 = vpop.f32.mrf.mxu1 }
 0x1b7   :  { %v2286_v43 = vmax.f32 %v1708_v21, %v2237_v62  ;;  %v1660_v45 = vmax.f32 %v1477_v39, 0.0  ;;  %v2238_v47 = vmax.f32 %v2055_v37, 0.0 }
 0x1b8   :  { %v1481_v16 = vpop.f32.mrf.mxu0  ;;  %v2059_v46 = vpop.f32.mrf.mxu1 }
 0x1b9   :  { %2335 = vst [vmem:[%s4573_s3 + $0x20] sm:$0xff] %v2286_v43  ;;  %v1709_v29 = vmax.f32 %v3828_v59, %v1660_v45  ;;  %v1482_v61 = vadd.f32 %v4207_v3, %v1481_v16  ;;  %v2060_v50 = vadd.f32 %v4207_v3, %v2059_v46 }
 0x1ba   :  { %v3101_v0 = vpop.f32.mrf.mxu0  ;;  %v3211_v57 = vpop.f32.mrf.mxu1 }
 0x1bb   :  { %v2287_v30 = vmax.f32 %v1709_v29, %v2238_v47  ;;  %v1661_v10 = vmax.f32 %v1482_v61, 0.0  ;;  %v2239_v52 = vmax.f32 %v2060_v50, 0.0 }
 0x1bc   :  { %v1484_v15 = vpop.f32.mrf.mxu0  ;;  %v2062_v17 = vpop.f32.mrf.mxu1 }
 0x1bd   :  { %2336 = vst [vmem:[%s4573_s3 + $0x28] sm:$0xff] %v2287_v30  ;;  %v1710_v62 = vmax.f32 %v3842_v8, %v1661_v10  ;;  %v1485_v59 = vadd.f32 %v4207_v3, %v1484_v15  ;;  %v2063_v26 = vadd.f32 %v4207_v3, %v2062_v17 }
 0x1be   :  { %v3102_v60 = vpop.f32.mrf.mxu0  ;;  %v3212_v21 = vpop.f32.mrf.mxu1 }
 0x1bf   :  { %v2288_v39 = vmax.f32 %v1710_v62, %v2239_v52  ;;  %v1662_v37 = vmax.f32 %v1485_v59, 0.0  ;;  %v2240_v45 = vmax.f32 %v2063_v26, 0.0 }
 0x1c0   :  { %v1489_v19 = vpop.f32.mrf.mxu0  ;;  %v2067_v22 = vpop.f32.mrf.mxu1 }
 0x1c1   :  { %2337 = vst [vmem:[%s4573_s3 + $0x30] sm:$0xff] %v2288_v39  ;;  %v1711_v43 = vmax.f32 %v3848_v18, %v1662_v37  ;;  %v1490_v16 = vadd.f32 %v4207_v3, %v1489_v19  ;;  %v2068_v8 = vadd.f32 %v4207_v3, %v2067_v22 }
 0x1c2   :  { %v3105_v46 = vpop.f32.mrf.mxu0  ;;  %v3215_v29 = vpop.f32.mrf.mxu1 }
 0x1c3   :  { %v2289_v47 = vmax.f32 %v1711_v43, %v2240_v45  ;;  %v1663_v61 = vmax.f32 %v1490_v16, 0.0  ;;  %v2241_v50 = vmax.f32 %v2068_v8, 0.0 }
 0x1c4   :  { %v1492_v0 = vpop.f32.mrf.mxu0  ;;  %v2070_v57 = vpop.f32.mrf.mxu1 }
 0x1c5   :  { %2338 = vst [vmem:[%s4573_s3 + $0x38] sm:$0xff] %v2289_v47  ;;  %v1712_v30 = vmax.f32 %v3862_v31, %v1663_v61  ;;  %v1493_v18 = vadd.f32 %v4207_v3, %v1492_v0  ;;  %v2071_v10 = vadd.f32 %v4207_v3, %v2070_v57 }
 0x1c6   :  { %v3106_v52 = vpop.f32.mrf.mxu0  ;;  %v3216_v15 = vpop.f32.mrf.mxu1 }
 0x1c7   :  { %v2290_v17 = vmax.f32 %v1712_v30, %v2241_v50  ;;  %v1664_v62 = vmax.f32 %v1493_v18, 0.0  ;;  %v2242_v21 = vmax.f32 %v2071_v10, 0.0 }
 0x1c8   :  { %v1497_v59 = vpop.f32.mrf.mxu0  ;;  %v2075_v26 = vpop.f32.mrf.mxu1 }
 0x1c9   :  { %2339 = vst [vmem:[%s4573_s3 + $0x40] sm:$0xff] %v2290_v17  ;;  %v1713_v60 = vmax.f32 %v3868_v41, %v1664_v62  ;;  %v1498_v39 = vadd.f32 %v4207_v3, %v1497_v59  ;;  %v2076_v31 = vadd.f32 %v4207_v3, %v2075_v26 }
 0x1ca   :  { %v3109_v37 = vpop.f32.mrf.mxu0  ;;  %v3219_v19 = vpop.f32.mrf.mxu1 }
 0x1cb   :  { %v2291_v22 = vmax.f32 %v1713_v60, %v2242_v21  ;;  %v1665_v43 = vmax.f32 %v1498_v39, 0.0  ;;  %v2243_v45 = vmax.f32 %v2076_v31, 0.0 }
 0x1cc   :  { %v1500_v16 = vpop.f32.mrf.mxu0  ;;  %v2078_v8 = vpop.f32.mrf.mxu1 }
 0x1cd   :  { %2340 = vst [vmem:[%s4573_s3 + $0x48] sm:$0xff] %v2291_v22  ;;  %v1714_v46 = vmax.f32 %v3882_v53, %v1665_v43  ;;  %v1501_v41 = vadd.f32 %v4207_v3, %v1500_v16  ;;  %v2079_v29 = vadd.f32 %v4207_v3, %v2078_v8 }
 0x1ce   :  { %v3110_v47 = vpop.f32.mrf.mxu0  ;;  %v3220_v61 = vpop.f32.mrf.mxu1 }
 0x1cf   :  { %v2292_v50 = vmax.f32 %v1714_v46, %v2243_v45  ;;  %v1666_v0 = vmax.f32 %v1501_v41, 0.0  ;;  %v2244_v10 = vmax.f32 %v2079_v29, 0.0 }
 0x1d0   :  { %v1505_v57 = vpop.f32.mrf.mxu0  ;;  %v2083_v30 = vpop.f32.mrf.mxu1 }
 0x1d1   :  { %2341 = vst [vmem:[%s4573_s3 + $0x50] sm:$0xff] %v2292_v50  ;;  %v1715_v18 = vmax.f32 %v3888_v1, %v1666_v0  ;;  %v1506_v52 = vadd.f32 %v4207_v3, %v1505_v57  ;;  %v2084_v53 = vadd.f32 %v4207_v3, %v2083_v30 }
 0x1d2   :  { %v3113_v15 = vpop.f32.mrf.mxu0  ;;  %v3223_v17 = vpop.f32.mrf.mxu1 }
 0x1d3   :  { %v2293_v62 = vmax.f32 %v1715_v18, %v2244_v10  ;;  %v1667_v59 = vmax.f32 %v1506_v52, 0.0  ;;  %v2245_v26 = vmax.f32 %v2084_v53, 0.0 }
 0x1d4   :  { %v1508_v60 = vpop.f32.mrf.mxu0  ;;  %v2086_v21 = vpop.f32.mrf.mxu1 }
 0x1d5   :  { %2342 = vst [vmem:[%s4573_s3 + $0x58] sm:$0xff] %v2293_v62  ;;  %v1716_v39 = vmax.f32 %v3902_v14, %v1667_v59  ;;  %v1509_v1 = vadd.f32 %v4207_v3, %v1508_v60  ;;  %v2087_v31 = vadd.f32 %v4207_v3, %v2086_v21 }
 0x1d6   :  { %v3114_v37 = vpop.f32.mrf.mxu0  ;;  %v3224_v19 = vpop.f32.mrf.mxu1 }
 0x1d7   :  { %v2294_v22 = vmax.f32 %v1716_v39, %v2245_v26  ;;  %v1668_v43 = vmax.f32 %v1509_v1, 0.0  ;;  %v2246_v46 = vmax.f32 %v2087_v31, 0.0 }
 0x1d8   :  { %v1513_v45 = vpop.f32.mrf.mxu0  ;;  %v2091_v16 = vpop.f32.mrf.mxu1 }
 0x1d9   :  { %2343 = vst [vmem:[%s4573_s3 + $0x60] sm:$0xff] %v2294_v22  ;;  %v1717_v8 = vmax.f32 %v3908_v25, %v1668_v43  ;;  %v1514_v41 = vadd.f32 %v4207_v3, %v1513_v45  ;;  %v2092_v14 = vadd.f32 %v4207_v3, %v2091_v16 }
 0x1da   :  { %v3117_v29 = vpop.f32.mrf.mxu0  ;;  %v3227_v47 = vpop.f32.mrf.mxu1 }
 0x1db   :  { %v2295_v61 = vmax.f32 %v1717_v8, %v2246_v46  ;;  %v1669_v50 = vmax.f32 %v1514_v41, 0.0  ;;  %v2247_v0 = vmax.f32 %v2092_v14, 0.0 }
 0x1dc   :  { %v1516_v57 = vpop.f32.mrf.mxu0  ;;  %v2094_v30 = vpop.f32.mrf.mxu1 }
 0x1dd   :  { %2344 = vst [vmem:[%s4573_s3 + $0x68] sm:$0xff] %v2295_v61  ;;  %v1718_v18 = vmax.f32 %v3922_v38, %v1669_v50  ;;  %v1517_v25 = vadd.f32 %v4207_v3, %v1516_v57  ;;  %v2095_v10 = vadd.f32 %v4207_v3, %v2094_v30 }
 0x1de   :  { %v3118_v52 = vpop.f32.mrf.mxu0  ;;  %v3228_v53 = vpop.f32.mrf.mxu1 }
 0x1df   :  { %v2296_v15 = vmax.f32 %v1718_v18, %v2247_v0  ;;  %v1670_v17 = vmax.f32 %v1517_v25, 0.0  ;;  %v2248_v60 = vmax.f32 %v2095_v10, 0.0 }
 0x1e0   :  { %v1521_v62 = vpop.f32.mrf.mxu0  ;;  %v2099_v59 = vpop.f32.mrf.mxu1 }
 0x1e1   :  { %2345 = vst [vmem:[%s4573_s3 + $0x70] sm:$0xff] %v2296_v15  ;;  %v1719_v26 = vmax.f32 %v3928_v49, %v1670_v17  ;;  %v1522_v21 = vadd.f32 %v4207_v3, %v1521_v62  ;;  %v2100_v38 = vadd.f32 %v4207_v3, %v2099_v59 }
 0x1e2   :  { %v3121_v39 = vpop.f32.mrf.mxu0  ;;  %v3231_v1 = vpop.f32.mrf.mxu1 }
 0x1e3   :  { %v2297_v31 = vmax.f32 %v1719_v26, %v2248_v60  ;;  %v1671_v37 = vmax.f32 %v1522_v21, 0.0  ;;  %v2249_v19 = vmax.f32 %v2100_v38, 0.0 }
 0x1e4   :  { %v1524_v22 = vpop.f32.mrf.mxu0  ;;  %v2102_v43 = vpop.f32.mrf.mxu1 }
 0x1e5   :  { %2346 = vst [vmem:[%s4573_s3 + $0x78] sm:$0xff] %v2297_v31  ;;  %v1720_v45 = vmax.f32 %v3942_v2, %v1671_v37  ;;  %v1525_v49 = vadd.f32 %v4207_v3, %v1524_v22  ;;  %v2103_v16 = vadd.f32 %v4207_v3, %v2102_v43 }
 0x1e6   :  { %v3122_v8 = vpop.f32.mrf.mxu0  ;;  %v3232_v46 = vpop.f32.mrf.mxu1 }
 0x1e7   :  { %v2298_v41 = vmax.f32 %v1720_v45, %v2249_v19  ;;  %v1672_v14 = vmax.f32 %v1525_v49, 0.0  ;;  %v2250_v50 = vmax.f32 %v2103_v16, 0.0 }
 0x1e8   :  { %v1529_v29 = vpop.f32.mrf.mxu0  ;;  %v2107_v47 = vpop.f32.mrf.mxu1 }
 0x1e9   :  { %2347 = vst [vmem:[%s4573_s3 + $0x80] sm:$0xff] %v2298_v41  ;;  %v1721_v61 = vmax.f32 %v3948_v13, %v1672_v14  ;;  %v1530_v0 = vadd.f32 %v4207_v3, %v1529_v29  ;;  %v2108_v2 = vadd.f32 %v4207_v3, %v2107_v47 }
 0x1ea   :  { %v3125_v57 = vpop.f32.mrf.mxu0  ;;  %v3235_v30 = vpop.f32.mrf.mxu1 }
 0x1eb   :  { %v2299_v18 = vmax.f32 %v1721_v61, %v2250_v50  ;;  %v1673_v25 = vmax.f32 %v1530_v0, 0.0  ;;  %v2251_v10 = vmax.f32 %v2108_v2, 0.0 }
 0x1ec   :  { %v1532_v52 = vpop.f32.mrf.mxu0  ;;  %v2110_v53 = vpop.f32.mrf.mxu1 }
 0x1ed   :  { %2348 = vst [vmem:[%s4573_s3 + $0x88] sm:$0xff] %v2299_v18  ;;  %v1722_v15 = vmax.f32 %v3962_v28, %v1673_v25  ;;  %v1533_v13 = vadd.f32 %v4207_v3, %v1532_v52  ;;  %v2111_v17 = vadd.f32 %v4207_v3, %v2110_v53 }
 0x1ee   :  { %v3126_v62 = vpop.f32.mrf.mxu0  ;;  %v3236_v59 = vpop.f32.mrf.mxu1 }
 0x1ef   :  { %v2300_v26 = vmax.f32 %v1722_v15, %v2251_v10  ;;  %v1674_v60 = vmax.f32 %v1533_v13, 0.0  ;;  %v2252_v1 = vmax.f32 %v2111_v17, 0.0 }
 0x1f0   :  { %v1537_v21 = vpop.f32.mrf.mxu0  ;;  %v2115_v38 = vpop.f32.mrf.mxu1 }
 0x1f1   :  { %2349 = vst [vmem:[%s4573_s3 + $0x90] sm:$0xff] %v2300_v26  ;;  %v1723_v39 = vmax.f32 %v3968_v42, %v1674_v60  ;;  %v1538_v31 = vadd.f32 %v4207_v3, %v1537_v21  ;;  %v2116_v28 = vadd.f32 %v4207_v3, %v2115_v38 }
 0x1f2   :  { %v3129_v37 = vpop.f32.mrf.mxu0  ;;  %v3239_v19 = vpop.f32.mrf.mxu1 }
 0x1f3   :  { %v2301_v22 = vmax.f32 %v1723_v39, %v2252_v1  ;;  %v1675_v43 = vmax.f32 %v1538_v31, 0.0  ;;  %v2253_v45 = vmax.f32 %v2116_v28, 0.0 }
 0x1f4   :  { %v1540_v49 = vpop.f32.mrf.mxu0  ;;  %v2118_v16 = vpop.f32.mrf.mxu1 }
 0x1f5   :  { %2350 = vst [vmem:[%s4573_s3 + $0x98] sm:$0xff] %v2301_v22  ;;  %v1724_v8 = vmax.f32 %v3982_v56, %v1675_v43  ;;  %v1541_v42 = vadd.f32 %v4207_v3, %v1540_v49  ;;  %v2119_v46 = vadd.f32 %v4207_v3, %v2118_v16 }
 0x1f6   :  { %v3130_v41 = vpop.f32.mrf.mxu0  ;;  %v3240_v14 = vpop.f32.mrf.mxu1 }
 0x1f7   :  { %v2302_v29 = vmax.f32 %v1724_v8, %v2253_v45  ;;  %v1676_v47 = vmax.f32 %v1541_v42, 0.0  ;;  %v2254_v2 = vmax.f32 %v2119_v46, 0.0 }
 0x1f8   :  { %v1545_v61 = vpop.f32.mrf.mxu0  ;;  %v2123_v50 = vpop.f32.mrf.mxu1 }
 0x1f9   :  { %2351 = vst [vmem:[%s4573_s3 + $0xa0] sm:$0xff] %v2302_v29  ;;  %v1725_v0 = vmax.f32 %v3988_v6, %v1676_v47  ;;  %v1546_v57 = vadd.f32 %v4207_v3, %v1545_v61  ;;  %v2124_v56 = vadd.f32 %v4207_v3, %v2123_v50 }
 0x1fa   :  { %v3133_v30 = vpop.f32.mrf.mxu0  ;;  %v3243_v18 = vpop.f32.mrf.mxu1 }
 0x1fb   :  { %v2303_v25 = vmax.f32 %v1725_v0, %v2254_v2  ;;  %v1677_v10 = vmax.f32 %v1546_v57, 0.0  ;;  %v2255_v52 = vmax.f32 %v2124_v56, 0.0 }
 0x1fc   :  { %v1548_v53 = vpop.f32.mrf.mxu0  ;;  %v2126_v15 = vpop.f32.mrf.mxu1 }
 0x1fd   :  { %2352 = vst [vmem:[%s4573_s3 + $0xa8] sm:$0xff] %v2303_v25  ;;  %v1726_v13 = vmax.f32 %v4002_v23, %v1677_v10  ;;  %v1549_v6 = vadd.f32 %v4207_v3, %v1548_v53  ;;  %v2127_v17 = vadd.f32 %v4207_v3, %v2126_v15 }
 0x1fe   :  { %v3134_v62 = vpop.f32.mrf.mxu0  ;;  %v3244_v59 = vpop.f32.mrf.mxu1 }
 0x1ff   :  { %v2304_v26 = vmax.f32 %v1726_v13, %v2255_v52  ;;  %v1678_v60 = vmax.f32 %v1549_v6, 0.0  ;;  %v2256_v1 = vmax.f32 %v2127_v17, 0.0 }
 0x200   :  { %v1553_v21 = vpop.f32.mrf.mxu0  ;;  %v2131_v38 = vpop.f32.mrf.mxu1 }
 0x201   :  { %2353 = vst [vmem:[%s4573_s3 + $0xb0] sm:$0xff] %v2304_v26  ;;  %v1727_v39 = vmax.f32 %v4008_v36, %v1678_v60  ;;  %v1554_v31 = vadd.f32 %v4207_v3, %v1553_v21  ;;  %v2132_v23 = vadd.f32 %v4207_v3, %v2131_v38 }
 0x202   :  { %v3137_v28 = vpop.f32.mrf.mxu0  ;;  %v3247_v37 = vpop.f32.mrf.mxu1 }
 0x203   :  { %v2305_v19 = vmax.f32 %v1727_v39, %v2256_v1  ;;  %v1679_v22 = vmax.f32 %v1554_v31, 0.0  ;;  %v2257_v43 = vmax.f32 %v2132_v23, 0.0 }
 0x204   :  { %v1556_v45 = vpop.f32.mrf.mxu0  ;;  %v2134_v49 = vpop.f32.mrf.mxu1 }
 0x205   :  { %2354 = vst [vmem:[%s4573_s3 + $0xb8] sm:$0xff] %v2305_v19  ;;  %v1728_v16 = vmax.f32 %v4022_v54, %v1679_v22  ;;  %v1557_v36 = vadd.f32 %v4207_v3, %v1556_v45  ;;  %v2135_v8 = vadd.f32 %v4207_v3, %v2134_v49 }
 0x206   :  { %v3138_v42 = vpop.f32.mrf.mxu0  ;;  %v3248_v46 = vpop.f32.mrf.mxu1 }
 0x207   :  { %v2306_v41 = vmax.f32 %v1728_v16, %v2257_v43  ;;  %v1680_v14 = vmax.f32 %v1557_v36, 0.0  ;;  %v2258_v50 = vmax.f32 %v2135_v8, 0.0 }
 0x208   :  { %v1561_v29 = vpop.f32.mrf.mxu0  ;;  %v2139_v47 = vpop.f32.mrf.mxu1 }
 0x209   :  { %2355 = vst [vmem:[%s4573_s3 + $0xc0] sm:$0xff] %v2306_v41  ;;  %v1729_v61 = vmax.f32 %v4028_v5, %v1680_v14  ;;  %v1562_v0 = vadd.f32 %v4207_v3, %v1561_v29  ;;  %v2140_v54 = vadd.f32 %v4207_v3, %v2139_v47 }
 0x20a   :  { %v3141_v2 = vpop.f32.mrf.mxu0  ;;  %v3251_v57 = vpop.f32.mrf.mxu1 }
 0x20b   :  { %v2307_v56 = vmax.f32 %v1729_v61, %v2258_v50  ;;  %v1681_v30 = vmax.f32 %v1562_v0, 0.0  ;;  %v2259_v18 = vmax.f32 %v2140_v54, 0.0 }
 0x20c   :  { %v1564_v25 = vpop.f32.mrf.mxu0  ;;  %v2142_v10 = vpop.f32.mrf.mxu1 }
 0x20d   :  { %2356 = vst [vmem:[%s4573_s3 + $0xc8] sm:$0xff] %v2307_v56  ;;  %v1730_v52 = vmax.f32 %v4042_v24, %v1681_v30  ;;  %v1565_v5 = vadd.f32 %v4207_v3, %v1564_v25  ;;  %v2143_v53 = vadd.f32 %v4207_v3, %v2142_v10 }
 0x20e   :  { %v3142_v15 = vpop.f32.mrf.mxu0  ;;  %v3252_v13 = vpop.f32.mrf.mxu1 }
 0x20f   :  { %v2308_v6 = vmax.f32 %v1730_v52, %v2259_v18  ;;  %v1682_v17 = vmax.f32 %v1565_v5, 0.0  ;;  %v2260_v60 = vmax.f32 %v2143_v53, 0.0 }
 0x210   :  { %v1569_v62 = vpop.f32.mrf.mxu0  ;;  %v2147_v59 = vpop.f32.mrf.mxu1 }
 0x211   :  { %2357 = vst [vmem:[%s4573_s3 + $0xd0] sm:$0xff] %v2308_v6  ;;  %v1731_v26 = vmax.f32 %v4048_v40, %v1682_v17  ;;  %v1570_v21 = vadd.f32 %v4207_v3, %v1569_v62  ;;  %v2148_v24 = vadd.f32 %v4207_v3, %v2147_v59 }
 0x212   :  { %v3145_v38 = vpop.f32.mrf.mxu0  ;;  %v3255_v39 = vpop.f32.mrf.mxu1 }
 0x213   :  { %v2309_v1 = vmax.f32 %v1731_v26, %v2260_v60  ;;  %v1683_v31 = vmax.f32 %v1570_v21, 0.0  ;;  %v2261_v23 = vmax.f32 %v2148_v24, 0.0 }
 0x214   :  { %v1572_v28 = vpop.f32.mrf.mxu0  ;;  %v2150_v37 = vpop.f32.mrf.mxu1 }
 0x215   :  { %2358 = vst [vmem:[%s4573_s3 + $0xd8] sm:$0xff] %v2309_v1  ;;  %v1732_v19 = vmax.f32 %v4062_v58, %v1683_v31  ;;  %v1573_v40 = vadd.f32 %v4207_v3, %v1572_v28  ;;  %v2151_v22 = vadd.f32 %v4207_v3, %v2150_v37 }
 0x216   :  { %v3146_v43 = vpop.f32.mrf.mxu0  ;;  %v3256_v45 = vpop.f32.mrf.mxu1 }
 0x217   :  { %v2310_v49 = vmax.f32 %v1732_v19, %v2261_v23  ;;  %v1684_v16 = vmax.f32 %v1573_v40, 0.0  ;;  %v2262_v46 = vmax.f32 %v2151_v22, 0.0 }
 0x218   :  { %v1577_v36 = vpop.f32.mrf.mxu0  ;;  %v2155_v8 = vpop.f32.mrf.mxu1 }
 0x219   :  { %2359 = vst [vmem:[%s4573_s3 + $0xe0] sm:$0xff] %v2310_v49  ;;  %v1733_v42 = vmax.f32 %v4068_v12, %v1684_v16  ;;  %v1578_v41 = vadd.f32 %v4207_v3, %v1577_v36  ;;  %v2156_v58 = vadd.f32 %v4207_v3, %v2155_v8 }
 0x21a   :  { %v3149_v14 = vpop.f32.mrf.mxu0  ;;  %v3259_v29 = vpop.f32.mrf.mxu1 }
 0x21b   :  { %v2311_v47 = vmax.f32 %v1733_v42, %v2262_v46  ;;  %v1685_v61 = vmax.f32 %v1578_v41, 0.0  ;;  %v2263_v50 = vmax.f32 %v2156_v58, 0.0 }
 0x21c   :  { %v1580_v0 = vpop.f32.mrf.mxu0  ;;  %v2158_v54 = vpop.f32.mrf.mxu1 }
 0x21d   :  { %2360 = vst [vmem:[%s4573_s3 + $0xe8] sm:$0xff] %v2311_v47  ;;  %v1734_v2 = vmax.f32 %v4082_v33, %v1685_v61  ;;  %v1581_v12 = vadd.f32 %v4207_v3, %v1580_v0  ;;  %v2159_v57 = vadd.f32 %v4207_v3, %v2158_v54 }
 0x21e   :  { %v3150_v56 = vpop.f32.mrf.mxu0  ;;  %v3260_v30 = vpop.f32.mrf.mxu1 }
 0x21f   :  { %v2312_v18 = vmax.f32 %v1734_v2, %v2263_v50  ;;  %v1686_v25 = vmax.f32 %v1581_v12, 0.0  ;;  %v2264_v53 = vmax.f32 %v2159_v57, 0.0 }
 0x220   :  { %v1585_v10 = vpop.f32.mrf.mxu0  ;;  %v2163_v52 = vpop.f32.mrf.mxu1 }
 0x221   :  { %2361 = vst [vmem:[%s4573_s3 + $0xf0] sm:$0xff] %v2312_v18  ;;  %v1735_v5 = vmax.f32 %v4088_v48, %v1686_v25  ;;  %v1586_v15 = vadd.f32 %v4207_v3, %v1585_v10  ;;  %v2164_v33 = vadd.f32 %v4207_v3, %v2163_v52 }
 0x222   :  { %v3153_v13 = vpop.f32.mrf.mxu0  ;;  %v3263_v6 = vpop.f32.mrf.mxu1 }
 0x223   :  { %v2313_v17 = vmax.f32 %v1735_v5, %v2264_v53  ;;  %v1687_v62 = vmax.f32 %v1586_v15, 0.0  ;;  %v2265_v59 = vmax.f32 %v2164_v33, 0.0 }
 0x224   :  { %v1588_v26 = vpop.f32.mrf.mxu0  ;;  %v2166_v60 = vpop.f32.mrf.mxu1 }
 0x225   :  { %2362 = vst [vmem:[%s4573_s3 + $0xf8] sm:$0xff] %v2313_v17  ;;  %v1736_v21 = vmax.f32 %v4102_v9, %v1687_v62  ;;  %v1589_v48 = vadd.f32 %v4207_v3, %v1588_v26  ;;  %v2167_v24 = vadd.f32 %v4207_v3, %v2166_v60 }
 0x226   :  { %v3154_v38 = vpop.f32.mrf.mxu0  ;;  %v3264_v39 = vpop.f32.mrf.mxu1 }
 0x227   :  { %v2314_v1 = vmax.f32 %v1736_v21, %v2265_v59  ;;  %v1688_v31 = vmax.f32 %v1589_v48, 0.0  ;;  %v2266_v19 = vmax.f32 %v2167_v24, 0.0 }
 0x228   :  { %v1593_v23 = vpop.f32.mrf.mxu0  ;;  %v2171_v28 = vpop.f32.mrf.mxu1 }
 0x229   :  { %2363 = vst [vmem:[%s4573_s3 + $0x100] sm:$0xff] %v2314_v1  ;;  %v1737_v37 = vmax.f32 %v4108_v27, %v1688_v31  ;;  %v1594_v40 = vadd.f32 %v4207_v3, %v1593_v23  ;;  %v2172_v9 = vadd.f32 %v4207_v3, %v2171_v28 }
 0x22a   :  { %v3157_v22 = vpop.f32.mrf.mxu0  ;;  %v3267_v43 = vpop.f32.mrf.mxu1 }
 0x22b   :  { %v2315_v45 = vmax.f32 %v1737_v37, %v2266_v19  ;;  %v1689_v49 = vmax.f32 %v1594_v40, 0.0  ;;  %v2267_v16 = vmax.f32 %v2172_v9, 0.0 }
 0x22c   :  { %v1596_v36 = vpop.f32.mrf.mxu0  ;;  %v2174_v8 = vpop.f32.mrf.mxu1 }
 0x22d   :  { %2364 = vst [vmem:[%s4573_s3 + $0x108] sm:$0xff] %v2315_v45  ;;  %v1738_v42 = vmax.f32 %v4122_v51, %v1689_v49  ;;  %v1597_v27 = vadd.f32 %v4207_v3, %v1596_v36  ;;  %v2175_v46 = vadd.f32 %v4207_v3, %v2174_v8 }
 0x22e   :  { %v3158_v41 = vpop.f32.mrf.mxu0  ;;  %v3268_v58 = vpop.f32.mrf.mxu1 }
 0x22f   :  { %v2316_v14 = vmax.f32 %v1738_v42, %v2267_v16  ;;  %v1690_v29 = vmax.f32 %v1597_v27, 0.0  ;;  %v2268_v0 = vmax.f32 %v2175_v46, 0.0 }
 0x230   :  { %v1601_v47 = vpop.f32.mrf.mxu0  ;;  %v2179_v61 = vpop.f32.mrf.mxu1 }
 0x231   :  { %2365 = vst [vmem:[%s4573_s3 + $0x110] sm:$0xff] %v2316_v14  ;;  %v1739_v50 = vmax.f32 %v4128_v7, %v1690_v29  ;;  %v1602_v54 = vadd.f32 %v4207_v3, %v1601_v47  ;;  %v2180_v51 = vadd.f32 %v4207_v3, %v2179_v61 }
 0x232   :  { %v3161_v2 = vpop.f32.mrf.mxu0  ;;  %v3271_v12 = vpop.f32.mrf.mxu1 }
 0x233   :  { %v2317_v57 = vmax.f32 %v1739_v50, %v2268_v0  ;;  %v1691_v56 = vmax.f32 %v1602_v54, 0.0  ;;  %v2269_v30 = vmax.f32 %v2180_v51, 0.0 }
 0x234   :  { %v1604_v18 = vpop.f32.mrf.mxu0  ;;  %v2182_v25 = vpop.f32.mrf.mxu1 }
 0x235   :  { %2366 = vst [vmem:[%s4573_s3 + $0x118] sm:$0xff] %v2317_v57  ;;  %v1740_v10 = vmax.f32 %v4142_v34, %v1691_v56  ;;  %v1605_v7 = vadd.f32 %v4207_v3, %v1604_v18  ;;  %v2183_v52 = vadd.f32 %v4207_v3, %v2182_v25 }
 0x236   :  { %v3162_v5 = vpop.f32.mrf.mxu0  ;;  %v3272_v53 = vpop.f32.mrf.mxu1 }
 0x237   :  { %v2318_v15 = vmax.f32 %v1740_v10, %v2269_v30  ;;  %v1692_v33 = vmax.f32 %v1605_v7, 0.0  ;;  %v2270_v62 = vmax.f32 %v2183_v52, 0.0 }
 0x238   :  { %v1609_v13 = vpop.f32.mrf.mxu0  ;;  %v2187_v6 = vpop.f32.mrf.mxu1 }
 0x239   :  { %2367 = vst [vmem:[%s4573_s3 + $0x120] sm:$0xff] %v2318_v15  ;;  %v1741_v17 = vmax.f32 %v4148_v55, %v1692_v33  ;;  %v1610_v59 = vadd.f32 %v4207_v3, %v1609_v13  ;;  %v2188_v34 = vadd.f32 %v4207_v3, %v2187_v6 }
 0x23a   :  { %v3165_v26 = vpop.f32.mrf.mxu0  ;;  %v3275_v60 = vpop.f32.mrf.mxu1 }
 0x23b   :  { %v2319_v21 = vmax.f32 %v1741_v17, %v2270_v62  ;;  %v1693_v48 = vmax.f32 %v1610_v59, 0.0  ;;  %v2271_v24 = vmax.f32 %v2188_v34, 0.0 }
 0x23c   :  { %v1612_v38 = vpop.f32.mrf.mxu0  ;;  %v2190_v39 = vpop.f32.mrf.mxu1 }
 0x23d   :  { %2368 = vst [vmem:[%s4573_s3 + $0x128] sm:$0xff] %v2319_v21  ;;  %v1742_v1 = vmax.f32 %v4162_v20, %v1693_v48  ;;  %v1613_v55 = vadd.f32 %v4207_v3, %v1612_v38  ;;  %v2191_v31 = vadd.f32 %v4207_v3, %v2190_v39  ;;  %v4511_v20 = vld [vmem:[%s4572_s2] ss:$0 sm:$0xff] }
 0x23e   :  { %v3166_v23 = vpop.f32.mrf.mxu0  ;;  %v3276_v28 = vpop.f32.mrf.mxu1 }
 0x23f   :  { %v2320_v37 = vmax.f32 %v1742_v1, %v2271_v24  ;;  %v1694_v19 = vmax.f32 %v1613_v55, 0.0  ;;  %v2272_v43 = vmax.f32 %v2191_v31, 0.0 }
 0x240   :  { %v1617_v40 = vpop.f32.mrf.mxu0  ;;  %v2195_v9 = vpop.f32.mrf.mxu1 }
 0x241   :  { %2369 = vst [vmem:[%s4573_s3 + $0x130] sm:$0xff] %v2320_v37  ;;  %v1743_v22 = vmax.f32 %v4168_v44, %v1694_v19  ;;  %v1618_v3 = vadd.f32 %v4511_v20, %v1617_v40  ;;  %v2196_v45 = vadd.f32 %v4511_v20, %v2195_v9  ;;  %v4581_v40 = vld [vmem:[#allocation2_spill] sm:$0xff] }
 0x242   :  { %v3169_v49 = vpop.f32.mrf.mxu0  ;;  %v3279_v16 = vpop.f32.mrf.mxu1 }
 0x243   :  { %v2321_v36 = vmax.f32 %v1743_v22, %v2272_v43  ;;  %v1695_v8 = vmax.f32 %v1618_v3, 0.0  ;;  %v2273_v42 = vmax.f32 %v2196_v45, 0.0 }
 0x244   :  { %v1620_v27 = vpop.f32.mrf.mxu0  ;;  %v2198_v46 = vpop.f32.mrf.mxu1 }
 0x245   :  { %2370 = vst [vmem:[%s4573_s3 + $0x138] sm:$0xff] %v2321_v36  ;;  %v1744_v44 = vmax.f32 %v4182_v11, %v1695_v8  ;;  %v1621_v41 = vadd.f32 %v4511_v20, %v1620_v27  ;;  %v2199_v58 = vadd.f32 %v4511_v20, %v2198_v46  ;;  %v4582_v27 = vld [vmem:[#allocation3_spill] sm:$0xff] }
 0x246   :  { %v3170_v14 = vpop.f32.mrf.mxu0  ;;  %v3280_v29 = vpop.f32.mrf.mxu1 }
 0x247   :  { %v2322_v47 = vmax.f32 %v1744_v44, %v2273_v42  ;;  %v1696_v61 = vmax.f32 %v1621_v41, 0.0  ;;  %v2274_v51 = vmax.f32 %v2199_v58, 0.0 }
 0x248   :  { %v1625_v50 = vpop.f32.mrf.mxu0  ;;  %v2203_v0 = vpop.f32.mrf.mxu1 }
 0x249   :  { %2371 = vst [vmem:[%s4573_s3 + $0x140] sm:$0xff] %v2322_v47  ;;  %v1745_v54 = vmax.f32 %v4188_v35, %v1696_v61  ;;  %v1626_v2 = vadd.f32 %v4511_v20, %v1625_v50  ;;  %v2204_v11 = vadd.f32 %v4511_v20, %v2203_v0  ;;  %v4583_v0 = vld [vmem:[#allocation4_spill] sm:$0xff] }
 0x24a   :  { %v3173_v12 = vpop.f32.mrf.mxu0  ;;  %v3283_v57 = vpop.f32.mrf.mxu1 }
 0x24b   :  { %v2323_v56 = vmax.f32 %v1745_v54, %v2274_v51  ;;  %v1697_v30 = vmax.f32 %v1626_v2, 0.0  ;;  %v2275_v18 = vmax.f32 %v2204_v11, 0.0 }
 0x24c   :  { %v1628_v25 = vpop.f32.mrf.mxu0  ;;  %v2206_v10 = vpop.f32.mrf.mxu1 }
 0x24d   :  { %2372 = vst [vmem:[%s4573_s3 + $0x148] sm:$0xff] %v2323_v56  ;;  %v1746_v7 = vmax.f32 %v4202_v63, %v1697_v30  ;;  %v1629_v35 = vadd.f32 %v4511_v20, %v1628_v25  ;;  %v2207_v52 = vadd.f32 %v4511_v20, %v2206_v10 }
 0x24e   :  { %v3174_v5 = vpop.f32.mrf.mxu0  ;;  %v3284_v53 = vpop.f32.mrf.mxu1 }
 0x24f   :  { %v2324_v15 = vmax.f32 %v1746_v7, %v2275_v18  ;;  %v1698_v33 = vmax.f32 %v1629_v35, 0.0  ;;  %v2276_v62 = vmax.f32 %v2207_v52, 0.0  ;;  %v4584_v7 = vld [vmem:[#allocation5_spill] sm:$0xff] }
 0x250   :  { %v1633_v13 = vpop.f32.mrf.mxu0  ;;  %v2211_v6 = vpop.f32.mrf.mxu1 }
 0x251   :  { %2373 = vst [vmem:[%s4573_s3 + $0x150] sm:$0xff] %v2324_v15  ;;  %v1747_v17 = vmax.f32 %v4213_v32, %v1698_v33  ;;  %v1634_v59 = vadd.f32 %v4511_v20, %v1633_v13  ;;  %v2212_v63 = vadd.f32 %v4511_v20, %v2211_v6 }
 0x252   :  { %v3177_v34 = vpop.f32.mrf.mxu0  ;;  %v3287_v26 = vpop.f32.mrf.mxu1 }
 0x253   :  { %v2325_v60 = vmax.f32 %v1747_v17, %v2276_v62  ;;  %v1699_v21 = vmax.f32 %v1634_v59, 0.0  ;;  %v2277_v48 = vmax.f32 %v2212_v63, 0.0 }
 0x254   :  { %v1636_v24 = vpop.f32.mrf.mxu0  ;;  %v2214_v38 = vpop.f32.mrf.mxu1 }
 0x255   :  { %2374 = vst [vmem:[%s4573_s3 + $0x158] sm:$0xff] %v2325_v60  ;;  %v1748_v39 = vmax.f32 %v4227_v4, %v1699_v21  ;;  %v1637_v32 = vadd.f32 %v4511_v20, %v1636_v24  ;;  %v2215_v1 = vadd.f32 %v4511_v20, %v2214_v38 }
 0x256   :  { %v3178_v55 = vpop.f32.mrf.mxu0  ;;  %v3288_v31 = vpop.f32.mrf.mxu1 }
 0x257   :  { %v2326_v23 = vmax.f32 %v1748_v39, %v2277_v48  ;;  %v1700_v28 = vmax.f32 %v1637_v32, 0.0  ;;  %v2278_v22 = vmax.f32 %v2215_v1, 0.0 }
 0x258   :  { %v1641_v37 = vpop.f32.mrf.mxu0  ;;  %v2219_v19 = vpop.f32.mrf.mxu1 }
 0x259   :  { %2375 = vst [vmem:[%s4573_s3 + $0x160] sm:$0xff] %v2326_v23  ;;  %v1749_v9 = vmax.f32 %v4581_v40, %v1700_v28  ;;  %v1642_v43 = vadd.f32 %v4511_v20, %v1641_v37  ;;  %v2220_v4 = vadd.f32 %v4511_v20, %v2219_v19 }
 0x25a   :  { %v3181_v3 = vpop.f32.mrf.mxu0  ;;  %v3291_v45 = vpop.f32.mrf.mxu1 }
 0x25b   :  { %v2327_v49 = vmax.f32 %v1749_v9, %v2278_v22  ;;  %v1701_v16 = vmax.f32 %v1642_v43, 0.0  ;;  %v2279_v36 = vmax.f32 %v2220_v4, 0.0 }
 0x25c   :  { %v1644_v8 = vpop.f32.mrf.mxu0  ;;  %v2222_v42 = vpop.f32.mrf.mxu1 }
 0x25d   :  { %2376 = vst [vmem:[%s4573_s3 + $0x168] sm:$0xff] %v2327_v49  ;;  %v1750_v46 = vmax.f32 %v4582_v27, %v1701_v16  ;;  %v1645_v44 = vadd.f32 %v4511_v20, %v1644_v8  ;;  %v2223_v41 = vadd.f32 %v4511_v20, %v2222_v42 }
 0x25e   :  { %v3182_v58 = vpop.f32.mrf.mxu0  ;;  %v3292_v14 = vpop.f32.mrf.mxu1 }
 0x25f   :  { %v2328_v29 = vmax.f32 %v1750_v46, %v2279_v36  ;;  %v1702_v47 = vmax.f32 %v1645_v44, 0.0  ;;  %v2280_v51 = vmax.f32 %v2223_v41, 0.0 }
 0x260   :  { %v1649_v61 = vpop.f32.mrf.mxu0  ;;  %v2227_v50 = vpop.f32.mrf.mxu1 }
 0x261   :  { %2377 = vst [vmem:[%s4573_s3 + $0x170] sm:$0xff] %v2328_v29  ;;  %v1751_v54 = vmax.f32 %v4583_v0, %v1702_v47  ;;  %v1650_v2 = vadd.f32 %v4511_v20, %v1649_v61  ;;  %v2228_v11 = vadd.f32 %v4511_v20, %v2227_v50 }
 0x262   :  { %v3185_v12 = vpop.f32.mrf.mxu0  ;;  %v3295_v57 = vpop.f32.mrf.mxu1 }
 0x263   :  { %v2329_v56 = vmax.f32 %v1751_v54, %v2280_v51  ;;  %v1703_v30 = vmax.f32 %v1650_v2, 0.0  ;;  %v2281_v18 = vmax.f32 %v2228_v11, 0.0 }
 0x264   :  { %v1652_v25 = vpop.f32.mrf.mxu0  ;;  %v2230_v10 = vpop.f32.mrf.mxu1 }
 0x265   :  { %2378 = vst [vmem:[%s4573_s3 + $0x178] sm:$0xff] %v2329_v56  ;;  %v1752_v35 = vmax.f32 %v4584_v7, %v1703_v30 }
 0x266   :  { %v3186_v52 = vpop.f32.mrf.mxu0  ;;  %v3296_v5 = vpop.f32.mrf.mxu1 }
 0x267   :  { %v2330_v53 = vmax.f32 %v1752_v35, %v2281_v18 }
 0x269   :  { %2379 = vst [vmem:[%s4573_s3 + $0x180] sm:$0xff] %v2330_v53 }

// kernel: lenet5_forward.4
= control target key start
LH: loop header
LB: loop body
LE: loop exit
PB: predicated region body
PF: predicated region fallthrough
CT: control target
= control target key end

     0   :  { %v765_v0 = vmov 0   ;;  %vm138_vm0 = vcmask 179200   ;;  %vm151_vm1 = vcmask 1042432   ;;  %s1082_s1 = inlined_call_operand.vmem [shape: bf16[150,128], index: 1, kind: input, shape index: {}]   ;;  %s1083_s0 = inlined_call_operand.vmem [shape: bf16[4,50,150], index: 0, kind: input, shape index: {}]   ;;  %s1084_s2 = inlined_call_operand.vmem [shape: f32[1,128], index: 2, kind: input, shape index: {}]   ;;  %s1085_s3 = inlined_call_operand.vmem [shape: f32[50,128], index: 3, kind: output, shape index: {}]  }
   0x1   :  { %155 = vmatprep.subr.bf16.mxu0 %v765_v0  ;;  %279 = vmatprep.subr.bf16.mxu1 %v765_v0  ;;  %v791_v1 = vld [vmem:[%s1082_s1 + $0x38] sm:$0xff]   ;;  %v798_v2 = vld [vmem:[%s1082_s1 + $0x30] sm:$0xff]   ;;  %v807_v3 = vld [vmem:[%s1082_s1 + $0x28] sm:$0xff]  }
   0x2   :  { %156 = vmatpush1.bf16.msra.mxu0 %v791_v1  ;;  %280 = vmatpush1.bf16.msra.mxu1 %v791_v1  ;;  %v816_v4 = vld [vmem:[%s1082_s1 + $0x20] sm:$0xff]   ;;  %v832_v7 = vld [vmem:[%s1082_s1 + $0x18] sm:$0xff]   ;;  %v842_v8 = vld [vmem:[%s1082_s1 + $0x10] sm:$0xff]  }
   0x3   :  { %157 = vmatprep.subr.bf16.mxu0 %v765_v0  ;;  %281 = vmatprep.subr.bf16.mxu1 %v765_v0  ;;  %v723_v5 = vld [vmem:[%s1083_s0 + $0x4] ss:$8 sps:$4 sm:$0xff]   ;;  %v719_v11 = vld [vmem:[%s1082_s1 + $0x48] ss:$0 sps:$4 sm:$0x77]  }
   0x4   :  { %649 = vmatprep.mubr.msk.bf16.mxu0 %vm138_vm0, %v723_v5  ;;  %v726_v6 = vld [vmem:[%s1083_s0 + $0x3c] ss:$8 sps:$4 sm:$0xff]   ;;  %v851_v9 = vld [vmem:[%s1082_s1 + $0x8] sm:$0xff]   ;;  %v871_v12 = vsel %vm151_vm1, %v719_v11, 0  ;;  %v724_v15 = vld [vmem:[%s1083_s0 + $0x38] ss:$8 sps:$4 sm:$0xff]  }
   0x5   :  { %668 = vmatprep.mubr.msk.bf16.mxu1 %vm138_vm0, %v726_v6  ;;  %v860_v10 = vld [vmem:[%s1082_s1] sm:$0xff]   ;;  %v727_v16 = vld [vmem:[%s1083_s0 + $0x14] ss:$8 sps:$4 sm:$0xff]   ;;  %v729_v18 = vld [vmem:[%s1083_s0 + $0x10] ss:$8 sps:$4 sm:$0xff]  }
   0x6   :  { %158 = vmatpush1.bf16.msra.mxu0 %v798_v2  ;;  %282 = vmatpush1.bf16.msra.mxu1 %v798_v2  ;;  %v878_v13 = vld [vmem:[%s1082_s1 + $0x40] sm:$0xff]   ;;  %v730_v17 = vld [vmem:[%s1083_s0 + $0x4c] ss:$8 sps:$4 sm:$0xff]   ;;  %v732_v19 = vld [vmem:[%s1083_s0 + $0x48] ss:$8 sps:$4 sm:$0xff]  }
   0x7   :  { %159 = vmatprep.subr.bf16.mxu0 %v765_v0  ;;  %283 = vmatprep.subr.bf16.mxu1 %v765_v0  ;;  %v721_v14 = vld [vmem:[%s1083_s0] ss:$8 sps:$4 sm:$0xff]   ;;  %v733_v20 = vld [vmem:[%s1083_s0 + $0x24] ss:$8 sps:$4 sm:$0xff]   ;;  %v41_v24 = vld [vmem:[%s1083_s0 + $0x30] sm:$0x11] }
   0x8   :  { %v736_v21 = vld [vmem:[%s1083_s0 + $0x5c] ss:$8 sps:$4 sm:$0xff]   ;;  %v735_v22 = vld [vmem:[%s1083_s0 + $0x20] ss:$8 sps:$4 sm:$0xff]   ;;  %v638_v26 = vcombine.high %v41_v24, %v41_v24  ;;  %v637_v28 = vcombine.low %v41_v24, %v41_v24  ;;  %v748_v31 = vld [vmem:[%s1083_s0 + $0xac] ss:$8 sps:$4 sm:$0xff]  }
   0x9   :  { %v738_v23 = vld [vmem:[%s1083_s0 + $0x58] ss:$8 sps:$4 sm:$0xff]   ;;  %v659_v25 = vld [vmem:[%s1083_s0 + $0x68] sm:$0x11]  ;;  %v745_v30 = vld [vmem:[%s1083_s0 + $0x74] ss:$8 sps:$4 sm:$0xff]  }
   0xa   :  { %160 = vmatpush1.bf16.msra.mxu0 %v807_v3  ;;  %284 = vmatpush1.bf16.msra.mxu1 %v807_v3  ;;  %v667_v27 = vcombine.high %v659_v25, %v659_v25  ;;  %v666_v29 = vcombine.low %v659_v25, %v659_v25  ;;  %v743_v32 = vld [vmem:[%s1083_s0 + $0x70] ss:$8 sps:$4 sm:$0xff]   ;;  %v749_v34 = vld [vmem:[%s1083_s0 + $0x84] ss:$8 sps:$4 sm:$0xff]   ;;  %v753_v36 = vld [vmem:[%s1083_s0 + $0x80] ss:$8 sps:$4 sm:$0xff]  }
   0xb   :  { %161 = vmatprep.subr.bf16.mxu0 %v765_v0  ;;  %285 = vmatprep.subr.bf16.mxu1 %v765_v0  ;;  %v746_v33 = vld [vmem:[%s1083_s0 + $0xa8] ss:$8 sps:$4 sm:$0xff]   ;;  %v751_v35 = vld [vmem:[%s1083_s0 + $0xbc] ss:$8 sps:$4 sm:$0xff]   ;;  %v754_v37 = vld [vmem:[%s1083_s0 + $0xb8] ss:$8 sps:$4 sm:$0xff]  }
   0xc   :  { %v755_v38 = vld [vmem:[%s1083_s0 + $0x94] ss:$8 sps:$4 sm:$0xff]   ;;  %v678_v40 = vld [vmem:[%s1083_s0 + $0xa0] sm:$0x11]  ;;  %v759_v42 = vld [vmem:[%s1083_s0 + $0x90] ss:$8 sps:$4 sm:$0xff]  }
   0xd   :  { %v757_v39 = vld [vmem:[%s1083_s0 + $0xcc] ss:$8 sps:$4 sm:$0xff]   ;;  %v697_v41 = vld [vmem:[%s1083_s0 + $0xd8] sm:$0x11]  ;;  %v760_v43 = vld [vmem:[%s1083_s0 + $0xc8] ss:$8 sps:$4 sm:$0xff]   ;;  %v686_v44 = vcombine.high %v678_v40, %v678_v40  ;;  %v685_v46 = vcombine.low %v678_v40, %v678_v40 }
   0xe   :  { %162 = vmatpush1.bf16.msra.mxu0 %v816_v4  ;;  %286 = vmatpush1.bf16.msra.mxu1 %v816_v4  ;;  %v705_v45 = vcombine.high %v697_v41, %v697_v41  ;;  %v704_v47 = vcombine.low %v697_v41, %v697_v41 }
   0xf   :  { %163 = vmatprep.subr.bf16.mxu0 %v765_v0  ;;  %287 = vmatprep.subr.bf16.mxu1 %v765_v0 }
  0x12   :  { %164 = vmatpush1.bf16.msra.mxu0 %v832_v7  ;;  %288 = vmatpush1.bf16.msra.mxu1 %v832_v7 }
  0x13   :  { %165 = vmatprep.subr.bf16.mxu0 %v765_v0  ;;  %289 = vmatprep.subr.bf16.mxu1 %v765_v0 }
  0x16   :  { %166 = vmatpush1.bf16.msra.mxu0 %v842_v8  ;;  %290 = vmatpush1.bf16.msra.mxu1 %v842_v8 }
  0x17   :  { %167 = vmatprep.subr.bf16.mxu0 %v765_v0  ;;  %291 = vmatprep.subr.bf16.mxu1 %v765_v0 }
  0x1a   :  { %168 = vmatpush1.bf16.msra.mxu0 %v851_v9  ;;  %292 = vmatpush1.bf16.msra.mxu1 %v851_v9 }
  0x1b   :  { %169 = vmatprep.subr.bf16.mxu0 %v765_v0  ;;  %293 = vmatprep.subr.bf16.mxu1 %v765_v0 }
  0x1e   :  { %170 = vmatpush1.bf16.msra.mxu0 %v860_v10  ;;  %294 = vmatpush1.bf16.msra.mxu1 %v860_v10 }
  0x1f   :  { %183 = vmatprep.subr.bf16.mxu0 %v765_v0  ;;  %307 = vmatprep.subr.bf16.mxu1 %v765_v0 }
  0x22   :  { %184 = vmatpush2.bf16.msra.mxu0 %v871_v12  ;;  %308 = vmatpush2.bf16.msra.mxu1 %v871_v12 }
  0x23   :  { %185 = vmatprep.subr.bf16.mxu0 %v765_v0  ;;  %309 = vmatprep.subr.bf16.mxu1 %v765_v0 }
  0x26   :  { %186 = vmatpush2.bf16.msra.mxu0 %v878_v13  ;;  %310 = vmatpush2.bf16.msra.mxu1 %v878_v13 }
  0x27   :  { %410 = vmatprep.subr.bf16.mxu0 %v765_v0  ;;  %541 = vmatprep.subr.bf16.mxu1 %v765_v0 }
  0x29   :  { %188 = vmatmul.mubr.bf16.vlgmr.msra.gmra.mxu0 %v721_v14  ;;  %312 = vmatmul.mubr.bf16.vlgmr.msra.gmra.mxu1 %v724_v15 }
  0x2a   :  { %411 = vmatpush1.bf16.msra.mxu0 %v791_v1  ;;  %542 = vmatpush1.bf16.msra.mxu1 %v791_v1 }
  0x2b   :  { %412 = vmatprep.subr.bf16.mxu0 %v765_v0  ;;  %543 = vmatprep.subr.bf16.mxu1 %v765_v0 }
  0x2c   :  { %650 = vmatprep.mubr.msk.bf16.mxu0 %vm138_vm0, %v727_v16  ;;  %669 = vmatprep.mubr.msk.bf16.mxu1 %vm138_vm0, %v730_v17  ;;  %v1027_v16 = vld [vmem:[%s1084_s2] ss:$0 sm:$0xff] }
  0x2e   :  { %413 = vmatpush1.bf16.msra.mxu0 %v798_v2  ;;  %544 = vmatpush1.bf16.msra.mxu1 %v798_v2 }
  0x2f   :  { %414 = vmatprep.subr.bf16.mxu0 %v765_v0  ;;  %545 = vmatprep.subr.bf16.mxu1 %v765_v0 }
  0x31   :  { %196 = vmatmul.mubr.bf16.gmra.mxu0 %v729_v18  ;;  %320 = vmatmul.mubr.bf16.gmra.mxu1 %v732_v19 }
  0x32   :  { %415 = vmatpush1.bf16.msra.mxu0 %v807_v3  ;;  %546 = vmatpush1.bf16.msra.mxu1 %v807_v3 }
  0x33   :  { %416 = vmatprep.subr.bf16.mxu0 %v765_v0  ;;  %547 = vmatprep.subr.bf16.mxu1 %v765_v0 }
  0x34   :  { %651 = vmatprep.mubr.msk.bf16.mxu0 %vm138_vm0, %v733_v20  ;;  %670 = vmatprep.mubr.msk.bf16.mxu1 %vm138_vm0, %v736_v21 }
  0x36   :  { %417 = vmatpush1.bf16.msra.mxu0 %v816_v4  ;;  %548 = vmatpush1.bf16.msra.mxu1 %v816_v4 }
  0x37   :  { %418 = vmatprep.subr.bf16.mxu0 %v765_v0  ;;  %549 = vmatprep.subr.bf16.mxu1 %v765_v0 }
  0x39   :  { %204 = vmatmul.mubr.bf16.gmra.mxu0 %v735_v22  ;;  %328 = vmatmul.mubr.bf16.gmra.mxu1 %v738_v23 }
  0x3a   :  { %419 = vmatpush1.bf16.msra.mxu0 %v832_v7  ;;  %550 = vmatpush1.bf16.msra.mxu1 %v832_v7 }
  0x3b   :  { %420 = vmatprep.subr.bf16.mxu0 %v765_v0  ;;  %551 = vmatprep.subr.bf16.mxu1 %v765_v0 }
  0x3c   :  { %652 = vmatprep.mubr.msk.bf16.mxu0 %vm138_vm0, %v638_v26  ;;  %671 = vmatprep.mubr.msk.bf16.mxu1 %vm138_vm0, %v667_v27 }
  0x3e   :  { %421 = vmatpush1.bf16.msra.mxu0 %v842_v8  ;;  %552 = vmatpush1.bf16.msra.mxu1 %v842_v8 }
  0x3f   :  { %422 = vmatprep.subr.bf16.mxu0 %v765_v0  ;;  %553 = vmatprep.subr.bf16.mxu1 %v765_v0 }
  0x41   :  { %212 = vmatmul.mubr.bf16.gmra.mxu0 %v637_v28  ;;  %336 = vmatmul.mubr.bf16.gmra.mxu1 %v666_v29 }
  0x42   :  { %423 = vmatpush1.bf16.msra.mxu0 %v851_v9  ;;  %554 = vmatpush1.bf16.msra.mxu1 %v851_v9 }
  0x43   :  { %424 = vmatprep.subr.bf16.mxu0 %v765_v0  ;;  %555 = vmatprep.subr.bf16.mxu1 %v765_v0 }
  0x44   :  { %687 = vmatprep.mubr.msk.bf16.mxu0 %vm138_vm0, %v745_v30  ;;  %706 = vmatprep.mubr.msk.bf16.mxu1 %vm138_vm0, %v748_v31 }
  0x46   :  { %425 = vmatpush1.bf16.msra.mxu0 %v860_v10  ;;  %556 = vmatpush1.bf16.msra.mxu1 %v860_v10 }
  0x47   :  { %438 = vmatprep.subr.bf16.mxu0 %v765_v0  ;;  %569 = vmatprep.subr.bf16.mxu1 %v765_v0 }
  0x4a   :  { %439 = vmatpush2.bf16.msra.mxu0 %v871_v12  ;;  %570 = vmatpush2.bf16.msra.mxu1 %v871_v12 }
  0x4b   :  { %440 = vmatprep.subr.bf16.mxu0 %v765_v0  ;;  %571 = vmatprep.subr.bf16.mxu1 %v765_v0 }
  0x4e   :  { %441 = vmatpush2.bf16.msra.mxu0 %v878_v13  ;;  %572 = vmatpush2.bf16.msra.mxu1 %v878_v13 }
  0x51   :  { %443 = vmatmul.mubr.bf16.vlgmr.msra.gmra.mxu0 %v743_v32  ;;  %574 = vmatmul.mubr.bf16.vlgmr.msra.gmra.mxu1 %v746_v33 }
  0x52   :  { %688 = vmatprep.mubr.msk.bf16.mxu0 %vm138_vm0, %v749_v34  ;;  %707 = vmatprep.mubr.msk.bf16.mxu1 %vm138_vm0, %v751_v35 }
  0x59   :  { %451 = vmatmul.mubr.bf16.gmra.mxu0 %v753_v36  ;;  %582 = vmatmul.mubr.bf16.gmra.mxu1 %v754_v37 }
  0x5a   :  { %689 = vmatprep.mubr.msk.bf16.mxu0 %vm138_vm0, %v755_v38  ;;  %708 = vmatprep.mubr.msk.bf16.mxu1 %vm138_vm0, %v757_v39 }
  0x61   :  { %459 = vmatmul.mubr.bf16.gmra.mxu0 %v759_v42  ;;  %590 = vmatmul.mubr.bf16.gmra.mxu1 %v760_v43 }
  0x62   :  { %690 = vmatprep.mubr.msk.bf16.mxu0 %vm138_vm0, %v686_v44  ;;  %709 = vmatprep.mubr.msk.bf16.mxu1 %vm138_vm0, %v705_v45 }
  0x69   :  { %467 = vmatmul.mubr.bf16.gmra.mxu0 %v685_v46  ;;  %598 = vmatmul.mubr.bf16.gmra.mxu1 %v704_v47 }
  0xe9   :  { %v189_v48 = vpop.f32.mrf.mxu0  ;;  %v313_v49 = vpop.f32.mrf.mxu1 }
  0xea   :  { %v190_v17 = vadd.f32 %v1027_v16, %v189_v48  ;;  %v314_v18 = vadd.f32 %v1027_v16, %v313_v49 }
  0xeb   :  { %v191_v50 = vpop.f32.mrf.mxu0  ;;  %v315_v51 = vpop.f32.mrf.mxu1 }
  0xec   :  { %v219_v19 = vmax.f32 %v190_v17, 0.0  ;;  %v343_v20 = vmax.f32 %v314_v18, 0.0 }
  0xed   :  { %v192_v52 = vpop.f32.mrf.mxu0  ;;  %v316_v53 = vpop.f32.mrf.mxu1 }
  0xee   :  { %v193_v21 = vadd.f32 %v1027_v16, %v192_v52  ;;  %v317_v22 = vadd.f32 %v1027_v16, %v316_v53  ;;  %v350_v27 = vmax.f32 %v219_v19, %v343_v20 }
  0xef   :  { %v194_v54 = vpop.f32.mrf.mxu0  ;;  %v318_v55 = vpop.f32.mrf.mxu1 }
  0xf0   :  { %v220_v32 = vmax.f32 %v193_v21, 0.0  ;;  %v344_v33 = vmax.f32 %v317_v22, 0.0 }
  0xf1   :  { %v197_v56 = vpop.f32.mrf.mxu0  ;;  %v321_v57 = vpop.f32.mrf.mxu1 }
  0xf2   :  { %v198_v28 = vadd.f32 %v1027_v16, %v197_v56  ;;  %v322_v29 = vadd.f32 %v1027_v16, %v321_v57  ;;  %v351_v46 = vmax.f32 %v220_v32, %v344_v33 }
  0xf3   :  { %v199_v58 = vpop.f32.mrf.mxu0  ;;  %v323_v59 = vpop.f32.mrf.mxu1 }
  0xf4   :  { %v221_v41 = vmax.f32 %v198_v28, 0.0  ;;  %v345_v42 = vmax.f32 %v322_v29, 0.0 }
  0xf5   :  { %v200_v60 = vpop.f32.mrf.mxu0  ;;  %v324_v61 = vpop.f32.mrf.mxu1 }
  0xf6   :  { %v201_v43 = vadd.f32 %v1027_v16, %v200_v60  ;;  %v325_v47 = vadd.f32 %v1027_v16, %v324_v61  ;;  %v352_v56 = vmax.f32 %v221_v41, %v345_v42 }
  0xf7   :  { %v202_v62 = vpop.f32.mrf.mxu0  ;;  %v326_v63 = vpop.f32.mrf.mxu1 }
  0xf8   :  { %v222_v57 = vmax.f32 %v201_v43, 0.0  ;;  %v346_v62 = vmax.f32 %v325_v47, 0.0 }
  0xf9   :  { %v205_v0 = vpop.f32.mrf.mxu0  ;;  %v329_v1 = vpop.f32.mrf.mxu1 }
  0xfa   :  { %v206_v58 = vadd.f32 %v1027_v16, %v205_v0  ;;  %v330_v59 = vadd.f32 %v1027_v16, %v329_v1  ;;  %v353_v18 = vmax.f32 %v222_v57, %v346_v62 }
  0xfb   :  { %v207_v2 = vpop.f32.mrf.mxu0  ;;  %v331_v3 = vpop.f32.mrf.mxu1 }
  0xfc   :  { %v223_v0 = vmax.f32 %v206_v58, 0.0 }
  0xfd   :  { %v1016_v4 = vpop.f32.mrf.mxu0  ;;  %v1018_v5 = vpop.f32.mrf.mxu1 }
  0xfe   :  { %v209_v1 = vadd.f32 %v1027_v16, %v1016_v4 }
  0xff   :  { %v210_v6 = vpop.f32.mrf.mxu0  ;;  %v334_v7 = vpop.f32.mrf.mxu1 }
 0x101   :  { %v1020_v8 = vpop.f32.mrf.mxu0  ;;  %v1022_v9 = vpop.f32.mrf.mxu1 }
 0x102   :  { %v214_v28 = vadd.f32 %v1027_v16, %v1020_v8 }
 0x103   :  { %v215_v10 = vpop.f32.mrf.mxu0  ;;  %v339_v11 = vpop.f32.mrf.mxu1 }
 0x104   :  { %v225_v42 = vmax.f32 %v214_v28, 0.0 }
 0x105   :  { %v216_v12 = vpop.f32.mrf.mxu0  ;;  %v340_v13 = vpop.f32.mrf.mxu1 }
 0x106   :  { %v347_v13 = vmax.f32 %v330_v59, 0.0 }
 0x107   :  { %v217_v14 = vpop.f32.mrf.mxu0  ;;  %v341_v15 = vpop.f32.mrf.mxu1 }
 0x108   :  { %v333_v14 = vadd.f32 %v1027_v16, %v1018_v5 }
 0x10a   :  { %v348_v5 = vmax.f32 %v333_v14, 0.0 }
 0x111   :  { %v444_v23 = vpop.f32.mrf.mxu0  ;;  %v575_v24 = vpop.f32.mrf.mxu1 }
 0x112   :  { %v445_v25 = vadd.f32 %v1027_v16, %v444_v23  ;;  %v576_v26 = vadd.f32 %v1027_v16, %v575_v24 }
 0x113   :  { %v446_v30 = vpop.f32.mrf.mxu0  ;;  %v577_v31 = vpop.f32.mrf.mxu1 }
 0x114   :  { %v474_v34 = vmax.f32 %v445_v25, 0.0  ;;  %v605_v35 = vmax.f32 %v576_v26, 0.0  ;;  %v354_v26 = vmax.f32 %v223_v0, %v347_v13  ;;  %v338_v31 = vadd.f32 %v1027_v16, %v1022_v9 }
 0x115   :  { %v447_v36 = vpop.f32.mrf.mxu0  ;;  %v578_v37 = vpop.f32.mrf.mxu1 }
 0x116   :  { %v481_v38 = vmax.f32 %v350_v27, %v474_v34  ;;  %v448_v39 = vadd.f32 %v1027_v16, %v447_v36  ;;  %v579_v40 = vadd.f32 %v1027_v16, %v578_v37  ;;  %v224_v27 = vmax.f32 %v209_v1, 0.0 }
 0x117   :  { %v449_v44 = vpop.f32.mrf.mxu0  ;;  %v580_v45 = vpop.f32.mrf.mxu1  ;;  %v349_v43 = vmax.f32 %v338_v31, 0.0 }
 0x118   :  { %v612_v48 = vmax.f32 %v481_v38, %v605_v35  ;;  %v475_v49 = vmax.f32 %v448_v39, 0.0  ;;  %v606_v53 = vmax.f32 %v579_v40, 0.0  ;;  %v355_v8 = vmax.f32 %v224_v27, %v348_v5 }
 0x119   :  { %v452_v50 = vpop.f32.mrf.mxu0  ;;  %v583_v51 = vpop.f32.mrf.mxu1 }
 0x11a   :  { %619 = vst [vmem:[%s1085_s3] sm:$0xff] %v612_v48  ;;  %v482_v52 = vmax.f32 %v351_v46, %v475_v49  ;;  %v453_v54 = vadd.f32 %v1027_v16, %v452_v50  ;;  %v584_v55 = vadd.f32 %v1027_v16, %v583_v51 }
 0x11b   :  { %v454_v60 = vpop.f32.mrf.mxu0  ;;  %v585_v61 = vpop.f32.mrf.mxu1 }
 0x11c   :  { %v613_v63 = vmax.f32 %v482_v52, %v606_v53  ;;  %v476_v2 = vmax.f32 %v453_v54, 0.0  ;;  %v607_v3 = vmax.f32 %v584_v55, 0.0  ;;  %v356_v53 = vmax.f32 %v225_v42, %v349_v43 }
 0x11d   :  { %v455_v6 = vpop.f32.mrf.mxu0  ;;  %v586_v7 = vpop.f32.mrf.mxu1 }
 0x11e   :  { %620 = vst [vmem:[%s1085_s3 + $0x8] sm:$0xff] %v613_v63  ;;  %v483_v10 = vmax.f32 %v352_v56, %v476_v2  ;;  %v456_v11 = vadd.f32 %v1027_v16, %v455_v6  ;;  %v587_v12 = vadd.f32 %v1027_v16, %v586_v7 }
 0x11f   :  { %v457_v15 = vpop.f32.mrf.mxu0  ;;  %v588_v17 = vpop.f32.mrf.mxu1 }
 0x120   :  { %v614_v19 = vmax.f32 %v483_v10, %v607_v3  ;;  %v477_v20 = vmax.f32 %v456_v11, 0.0  ;;  %v608_v24 = vmax.f32 %v587_v12, 0.0 }
 0x121   :  { %v460_v21 = vpop.f32.mrf.mxu0  ;;  %v591_v22 = vpop.f32.mrf.mxu1 }
 0x122   :  { %621 = vst [vmem:[%s1085_s3 + $0x10] sm:$0xff] %v614_v19  ;;  %v484_v23 = vmax.f32 %v353_v18, %v477_v20  ;;  %v461_v25 = vadd.f32 %v1027_v16, %v460_v21  ;;  %v592_v4 = vadd.f32 %v1027_v16, %v591_v22 }
 0x123   :  { %v462_v29 = vpop.f32.mrf.mxu0  ;;  %v593_v30 = vpop.f32.mrf.mxu1 }
 0x124   :  { %v615_v32 = vmax.f32 %v484_v23, %v608_v24  ;;  %v478_v33 = vmax.f32 %v461_v25, 0.0  ;;  %v609_v34 = vmax.f32 %v592_v4, 0.0 }
 0x125   :  { %v463_v35 = vpop.f32.mrf.mxu0  ;;  %v594_v36 = vpop.f32.mrf.mxu1 }
 0x126   :  { %622 = vst [vmem:[%s1085_s3 + $0x18] sm:$0xff] %v615_v32  ;;  %v485_v37 = vmax.f32 %v354_v26, %v478_v33  ;;  %v464_v38 = vadd.f32 %v1027_v16, %v463_v35  ;;  %v595_v39 = vadd.f32 %v1027_v16, %v594_v36 }
 0x127   :  { %v465_v40 = vpop.f32.mrf.mxu0  ;;  %v596_v41 = vpop.f32.mrf.mxu1 }
 0x128   :  { %v616_v9 = vmax.f32 %v485_v37, %v609_v34  ;;  %v479_v44 = vmax.f32 %v464_v38, 0.0  ;;  %v610_v48 = vmax.f32 %v595_v39, 0.0 }
 0x129   :  { %v468_v45 = vpop.f32.mrf.mxu0  ;;  %v599_v46 = vpop.f32.mrf.mxu1 }
 0x12a   :  { %623 = vst [vmem:[%s1085_s3 + $0x20] sm:$0xff] %v616_v9  ;;  %v486_v47 = vmax.f32 %v355_v8, %v479_v44  ;;  %v469_v49 = vadd.f32 %v1027_v16, %v468_v45  ;;  %v600_v50 = vadd.f32 %v1027_v16, %v599_v46 }
 0x12b   :  { %v470_v51 = vpop.f32.mrf.mxu0  ;;  %v601_v52 = vpop.f32.mrf.mxu1 }
 0x12c   :  { %v617_v54 = vmax.f32 %v486_v47, %v610_v48  ;;  %v480_v55 = vmax.f32 %v469_v49, 0.0  ;;  %v611_v56 = vmax.f32 %v600_v50, 0.0 }
 0x12d   :  { %v471_v57 = vpop.f32.mrf.mxu0  ;;  %v602_v58 = vpop.f32.mrf.mxu1 }
 0x12e   :  { %624 = vst [vmem:[%s1085_s3 + $0x28] sm:$0xff] %v617_v54  ;;  %v487_v59 = vmax.f32 %v356_v53, %v480_v55 }
 0x12f   :  { %v472_v60 = vpop.f32.mrf.mxu0  ;;  %v603_v61 = vpop.f32.mrf.mxu1 }
 0x130   :  { %v618_v62 = vmax.f32 %v487_v59, %v611_v56 }
 0x132   :  { %625 = vst [vmem:[%s1085_s3 + $0x30] sm:$0x3] %v618_v62 }

// kernel: lenet5_forward.5
= control target key start
LH: loop header
LB: loop body
LE: loop exit
PB: predicated region body
PF: predicated region fallthrough
CT: control target
= control target key end

     0   :  { %v783_v1 = vmov 0   ;;  %v98_v20 = vlaneseq  ;;  %v784_v25 = vmov 1966171168   ;;  %vm264_vm0 = vcmask 130048   ;;  %s993_s0 = inlined_call_operand.vmem [shape: bf16[2,400], index: 0, kind: input, shape index: {}]   ;;  %s994_s1 = inlined_call_operand.vmem [shape: bf16[400,128], index: 1, kind: input, shape index: {}]   ;;  %s995_s2 = inlined_call_operand.vmem [shape: f32[1,128], index: 2, kind: input, shape index: {}]   ;;  %s996_s3 = inlined_call_operand.vmem [shape: bf16[128,128], index: 3, kind: input, shape index: {}]   ;;  %s997_s4 = inlined_call_operand.vmem [shape: f32[1,128], index: 4, kind: input, shape index: {}]   ;;  %s998_s5 = inlined_call_operand.vmem [shape: bf16[128,128], index: 5, kind: input, shape index: {}]   ;;  %s999_s6 = inlined_call_operand.vmem [shape: f32[1,128], index: 6, kind: input, shape index: {}]   ;;  %s1000_s7 = inlined_call_operand.hbm [shape: f32[2,128], index: 7, kind: output, shape index: {}]  }
   0x1   :  { %v720_v0 = vld [vmem:[%s994_s1 + $0x78] sm:$0xff]   ;;  %308 = vmatprep.subr.bf16.mxu1 %v783_v1  ;;  %v723_v4 = vld [vmem:[%s994_s1 + $0x70] sm:$0xff]   ;;  %v726_v7 = vld [vmem:[%s994_s1 + $0x68] sm:$0xff]   ;;  %v96_v26 = vunpack.c.l.s4 %v784_v25  ;;  %v785_v38 = vmov 0.0  }
   0x2   :  { %v721_v2 = vld [vmem:[%s994_s1 + $0xb8] sm:$0xff]   ;;  %635 = vmatprep.subr.bf16.mxu0 %v720_v0  ;;  %v724_v5 = vld [vmem:[%s994_s1 + $0xb0] sm:$0xff]   ;;  %v727_v8 = vld [vmem:[%s994_s1 + $0xa8] sm:$0xff]   ;;  %v99_v27 = vshrl.u32 %v98_v20, 7 }
   0x3   :  { %v722_v3 = vld [vmem:[%s994_s1 + $0x38] sm:$0xff]   ;;  %309 = vmatpush1.bf16.msra.mxu1 %v721_v2  ;;  %v725_v6 = vld [vmem:[%s994_s1 + $0x30] sm:$0xff]   ;;  %v728_v9 = vld [vmem:[%s994_s1 + $0x28] sm:$0xff]   ;;  %v97_v30 = vunpack.c.0.s8 %v96_v26 }
   0x4   :  { %636 = vmatpush3.bf16.msra.mxu0 %v722_v3  ;;  %310 = vmatprep.subr.bf16.mxu1 %v783_v1  ;;  %v729_v10 = vld [vmem:[%s994_s1 + $0x60] sm:$0xff]   ;;  %v732_v13 = vld [vmem:[%s994_s1 + $0x58] sm:$0xff]   ;;  %v735_v16 = vld [vmem:[%s994_s1 + $0x50] sm:$0xff]  }
   0x5   :  { %637 = vmatprep.subr.bf16.mxu0 %v723_v4  ;;  %v730_v11 = vld [vmem:[%s994_s1 + $0xa0] sm:$0xff]   ;;  %v733_v14 = vld [vmem:[%s994_s1 + $0x98] sm:$0xff]   ;;  %v736_v17 = vld [vmem:[%s994_s1 + $0x90] sm:$0xff]   ;;  %v100_v32 = vsub.s32 %v97_v30, %v99_v27 }
   0x6   :  { %v731_v12 = vld [vmem:[%s994_s1 + $0x20] sm:$0xff]   ;;  %v734_v15 = vld [vmem:[%s994_s1 + $0x18] sm:$0xff]   ;;  %v737_v18 = vld [vmem:[%s994_s1 + $0x10] sm:$0xff]  }
   0x7   :  { %311 = vmatpush1.bf16.msra.mxu1 %v724_v5  ;;  %v738_v19 = vld [vmem:[%s994_s1 + $0x48] sm:$0xff]   ;;  %v590_v23 = vld.sshfl [vmem:[%s993_s0] sm:$0x33 pattern:$0x75316420]  ;;  %v745_v34 = vld [vmem:[%s996_s3 + $0x38] sm:$0xff]  }
   0x8   :  { %638 = vmatpush3.bf16.msra.mxu0 %v725_v6  ;;  %312 = vmatprep.subr.bf16.mxu1 %v783_v1  ;;  %v739_v21 = vld [vmem:[%s994_s1 + $0x88] sm:$0xff]   ;;  %v741_v24 = vld [vmem:[%s994_s1 + $0x40] sm:$0xff]   ;;  %v94_v29 = vcombine.high %v590_v23, %v590_v23  ;;  %v101_v36 = vrot.slane %v590_v23, %v100_v32  ;;  %v746_v40 = vld [vmem:[%s996_s3 + $0x30] sm:$0xff]  }
   0x9   :  { %639 = vmatprep.subr.bf16.mxu0 %v726_v7  ;;  %v740_v22 = vld [vmem:[%s994_s1 + $0x8] sm:$0xff]   ;;  %v742_v28 = vld [vmem:[%s994_s1 + $0x80] sm:$0xff]  }
   0xa   :  { %v743_v31 = vld [vmem:[%s994_s1] sm:$0xff]   ;;  %v108_v35 = vrot.slane %v94_v29, %v100_v32  ;;  %v109_v39 = vcombine.high %v101_v36, %v101_v36 }
   0xb   :  { %313 = vmatpush1.bf16.msra.mxu1 %v727_v8  ;;  %v744_v33 = vld [vmem:[%s994_s1 + $0xc0] sm:$0xff]  }
   0xc   :  { %640 = vmatpush3.bf16.msra.mxu0 %v728_v9  ;;  %314 = vmatprep.subr.bf16.mxu1 %v783_v1  ;;  %v110_v37 = vcombine.high %v108_v35, %v108_v35 }
   0xd   :  { %641 = vmatprep.subr.bf16.mxu0 %v729_v10  ;;  %300 = vmatprep.mubr.bf16.mxu0 %v108_v35 }
   0xe   :  { %616 = vmatprep.mubr.msk.bf16.mxu1 %vm264_vm0, %v110_v37 }
   0xf   :  { %315 = vmatpush1.bf16.msra.mxu1 %v730_v11 }
  0x10   :  { %642 = vmatpush3.bf16.msra.mxu0 %v731_v12  ;;  %316 = vmatprep.subr.bf16.mxu1 %v783_v1 }
  0x11   :  { %643 = vmatprep.subr.bf16.mxu0 %v732_v13 }
  0x13   :  { %317 = vmatpush1.bf16.msra.mxu1 %v733_v14 }
  0x14   :  { %644 = vmatpush3.bf16.msra.mxu0 %v734_v15  ;;  %318 = vmatprep.subr.bf16.mxu1 %v783_v1 }
  0x15   :  { %645 = vmatprep.subr.bf16.mxu0 %v735_v16 }
  0x17   :  { %319 = vmatpush1.bf16.msra.mxu1 %v736_v17 }
  0x18   :  { %646 = vmatpush3.bf16.msra.mxu0 %v737_v18  ;;  %320 = vmatprep.subr.bf16.mxu1 %v783_v1 }
  0x19   :  { %647 = vmatprep.subr.bf16.mxu0 %v738_v19 }
  0x1b   :  { %321 = vmatpush1.bf16.msra.mxu1 %v739_v21 }
  0x1c   :  { %648 = vmatpush3.bf16.msra.mxu0 %v740_v22  ;;  %322 = vmatprep.subr.bf16.mxu1 %v783_v1 }
  0x1d   :  { %649 = vmatprep.subr.bf16.mxu0 %v741_v24 }
  0x1f   :  { %323 = vmatpush1.bf16.msra.mxu1 %v742_v28 }
  0x20   :  { %650 = vmatpush3.bf16.msra.mxu0 %v743_v31  ;;  %338 = vmatprep.subr.bf16.mxu1 %v783_v1 }
  0x21   :  { %675 = vmatprep.subr.bf16.mxu0 %v785_v38 }
  0x23   :  { %301 = vmatmul.mubr.bf16.vlgmr.msra.gmra.mxu0 %v101_v36  ;;  %339 = vmatpush2.bf16.msra.mxu1 %v744_v33 }
  0x24   :  { %676 = vmatpush3.bf16.msra.mxu0 %v745_v34  ;;  %695 = vmatprep.subr.bf16.mxu1 %v785_v38 }
  0x25   :  { %677 = vmatprep.subr.bf16.mxu0 %v785_v38 }
  0x26   :  { %341 = vmatmul.mubr.bf16.vlgmr.msra.gmra.mxu1 %v109_v39 }
  0x27   :  { %12 = vsyncpa [#allocation3], 0  ;;  %v747_v41 = vld [vmem:[%s996_s3 + $0x28] sm:$0xff]   ;;  %v748_v42 = vld [vmem:[%s996_s3 + $0x20] sm:$0xff]   ;;  %vm786_vm1 = vmmov 0   ;;  %s787_s16 = smov [#allocation2]  }
  0x28   :  { %678 = vmatpush3.bf16.msra.mxu0 %v746_v40  ;;  %v749_v43 = vld [vmem:[%s996_s3 + $0x18] sm:$0xff]   ;;  %v750_v44 = vld [vmem:[%s996_s3 + $0x10] sm:$0xff]   ;;  %v751_v45 = vld [vmem:[%s996_s3 + $0x8] sm:$0xff]   ;;  %691 = vmatprep.mubr.msk.bf16.mxu0 %vm786_vm1, %v785_v38  ;;  %s581_s17 = sshll.u32 %s787_s16, 4  ;;  %s582_s17 = int_to_ptr.vmem [resolvable:$true] %s581_s17 }
  0x29   :  { %679 = vmatprep.subr.bf16.mxu0 %v785_v38  ;;  %v752_v46 = vld [vmem:[%s996_s3] sm:$0xff]   ;;  %711 = vmatprep.mubr.msk.bf16.mxu1 %vm786_vm1, %v785_v38  ;;  %v753_v47 = vld [vmem:[%s998_s5 + $0x38] sm:$0xff]   ;;  %v754_v48 = vld [vmem:[%s998_s5 + $0x30] sm:$0xff]   ;;  %p766_p1 = scmp.lt.s32.totalorder %s582_s17, %s582_s17 }
  0x2a   :  { %696 = vmatpush3.bf16.msra.mxu1 %v753_v47  ;;  %v755_v49 = vld [vmem:[%s998_s5 + $0x28] sm:$0xff]   ;;  %v756_v50 = vld [vmem:[%s998_s5 + $0x20] sm:$0xff]   ;;  %v757_v51 = vld [vmem:[%s998_s5 + $0x18] sm:$0xff]  }
  0x2b   :  { %697 = vmatprep.subr.bf16.mxu1 %v785_v38  ;;  %v758_v52 = vld [vmem:[%s998_s5 + $0x10] sm:$0xff]   ;;  %v589_v55 = vld [vmem:[%s995_s2] ss:$0 sm:$0xff]  ;;  %v759_v3 = vld [vmem:[%s998_s5 + $0x8] sm:$0xff]  }
  0x2c   :  { %680 = vmatpush3.bf16.msra.mxu0 %v747_v41  ;;  %v760_v4 = vld [vmem:[%s998_s5] sm:$0xff]  }
  0x2d   :  { %681 = vmatprep.subr.bf16.mxu0 %v785_v38  ;;  %v617_v5 = vld [vmem:[%s997_s4] ss:$0 sm:$0xff]  ;;  %s761_s4 = scalar_lea.vmem %s582_s17, 32 }
  0x2e   :  { %698 = vmatpush3.bf16.msra.mxu1 %v754_v48  ;;  %v626_v13 = vld [vmem:[%s999_s6] ss:$0 sm:$0xff]  ;;  %p762_p0 = scmp.ne.s32.totalorder %s582_s17, %s761_s4  ;;  %p767_p2 = scmp.lt.s32.totalorder %s761_s4, %s761_s4 }
  0x2f   :  { %699 = vmatprep.subr.bf16.mxu1 %v785_v38 }
  0x30   :  { %682 = vmatpush3.bf16.msra.mxu0 %v748_v42  ;;  %p768_p3 = por %p767_p2, %p766_p1 }
  0x31   :  { %683 = vmatprep.subr.bf16.mxu0 %v785_v38 }
  0x32   :  { %700 = vmatpush3.bf16.msra.mxu1 %v755_v49  ;;  %p769_p4 = pnand %p768_p3, %p762_p0 }
  0x33   :  { %701 = vmatprep.subr.bf16.mxu1 %v785_v38 }
  0x34   :  { %684 = vmatpush3.bf16.msra.mxu0 %v749_v43 }
  0x35   :  { %685 = vmatprep.subr.bf16.mxu0 %v785_v38 }
  0x36   :  { %702 = vmatpush3.bf16.msra.mxu1 %v756_v50 }
  0x37   :  { %703 = vmatprep.subr.bf16.mxu1 %v785_v38 }
  0x38   :  { %686 = vmatpush3.bf16.msra.mxu0 %v750_v44 }
  0x39   :  { %687 = vmatprep.subr.bf16.mxu0 %v785_v38 }
  0x3a   :  { %704 = vmatpush3.bf16.msra.mxu1 %v757_v51 }
  0x3b   :  { %705 = vmatprep.subr.bf16.mxu1 %v785_v38 }
  0x3c   :  { %688 = vmatpush3.bf16.msra.mxu0 %v751_v45 }
  0x3d   :  { %689 = vmatprep.subr.bf16.mxu0 %v785_v38 }
  0x3e   :  { %706 = vmatpush3.bf16.msra.mxu1 %v758_v52 }
  0x3f   :  { %707 = vmatprep.subr.bf16.mxu1 %v785_v38 }
  0x40   :  { %690 = vmatpush3.bf16.msra.mxu0 %v752_v46 }
  0x42   :  { %708 = vmatpush3.bf16.msra.mxu1 %v759_v3 }
  0x43   :  { %709 = vmatprep.subr.bf16.mxu1 %v785_v38 }
  0x46   :  { %710 = vmatpush3.bf16.msra.mxu1 %v760_v4 }
  0xe3   :  { %v651_v53 = vpop.f32.mrf.mxu0 }
  0xe5   :  { %v652_v54 = vpop.f32.mrf.mxu0 }
  0xe6   :  { %v653_v56 = vadd.f32 %v652_v54, %v651_v53  ;;  %v342_v57 = vpop.f32.mrf.mxu1 }
  0xe7   :  { %v654_v58 = vpop.f32.mrf.mxu0 }
  0xe8   :  { %v303_v59 = vadd.f32 %v653_v56, %v589_v55  ;;  %v344_v60 = vpop.f32.mrf.mxu1 }
  0xe9   :  { %v655_v61 = vpop.f32.mrf.mxu0 }
  0xea   :  { %v343_v62 = vadd.f32 %v342_v57, %v303_v59  ;;  %v345_v63 = vpop.f32.mrf.mxu1 }
  0xec   :  { %v348_v0 = vmax.f32 %v343_v62, 0.0  ;;  %v346_v1 = vpop.f32.mrf.mxu1 }
  0xee   :  { %v349_v2 = vpack.c.bf16 %v348_v0, %v348_v0 }
  0xf0   :  { %692 = vmatmul.mubr.bf16.vlgmr.msra.gmra.mxu0 %v349_v2 }
 0x1b0   :  { %v455_v6 = vpop.f32.mrf.mxu0 }
 0x1b1   :  { %v456_v7 = vadd.f32 %v617_v5, %v455_v6 }
 0x1b2   :  { %v693_v8 = vpop.f32.mrf.mxu0 }
 0x1b3   :  { %v461_v9 = vmax.f32 %v456_v7, 0.0 }
 0x1b4   :  { %v458_v10 = vpop.f32.mrf.mxu0 }
 0x1b5   :  { %v462_v11 = vpack.c.bf16 %v461_v9, %v461_v9 }
 0x1b6   :  { %v694_v12 = vpop.f32.mrf.mxu0 }
 0x1b7   :  { %712 = vmatmul.mubr.bf16.vlgmr.msra.gmra.mxu1 %v462_v11 }
 0x277   :  { %v568_v14 = vpop.f32.mrf.mxu1 }
 0x278   :  { %v569_v15 = vadd.f32 %v626_v13, %v568_v14 }
 0x279   :  { %v713_v16 = vpop.f32.mrf.mxu1 }
 0x27a   :  { %574 = vst [vmem:[#allocation2] sm:$0x3] %v569_v15 }
 0x27b   :  { %v571_v17 = vpop.f32.mrf.mxu1 }
 0x27c   :  { %772 = shalt.err (!%p769_p4)
}
 0x27d   :  { %584 = dma.vmem_to_hbm [thread:$0]  %s582_s17, 32, %s1000_s7, [#allocation3]   ;;  %v714_v18 = vpop.f32.mrf.mxu1 }
 0x27e   :  { %781 = dma.done.wait [#allocation3], 32  }
 0x27f   :  { %782 = vsyncadd [#allocation3], 4294967264 }
 0x280   :  { %588 = vsyncpa [#allocation3], 1 }

</bundles_post_ra>
